<compile_context>
chip_gen: v7x
topology: tpu7x:2x2x1
jax: 0.10.0
libtpu: 0.0.40
codegen_flags: <defaults>
</compile_context>

<pallas_src>
import functools

import jax
import jax.numpy as jnp
from jax.experimental import pallas as pl
from jax.experimental.pallas import tpu as pltpu

EPS = 1e-5
_VMEM = pl.BlockSpec(memory_space=pltpu.MemorySpace.VMEM)


# ----------------------------------------------------------------------------- kernels
def _conv_bn_relu_kernel(x_ref, w_ref, b_ref, g_ref, bt_ref, o_ref, *, eps):
    """Fused im2col-conv matmul + bias + BatchNorm(batch stats) + ReLU for one agent."""
    y = jnp.dot(x_ref[...], w_ref[...], preferred_element_type=jnp.float32) + b_ref[...]
    mean = jnp.mean(y, axis=0, keepdims=True)
    var = jnp.mean(jnp.square(y - mean), axis=0, keepdims=True)      # biased var (PyTorch BN)
    yn = (y - mean) * jax.lax.rsqrt(var + eps) * g_ref[...] + bt_ref[...]
    o_ref[...] = jnp.maximum(yn, 0.0).astype(o_ref.dtype)


def _single_head_kernel(x_ref, mask_ref, whqv_ref, bhqv_ref, wh_ref, bh_ref, wq_ref, bq_ref,
                        cat_ref, q_ref):
    """Fused SingleQ head for one agent: [hq|hv] matmul + SiLU, hidden + dropout mask, q + ReLU."""
    x = x_ref[...]                                                       # [N, lin_in] bf16
    z = jnp.dot(x, whqv_ref[...], preferred_element_type=jnp.float32) + bhqv_ref[...]
    cat = z * (1.0 / (1.0 + jnp.exp(-z)))                                # SiLU, [N, 2F] = [hq | hv]
    cat_ref[...] = cat
    h = jnp.dot(cat.astype(jnp.bfloat16), wh_ref[...],
                preferred_element_type=jnp.float32) + bh_ref[...]        # [N, F]
    h = h * mask_ref[...]                                                # dropout p=0.75 (pre-scaled mask)
    q = jnp.dot(h.astype(jnp.bfloat16), wq_ref[...],
                preferred_element_type=jnp.float32) + bq_ref[...]
    q_ref[...] = jnp.maximum(q, 0.0)


def _joint_q_kernel(x_ref, w1_ref, b1_ref, w2_ref, b2_ref, w3_ref, b3_ref, o_ref):
    x = x_ref[...].astype(jnp.bfloat16)
    h1 = jnp.maximum(jnp.dot(x, w1_ref[...], preferred_element_type=jnp.float32) + b1_ref[...], 0.0)
    h2 = jnp.maximum(jnp.dot(h1.astype(jnp.bfloat16), w2_ref[...],
                             preferred_element_type=jnp.float32) + b2_ref[...], 0.0)
    o = jnp.maximum(jnp.dot(h2.astype(jnp.bfloat16), w3_ref[...],
                            preferred_element_type=jnp.float32) + b3_ref[...], 0.0)
    o_ref[...] = o


def _joint_v_kernel(x_ref, w1_ref, b1_ref, w2_ref, b2_ref, w3_ref, b3_ref, o_ref, *, denom):
    x = x_ref[...].astype(jnp.bfloat16)
    h1 = jnp.maximum(jnp.dot(x, w1_ref[...], preferred_element_type=jnp.float32) + b1_ref[...], 0.0)
    h2 = jnp.maximum(jnp.dot(h1.astype(jnp.bfloat16), w2_ref[...],
                             preferred_element_type=jnp.float32) + b2_ref[...], 0.0)
    o = jnp.maximum(jnp.dot(h2.astype(jnp.bfloat16), w3_ref[...],
                            preferred_element_type=jnp.float32) + b3_ref[...], 0.0)
    row = jnp.sum(o, axis=1, keepdims=True)                              # lane reduce
    o_ref[...] = jnp.sum(row, axis=0, keepdims=True) * (1.0 / denom)     # sublane reduce -> (1,1)


# ----------------------------------------------------------------------------- wrappers
def conv_bn_relu_batched(patches, w, b, gamma, beta):
    """patches: [A, R, K] bf16; w: [A, K, Cout] bf16; b/gamma/beta: [A, 1, Cout] f32."""
    A, R, K = patches.shape
    Cout = w.shape[-1]
    kern = functools.partial(_conv_bn_relu_kernel, eps=EPS)
    return pl.pallas_call(
        kern,
        out_shape=jax.ShapeDtypeStruct((A, R, Cout), jnp.bfloat16),
        grid=(A,),
        in_specs=[
            pl.BlockSpec((None, R, K), lambda a: (a, 0, 0)),
            pl.BlockSpec((None, K, Cout), lambda a: (a, 0, 0)),
            pl.BlockSpec((None, 1, Cout), lambda a: (a, 0, 0)),
            pl.BlockSpec((None, 1, Cout), lambda a: (a, 0, 0)),
            pl.BlockSpec((None, 1, Cout), lambda a: (a, 0, 0)),
        ],
        out_specs=pl.BlockSpec((None, R, Cout), lambda a: (a, 0, 0)),
        compiler_params=pltpu.CompilerParams(dimension_semantics=("parallel",)),
    )(patches, w, b, gamma, beta)


def single_head_batched(flat, drop_mask, w_hqv, b_hqv, w_h, b_h, w_q, b_q):
    """flat: [A, N, lin_in] bf16; drop_mask: [A, N, F] f32 (pre-scaled keep mask).
    Returns (cat [A,N,2F] f32, q [A,N,actions] f32)."""
    A, N, K = flat.shape
    F2 = w_hqv.shape[-1]
    F = w_h.shape[-1]
    ACT = w_q.shape[-1]
    return pl.pallas_call(
        _single_head_kernel,
        out_shape=(jax.ShapeDtypeStruct((A, N, F2), jnp.float32),
                   jax.ShapeDtypeStruct((A, N, ACT), jnp.float32)),
        grid=(A,),
        in_specs=[
            pl.BlockSpec((None, N, K), lambda a: (a, 0, 0)),
            pl.BlockSpec((None, N, F), lambda a: (a, 0, 0)),
            pl.BlockSpec((None, K, F2), lambda a: (a, 0, 0)),
            pl.BlockSpec((None, 1, F2), lambda a: (a, 0, 0)),
            pl.BlockSpec((None, F2, F), lambda a: (a, 0, 0)),
            pl.BlockSpec((None, 1, F), lambda a: (a, 0, 0)),
            pl.BlockSpec((None, F, ACT), lambda a: (a, 0, 0)),
            pl.BlockSpec((None, 1, ACT), lambda a: (a, 0, 0)),
        ],
        out_specs=(
            pl.BlockSpec((None, N, F2), lambda a: (a, 0, 0)),
            pl.BlockSpec((None, N, ACT), lambda a: (a, 0, 0)),
        ),
        compiler_params=pltpu.CompilerParams(dimension_semantics=("parallel",)),
    )(flat, drop_mask, w_hqv, b_hqv, w_h, b_h, w_q, b_q)


def joint_q_fused(x, p):
    N = x.shape[0]
    out = p["w3"].shape[-1]
    return pl.pallas_call(
        _joint_q_kernel,
        out_shape=jax.ShapeDtypeStruct((N, out), jnp.float32),
        in_specs=[_VMEM] * 7,
        out_specs=_VMEM,
    )(x, p["w1"], p["b1"], p["w2"], p["b2"], p["w3"], p["b3"])


def joint_v_fused(x, p):
    N = x.shape[0]
    out = p["w3"].shape[-1]
    kern = functools.partial(_joint_v_kernel, denom=float(N * out))
    return pl.pallas_call(
        kern,
        out_shape=jax.ShapeDtypeStruct((1, 1), jnp.float32),
        in_specs=[_VMEM] * 7,
        out_specs=_VMEM,
    )(x, p["w1"], p["b1"], p["w2"], p["b2"], p["w3"], p["b3"])


# ----------------------------------------------------------------------------- glue
def im2col_nhwc(x, k=5, s=2):
    """x: [A, N, H, W, C] -> patches [A, N*Ho*Wo, k*k*C] (column order (kh, kw, c))."""
    A, N, H, W, C = x.shape
    Ho = (H - k) // s + 1
    Wo = (W - k) // s + 1
    cols = [x[:, :, i:i + s * Ho:s, j:j + s * Wo:s, :] for i in range(k) for j in range(k)]
    p = jnp.stack(cols, axis=4)                                  # [A, N, Ho, Wo, k*k, C]
    return p.reshape(A, N * Ho * Wo, k * k * C), (Ho, Wo)


def central_forward(prep, obs_stack, drop_key, *, joint_q_out, drop_p=0.75):
    """obs_stack: [A, N, 3, H, W] f32; drop_key: jax PRNG key for the dropout mask."""
    A, N = obs_stack.shape[0], obs_stack.shape[1]
    x = jnp.transpose(obs_stack, (0, 1, 3, 4, 2)).astype(jnp.bfloat16)   # NHWC, bf16 operands

    # conv1 (+BN+ReLU), K padded 75 -> 128 for lane-aligned MXU feeds
    p1, (ho, wo) = im2col_nhwc(x)
    kpad = prep["c1w"].shape[1]
    p1 = jnp.pad(p1, ((0, 0), (0, 0), (0, kpad - p1.shape[-1])))
    y = conv_bn_relu_batched(p1, prep["c1w"], prep["c1b"], prep["g1"], prep["b1"])
    y = y.reshape(A, N, ho, wo, -1)
    # conv2
    p2, (ho, wo) = im2col_nhwc(y)
    y = conv_bn_relu_batched(p2, prep["c2w"], prep["c2b"], prep["g2"], prep["b2"])
    y = y.reshape(A, N, ho, wo, -1)
    # conv3
    p3, (ho, wo) = im2col_nhwc(y)
    y = conv_bn_relu_batched(p3, prep["c3w"], prep["c3b"], prep["g3"], prep["b3"])
    flat = y.reshape(A, N, -1)                                           # NHWC-flat (weights permuted)

    # dropout keep-mask (p=0.75) generated outside the kernel, pre-scaled by 1/(1-p)
    F = prep["w_h"].shape[-1]
    keep = jax.random.bernoulli(drop_key, 1.0 - drop_p, (A, N, F))
    drop_mask = keep.astype(jnp.float32) * (1.0 / (1.0 - drop_p))

    # fused head: [hq|hv] matmul + SiLU, hidden + dropout, q + ReLU
    cat, q_all = single_head_batched(flat, drop_mask, prep["w_hqv"], prep["b_hqv"],
                                     prep["w_h"], prep["b_h"], prep["w_q"], prep["b_q"])
    jt_q_in = jnp.sum(cat[:, :, :F], axis=0)                             # sum of hq over agents
    jt_v_in = jnp.sum(cat[:, :, F:], axis=0)                             # sum of hv over agents

    q_jt = joint_q_fused(jt_q_in, prep["jointQ"])[:, :joint_q_out]       # drop lane padding
    v_jt = joint_v_fused(jt_v_in, prep["jointV"])[0, 0]                  # torch.mean(x) -> scalar
    return q_all, q_jt, v_jt


# ----------------------------------------------------------------------------- params (PyTorch-style init)
def _uinit(key, shape, fan_in):
    bound = 1.0 / (fan_in ** 0.5)
    return jax.random.uniform(key, shape, jnp.float32, -bound, bound)


def _init_linear(key, out_f, in_f):
    kw, kb = jax.random.split(key)
    return _uinit(kw, (out_f, in_f), in_f), _uinit(kb, (out_f,), in_f)


def _init_conv(key, cout, cin, k=5):
    kw, kb = jax.random.split(key)
    fan_in = cin * k * k
    return _uinit(kw, (cout, cin, k, k), fan_in), _uinit(kb, (cout,), fan_in)


def _conv_size(s, k=5, st=2):
    return (s - (k - 1) - 1) // st + 1


def init_single_q(key, w, h, features_n=64, actions_n=5):
    cw = _conv_size(_conv_size(_conv_size(w)))
    ch = _conv_size(_conv_size(_conv_size(h)))
    lin_in = cw * ch * 32
    ks = jax.random.split(key, 7)
    p = {}
    p["c1w"], p["c1b"] = _init_conv(ks[0], 16, 3)
    p["g1"], p["b1"] = jnp.ones((16,), jnp.float32), jnp.zeros((16,), jnp.float32)
    p["c2w"], p["c2b"] = _init_conv(ks[1], 32, 16)
    p["g2"], p["b2"] = jnp.ones((32,), jnp.float32), jnp.zeros((32,), jnp.float32)
    p["c3w"], p["c3b"] = _init_conv(ks[2], 32, 32)
    p["g3"], p["b3"] = jnp.ones((32,), jnp.float32), jnp.zeros((32,), jnp.float32)
    p["hv_w"], p["hv_b"] = _init_linear(ks[3], features_n, lin_in)
    p["hq_w"], p["hq_b"] = _init_linear(ks[4], features_n, lin_in)
    p["h_w"], p["h_b"] = _init_linear(ks[5], features_n, features_n * 2)
    p["q_w"], p["q_b"] = _init_linear(ks[6], actions_n, features_n)
    return p


def init_central_params(key, agents_n, w, h, features_n=64, actions_n=5):
    ks = jax.random.split(key, agents_n + 2)
    params = {"singles": [init_single_q(ks[i], w, h, features_n, actions_n)
                          for i in range(agents_n)]}
    kq = jax.random.split(ks[agents_n], 3)
    params["jointQ"] = {}
    params["jointQ"]["h1_w"], params["jointQ"]["h1_b"] = _init_linear(kq[0], features_n // 2, features_n)
    params["jointQ"]["h2_w"], params["jointQ"]["h2_b"] = _init_linear(kq[1], features_n, features_n // 2)
    params["jointQ"]["q_w"], params["jointQ"]["q_b"] = _init_linear(kq[2], actions_n ** agents_n, features_n)
    kv = jax.random.split(ks[agents_n + 1], 3)
    params["jointV"] = {}
    params["jointV"]["h1_w"], params["jointV"]["h1_b"] = _init_linear(kv[0], features_n // 2, features_n)
    params["jointV"]["h2_w"], params["jointV"]["h2_b"] = _init_linear(kv[1], features_n, features_n // 2)
    params["jointV"]["v_w"], params["jointV"]["v_b"] = _init_linear(kv[2], agents_n, features_n)
    return params


# ----------------------------------------------------------------------------- one-time weight prep
def _prep_conv_w(w, k_pad=None):
    """[Cout, Cin, kh, kw] -> [K, Cout] bf16 with K ordered (kh, kw, cin); optionally zero-pad K."""
    cout, cin, kh, kw = w.shape
    wf = jnp.transpose(w, (2, 3, 1, 0)).reshape(kh * kw * cin, cout)
    if k_pad is not None and wf.shape[0] < k_pad:
        wf = jnp.pad(wf, ((0, k_pad - wf.shape[0]), (0, 0)))
    return wf.astype(jnp.bfloat16)


def _prep_single(p, conv_h, conv_w):
    out = {}
    out["c1w"] = _prep_conv_w(p["c1w"], k_pad=128)          # K: 75 -> 128 (lane-aligned)
    out["c2w"] = _prep_conv_w(p["c2w"])
    out["c3w"] = _prep_conv_w(p["c3w"])
    for i in (1, 2, 3):
        c = p[f"c{i}w"].shape[0]
        out[f"c{i}b"] = p[f"c{i}b"].reshape(1, c).astype(jnp.float32)
        out[f"g{i}"] = p[f"g{i}"].reshape(1, c).astype(jnp.float32)
        out[f"b{i}"] = p[f"b{i}"].reshape(1, c).astype(jnp.float32)
    c3 = p["c3w"].shape[0]

    def nchw_to_nhwc_cols(wl):  # permute flatten order: c*H*W+h*W+w -> h*W*C+w*C+c
        o = wl.shape[0]
        return wl.reshape(o, c3, conv_h, conv_w).transpose(0, 2, 3, 1).reshape(o, conv_h * conv_w * c3)

    w_hqv = jnp.concatenate([nchw_to_nhwc_cols(p["hq_w"]), nchw_to_nhwc_cols(p["hv_w"])], axis=0)
    out["w_hqv"] = jnp.transpose(w_hqv).astype(jnp.bfloat16)            # [lin_in, 2F], cols [hq|hv]
    out["b_hqv"] = jnp.concatenate([p["hq_b"], p["hv_b"]]).reshape(1, -1).astype(jnp.float32)
    out["w_h"] = jnp.transpose(p["h_w"]).astype(jnp.bfloat16)
    out["b_h"] = p["h_b"].reshape(1, -1).astype(jnp.float32)
    out["w_q"] = jnp.transpose(p["q_w"]).astype(jnp.bfloat16)
    out["b_q"] = p["q_b"].reshape(1, -1).astype(jnp.float32)
    return out


def _prep_mlp3(w1, b1, w2, b2, w3, b3, pad_out_to=None):
    w3t = jnp.transpose(w3)
    b3r = b3.reshape(1, -1)
    if pad_out_to is not None and w3t.shape[1] < pad_out_to:
        pad = pad_out_to - w3t.shape[1]
        w3t = jnp.pad(w3t, ((0, 0), (0, pad)))
        b3r = jnp.pad(b3r, ((0, 0), (0, pad)))
    return dict(
        w1=jnp.transpose(w1).astype(jnp.bfloat16), b1=b1.reshape(1, -1).astype(jnp.float32),
        w2=jnp.transpose(w2).astype(jnp.bfloat16), b2=b2.reshape(1, -1).astype(jnp.float32),
        w3=w3t.astype(jnp.bfloat16), b3=b3r.astype(jnp.float32),
    )


def prep_central_params(params, *, w, h):
    conv_w = _conv_size(_conv_size(_conv_size(w)))
    conv_h = _conv_size(_conv_size(_conv_size(h)))
    singles = [_prep_single(p, conv_h, conv_w) for p in params["singles"]]
    prep = {k: jnp.stack([s[k] for s in singles], axis=0) for k in singles[0]}   # [A, ...]
    jq_out = params["jointQ"]["q_w"].shape[0]
    prep["jointQ"] = _prep_mlp3(params["jointQ"]["h1_w"], params["jointQ"]["h1_b"],
                                params["jointQ"]["h2_w"], params["jointQ"]["h2_b"],
                                params["jointQ"]["q_w"], params["jointQ"]["q_b"],
                                pad_out_to=-(-jq_out // 128) * 128)              # 625 -> 640
    prep["jointV"] = _prep_mlp3(params["jointV"]["h1_w"], params["jointV"]["h1_b"],
                                params["jointV"]["h2_w"], params["jointV"]["h2_b"],
                                params["jointV"]["v_w"], params["jointV"]["v_b"])
    return prep


# ----------------------------------------------------------------------------- main
if __name__ == "__main__":
    key = jax.random.PRNGKey(0)
    agents_n = 4
    N, H, W = 2, 40, 40          # conv stack: 40 -> 18 -> 7 -> 2  => lin_in = 2*2*32 = 128
    features_n, actions_n = 64, 5

    pkey, okey, dkey = jax.random.split(key, 3)
    params = init_central_params(pkey, agents_n=agents_n, w=W, h=H,
                                 features_n=features_n, actions_n=actions_n)
    prep = prep_central_params(params, w=W, h=H)

    agent_names = [f"agent_{i}" for i in range(agents_n)]
    obs_keys = jax.random.split(okey, agents_n)
    observations = {agent_names[i]: jax.random.normal(obs_keys[i], (N, 3, H, W), jnp.float32)
                    for i in range(agents_n)}
    obs_stack = jnp.stack([observations[a] for a in agent_names], axis=0)        # [A, N, 3, H, W]

    fwd = jax.jit(functools.partial(central_forward, joint_q_out=actions_n ** agents_n))
    q_all, q_jt, v_jt = fwd(prep, obs_stack, dkey)
    jax.block_until_ready((q_all, q_jt, v_jt))

    q_dict = {agent_names[i]: q_all[i] for i in range(agents_n)}
    assert q_jt.shape == (N, actions_n ** agents_n)
    assert v_jt.shape == ()
    for a in agent_names:
        assert q_dict[a].shape == (N, actions_n)
    print("KERNEL_OK")
</pallas_src>

<mosaic_0001>
module attributes {stable_mosaic.version = 11 : i64} {
  func.func @_conv_bn_relu_kernel(%arg0: i32, %arg1: memref<1x648x128xbf16, #tpu.memory_space<vmem>>, %arg2: memref<1x128x16xbf16, #tpu.memory_space<vmem>>, %arg3: memref<1x1x16xf32, #tpu.memory_space<vmem>>, %arg4: memref<1x1x16xf32, #tpu.memory_space<vmem>>, %arg5: memref<1x1x16xf32, #tpu.memory_space<vmem>>, %arg6: memref<1x648x16xbf16, #tpu.memory_space<vmem>>) attributes {dimension_semantics = [#tpu.dimension_semantics<parallel>], iteration_bounds = array<i64: 4>, scalar_prefetch = 0 : i64, scratch_operands = 0 : i64, tpu.core_type = #tpu.core_type<tc>, window_params = [{transform_indices = @transform_0, window_bounds = array<i64: 1, 648, 128>}, {transform_indices = @transform_1, window_bounds = array<i64: 1, 128, 16>}, {transform_indices = @transform_2, window_bounds = array<i64: 1, 1, 16>}, {transform_indices = @transform_3, window_bounds = array<i64: 1, 1, 16>}, {transform_indices = @transform_4, window_bounds = array<i64: 1, 1, 16>}, {transform_indices = @transform_5, window_bounds = array<i64: 1, 648, 16>}]} {
    %c0 = arith.constant 0 : index
    %c0_0 = arith.constant 0 : index
    %c0_1 = arith.constant 0 : index
    %0 = vector.load %arg1[%c0, %c0_0, %c0_1] : memref<1x648x128xbf16, #tpu.memory_space<vmem>>, vector<1x648x128xbf16>
    %1 = vector.shape_cast %0 : vector<1x648x128xbf16> to vector<648x128xbf16>
    %c0_2 = arith.constant 0 : index
    %c0_3 = arith.constant 0 : index
    %c0_4 = arith.constant 0 : index
    %2 = vector.load %arg2[%c0_2, %c0_3, %c0_4] : memref<1x128x16xbf16, #tpu.memory_space<vmem>>, vector<1x128x16xbf16>
    %3 = vector.shape_cast %2 : vector<1x128x16xbf16> to vector<128x16xbf16>
    %cst = arith.constant dense<0.000000e+00> : vector<648x16xf32>
    %4 = tpu.matmul %1, %3, %cst {dimension_numbers = #tpu.dot_dimension_numbers<[1], [0], [0], [1], [0, 0, 1, 1], [], []>} : vector<648x128xbf16>, vector<128x16xbf16>, vector<648x16xf32> -> vector<648x16xf32>
    %c0_5 = arith.constant 0 : index
    %c0_6 = arith.constant 0 : index
    %c0_7 = arith.constant 0 : index
    %5 = vector.load %arg3[%c0_5, %c0_6, %c0_7] : memref<1x1x16xf32, #tpu.memory_space<vmem>>, vector<1x1x16xf32>
    %6 = vector.shape_cast %5 : vector<1x1x16xf32> to vector<1x16xf32>
    %7 = vector.broadcast %6 : vector<1x16xf32> to vector<648x16xf32>
    %8 = arith.addf %4, %7 : vector<648x16xf32>
    %cst_8 = arith.constant dense<0.000000e+00> : vector<16xf32>
    %9 = vector.multi_reduction <add>, %8, %cst_8 [0] : vector<648x16xf32> to vector<16xf32>
    %10 = vector.shape_cast %9 : vector<16xf32> to vector<1x16xf32>
    %cst_9 = arith.constant 6.480000e+02 : f32
    %11 = vector.broadcast %cst_9 : f32 to vector<1x16xf32>
    %12 = arith.divf %10, %11 : vector<1x16xf32>
    %13 = vector.broadcast %12 : vector<1x16xf32> to vector<648x16xf32>
    %14 = arith.subf %8, %13 : vector<648x16xf32>
    %15 = arith.mulf %14, %14 : vector<648x16xf32>
    %cst_10 = arith.constant dense<0.000000e+00> : vector<16xf32>
    %16 = vector.multi_reduction <add>, %15, %cst_10 [0] : vector<648x16xf32> to vector<16xf32>
    %17 = vector.shape_cast %16 : vector<16xf32> to vector<1x16xf32>
    %cst_11 = arith.constant 6.480000e+02 : f32
    %18 = vector.broadcast %cst_11 : f32 to vector<1x16xf32>
    %19 = arith.divf %17, %18 : vector<1x16xf32>
    %20 = vector.broadcast %12 : vector<1x16xf32> to vector<648x16xf32>
    %21 = arith.subf %8, %20 : vector<648x16xf32>
    %cst_12 = arith.constant 9.99999974E-6 : f32
    %22 = vector.broadcast %cst_12 : f32 to vector<1x16xf32>
    %23 = arith.addf %19, %22 : vector<1x16xf32>
    %24 = math.rsqrt %23 : vector<1x16xf32>
    %25 = vector.broadcast %24 : vector<1x16xf32> to vector<648x16xf32>
    %26 = arith.mulf %21, %25 : vector<648x16xf32>
    %c0_13 = arith.constant 0 : index
    %c0_14 = arith.constant 0 : index
    %c0_15 = arith.constant 0 : index
    %27 = vector.load %arg4[%c0_13, %c0_14, %c0_15] : memref<1x1x16xf32, #tpu.memory_space<vmem>>, vector<1x1x16xf32>
    %28 = vector.shape_cast %27 : vector<1x1x16xf32> to vector<1x16xf32>
    %29 = vector.broadcast %28 : vector<1x16xf32> to vector<648x16xf32>
    %30 = arith.mulf %26, %29 : vector<648x16xf32>
    %c0_16 = arith.constant 0 : index
    %c0_17 = arith.constant 0 : index
    %c0_18 = arith.constant 0 : index
    %31 = vector.load %arg5[%c0_16, %c0_17, %c0_18] : memref<1x1x16xf32, #tpu.memory_space<vmem>>, vector<1x1x16xf32>
    %32 = vector.shape_cast %31 : vector<1x1x16xf32> to vector<1x16xf32>
    %33 = vector.broadcast %32 : vector<1x16xf32> to vector<648x16xf32>
    %34 = arith.addf %30, %33 : vector<648x16xf32>
    %cst_19 = arith.constant 0.000000e+00 : f32
    %35 = vector.broadcast %cst_19 : f32 to vector<648x16xf32>
    %36 = arith.maximumf %34, %35 : vector<648x16xf32>
    %37 = arith.truncf %36 : vector<648x16xf32> to vector<648x16xbf16>
    %c0_20 = arith.constant 0 : index
    %c0_21 = arith.constant 0 : index
    %c0_22 = arith.constant 0 : index
    %38 = vector.load %arg6[%c0_20, %c0_21, %c0_22] : memref<1x648x16xbf16, #tpu.memory_space<vmem>>, vector<1x648x16xbf16>
    %39 = vector.shape_cast %38 : vector<1x648x16xbf16> to vector<648x16xbf16>
    %40 = vector.shape_cast %37 : vector<648x16xbf16> to vector<1x648x16xbf16>
    tpu.vector_store %arg6[%c0_20, %c0_21, %c0_22], %40 {strides = array<i32>} : memref<1x648x16xbf16, #tpu.memory_space<vmem>>, vector<1x648x16xbf16>,
    return
  }
  func.func @transform_0(%arg0: i32) -> (i32, i32, i32) {
    %c0_i32 = arith.constant 0 : i32
    %c0_i32_0 = arith.constant 0 : i32
    %c0_i32_1 = arith.constant 0 : i32
    return %arg0, %c0_i32, %c0_i32_0 : i32, i32, i32
  }
  func.func @transform_1(%arg0: i32) -> (i32, i32, i32) {
    %c0_i32 = arith.constant 0 : i32
    %c0_i32_0 = arith.constant 0 : i32
    %c0_i32_1 = arith.constant 0 : i32
    return %arg0, %c0_i32, %c0_i32_0 : i32, i32, i32
  }
  func.func @transform_2(%arg0: i32) -> (i32, i32, i32) {
    %c0_i32 = arith.constant 0 : i32
    %c0_i32_0 = arith.constant 0 : i32
    %c0_i32_1 = arith.constant 0 : i32
    return %arg0, %c0_i32, %c0_i32_0 : i32, i32, i32
  }
  func.func @transform_3(%arg0: i32) -> (i32, i32, i32) {
    %c0_i32 = arith.constant 0 : i32
    %c0_i32_0 = arith.constant 0 : i32
    %c0_i32_1 = arith.constant 0 : i32
    return %arg0, %c0_i32, %c0_i32_0 : i32, i32, i32
  }
  func.func @transform_4(%arg0: i32) -> (i32, i32, i32) {
    %c0_i32 = arith.constant 0 : i32
    %c0_i32_0 = arith.constant 0 : i32
    %c0_i32_1 = arith.constant 0 : i32
    return %arg0, %c0_i32, %c0_i32_0 : i32, i32, i32
  }
  func.func @transform_5(%arg0: i32) -> (i32, i32, i32) {
    %c0_i32 = arith.constant 0 : i32
    %c0_i32_0 = arith.constant 0 : i32
    %c0_i32_1 = arith.constant 0 : i32
    return %arg0, %c0_i32, %c0_i32_0 : i32, i32, i32
  }
}

module attributes {stable_mosaic.version = 11 : i64} {
  func.func @_conv_bn_relu_kernel(%arg0: i32, %arg1: memref<1x98x400xbf16, #tpu.memory_space<vmem>>, %arg2: memref<1x400x32xbf16, #tpu.memory_space<vmem>>, %arg3: memref<1x1x32xf32, #tpu.memory_space<vmem>>, %arg4: memref<1x1x32xf32, #tpu.memory_space<vmem>>, %arg5: memref<1x1x32xf32, #tpu.memory_space<vmem>>, %arg6: memref<1x98x32xbf16, #tpu.memory_space<vmem>>) attributes {dimension_semantics = [#tpu.dimension_semantics<parallel>], iteration_bounds = array<i64: 4>, scalar_prefetch = 0 : i64, scratch_operands = 0 : i64, tpu.core_type = #tpu.core_type<tc>, window_params = [{transform_indices = @transform_0, window_bounds = array<i64: 1, 98, 400>}, {transform_indices = @transform_1, window_bounds = array<i64: 1, 400, 32>}, {transform_indices = @transform_2, window_bounds = array<i64: 1, 1, 32>}, {transform_indices = @transform_3, window_bounds = array<i64: 1, 1, 32>}, {transform_indices = @transform_4, window_bounds = array<i64: 1, 1, 32>}, {transform_indices = @transform_5, window_bounds = array<i64: 1, 98, 32>}]} {
    %c0 = arith.constant 0 : index
    %c0_0 = arith.constant 0 : index
    %c0_1 = arith.constant 0 : index
    %0 = vector.load %arg1[%c0, %c0_0, %c0_1] : memref<1x98x400xbf16, #tpu.memory_space<vmem>>, vector<1x98x400xbf16>
    %1 = vector.shape_cast %0 : vector<1x98x400xbf16> to vector<98x400xbf16>
    %c0_2 = arith.constant 0 : index
    %c0_3 = arith.constant 0 : index
    %c0_4 = arith.constant 0 : index
    %2 = vector.load %arg2[%c0_2, %c0_3, %c0_4] : memref<1x400x32xbf16, #tpu.memory_space<vmem>>, vector<1x400x32xbf16>
    %3 = vector.shape_cast %2 : vector<1x400x32xbf16> to vector<400x32xbf16>
    %cst = arith.constant dense<0.000000e+00> : vector<98x32xf32>
    %4 = tpu.matmul %1, %3, %cst {dimension_numbers = #tpu.dot_dimension_numbers<[1], [0], [0], [1], [0, 0, 1, 1], [], []>} : vector<98x400xbf16>, vector<400x32xbf16>, vector<98x32xf32> -> vector<98x32xf32>
    %c0_5 = arith.constant 0 : index
    %c0_6 = arith.constant 0 : index
    %c0_7 = arith.constant 0 : index
    %5 = vector.load %arg3[%c0_5, %c0_6, %c0_7] : memref<1x1x32xf32, #tpu.memory_space<vmem>>, vector<1x1x32xf32>
    %6 = vector.shape_cast %5 : vector<1x1x32xf32> to vector<1x32xf32>
    %7 = vector.broadcast %6 : vector<1x32xf32> to vector<98x32xf32>
    %8 = arith.addf %4, %7 : vector<98x32xf32>
    %cst_8 = arith.constant dense<0.000000e+00> : vector<32xf32>
    %9 = vector.multi_reduction <add>, %8, %cst_8 [0] : vector<98x32xf32> to vector<32xf32>
    %10 = vector.shape_cast %9 : vector<32xf32> to vector<1x32xf32>
    %cst_9 = arith.constant 9.800000e+01 : f32
    %11 = vector.broadcast %cst_9 : f32 to vector<1x32xf32>
    %12 = arith.divf %10, %11 : vector<1x32xf32>
    %13 = vector.broadcast %12 : vector<1x32xf32> to vector<98x32xf32>
    %14 = arith.subf %8, %13 : vector<98x32xf32>
    %15 = arith.mulf %14, %14 : vector<98x32xf32>
    %cst_10 = arith.constant dense<0.000000e+00> : vector<32xf32>
    %16 = vector.multi_reduction <add>, %15, %cst_10 [0] : vector<98x32xf32> to vector<32xf32>
    %17 = vector.shape_cast %16 : vector<32xf32> to vector<1x32xf32>
    %cst_11 = arith.constant 9.800000e+01 : f32
    %18 = vector.broadcast %cst_11 : f32 to vector<1x32xf32>
    %19 = arith.divf %17, %18 : vector<1x32xf32>
    %20 = vector.broadcast %12 : vector<1x32xf32> to vector<98x32xf32>
    %21 = arith.subf %8, %20 : vector<98x32xf32>
    %cst_12 = arith.constant 9.99999974E-6 : f32
    %22 = vector.broadcast %cst_12 : f32 to vector<1x32xf32>
    %23 = arith.addf %19, %22 : vector<1x32xf32>
    %24 = math.rsqrt %23 : vector<1x32xf32>
    %25 = vector.broadcast %24 : vector<1x32xf32> to vector<98x32xf32>
    %26 = arith.mulf %21, %25 : vector<98x32xf32>
    %c0_13 = arith.constant 0 : index
    %c0_14 = arith.constant 0 : index
    %c0_15 = arith.constant 0 : index
    %27 = vector.load %arg4[%c0_13, %c0_14, %c0_15] : memref<1x1x32xf32, #tpu.memory_space<vmem>>, vector<1x1x32xf32>
    %28 = vector.shape_cast %27 : vector<1x1x32xf32> to vector<1x32xf32>
    %29 = vector.broadcast %28 : vector<1x32xf32> to vector<98x32xf32>
    %30 = arith.mulf %26, %29 : vector<98x32xf32>
    %c0_16 = arith.constant 0 : index
    %c0_17 = arith.constant 0 : index
    %c0_18 = arith.constant 0 : index
    %31 = vector.load %arg5[%c0_16, %c0_17, %c0_18] : memref<1x1x32xf32, #tpu.memory_space<vmem>>, vector<1x1x32xf32>
    %32 = vector.shape_cast %31 : vector<1x1x32xf32> to vector<1x32xf32>
    %33 = vector.broadcast %32 : vector<1x32xf32> to vector<98x32xf32>
    %34 = arith.addf %30, %33 : vector<98x32xf32>
    %cst_19 = arith.constant 0.000000e+00 : f32
    %35 = vector.broadcast %cst_19 : f32 to vector<98x32xf32>
    %36 = arith.maximumf %34, %35 : vector<98x32xf32>
    %37 = arith.truncf %36 : vector<98x32xf32> to vector<98x32xbf16>
    %c0_20 = arith.constant 0 : index
    %c0_21 = arith.constant 0 : index
    %c0_22 = arith.constant 0 : index
    %38 = vector.load %arg6[%c0_20, %c0_21, %c0_22] : memref<1x98x32xbf16, #tpu.memory_space<vmem>>, vector<1x98x32xbf16>
    %39 = vector.shape_cast %38 : vector<1x98x32xbf16> to vector<98x32xbf16>
    %40 = vector.shape_cast %37 : vector<98x32xbf16> to vector<1x98x32xbf16>
    tpu.vector_store %arg6[%c0_20, %c0_21, %c0_22], %40 {strides = array<i32>} : memref<1x98x32xbf16, #tpu.memory_space<vmem>>, vector<1x98x32xbf16>,
    return
  }
  func.func @transform_0(%arg0: i32) -> (i32, i32, i32) {
    %c0_i32 = arith.constant 0 : i32
    %c0_i32_0 = arith.constant 0 : i32
    %c0_i32_1 = arith.constant 0 : i32
    return %arg0, %c0_i32, %c0_i32_0 : i32, i32, i32
  }
  func.func @transform_1(%arg0: i32) -> (i32, i32, i32) {
    %c0_i32 = arith.constant 0 : i32
    %c0_i32_0 = arith.constant 0 : i32
    %c0_i32_1 = arith.constant 0 : i32
    return %arg0, %c0_i32, %c0_i32_0 : i32, i32, i32
  }
  func.func @transform_2(%arg0: i32) -> (i32, i32, i32) {
    %c0_i32 = arith.constant 0 : i32
    %c0_i32_0 = arith.constant 0 : i32
    %c0_i32_1 = arith.constant 0 : i32
    return %arg0, %c0_i32, %c0_i32_0 : i32, i32, i32
  }
  func.func @transform_3(%arg0: i32) -> (i32, i32, i32) {
    %c0_i32 = arith.constant 0 : i32
    %c0_i32_0 = arith.constant 0 : i32
    %c0_i32_1 = arith.constant 0 : i32
    return %arg0, %c0_i32, %c0_i32_0 : i32, i32, i32
  }
  func.func @transform_4(%arg0: i32) -> (i32, i32, i32) {
    %c0_i32 = arith.constant 0 : i32
    %c0_i32_0 = arith.constant 0 : i32
    %c0_i32_1 = arith.constant 0 : i32
    return %arg0, %c0_i32, %c0_i32_0 : i32, i32, i32
  }
  func.func @transform_5(%arg0: i32) -> (i32, i32, i32) {
    %c0_i32 = arith.constant 0 : i32
    %c0_i32_0 = arith.constant 0 : i32
    %c0_i32_1 = arith.constant 0 : i32
    return %arg0, %c0_i32, %c0_i32_0 : i32, i32, i32
  }
}

module attributes {stable_mosaic.version = 11 : i64} {
  func.func @_conv_bn_relu_kernel(%arg0: i32, %arg1: memref<1x8x800xbf16, #tpu.memory_space<vmem>>, %arg2: memref<1x800x32xbf16, #tpu.memory_space<vmem>>, %arg3: memref<1x1x32xf32, #tpu.memory_space<vmem>>, %arg4: memref<1x1x32xf32, #tpu.memory_space<vmem>>, %arg5: memref<1x1x32xf32, #tpu.memory_space<vmem>>, %arg6: memref<1x8x32xbf16, #tpu.memory_space<vmem>>) attributes {dimension_semantics = [#tpu.dimension_semantics<parallel>], iteration_bounds = array<i64: 4>, scalar_prefetch = 0 : i64, scratch_operands = 0 : i64, tpu.core_type = #tpu.core_type<tc>, window_params = [{transform_indices = @transform_0, window_bounds = array<i64: 1, 8, 800>}, {transform_indices = @transform_1, window_bounds = array<i64: 1, 800, 32>}, {transform_indices = @transform_2, window_bounds = array<i64: 1, 1, 32>}, {transform_indices = @transform_3, window_bounds = array<i64: 1, 1, 32>}, {transform_indices = @transform_4, window_bounds = array<i64: 1, 1, 32>}, {transform_indices = @transform_5, window_bounds = array<i64: 1, 8, 32>}]} {
    %c0 = arith.constant 0 : index
    %c0_0 = arith.constant 0 : index
    %c0_1 = arith.constant 0 : index
    %0 = vector.load %arg1[%c0, %c0_0, %c0_1] : memref<1x8x800xbf16, #tpu.memory_space<vmem>>, vector<1x8x800xbf16>
    %1 = vector.shape_cast %0 : vector<1x8x800xbf16> to vector<8x800xbf16>
    %c0_2 = arith.constant 0 : index
    %c0_3 = arith.constant 0 : index
    %c0_4 = arith.constant 0 : index
    %2 = vector.load %arg2[%c0_2, %c0_3, %c0_4] : memref<1x800x32xbf16, #tpu.memory_space<vmem>>, vector<1x800x32xbf16>
    %3 = vector.shape_cast %2 : vector<1x800x32xbf16> to vector<800x32xbf16>
    %cst = arith.constant dense<0.000000e+00> : vector<8x32xf32>
    %4 = tpu.matmul %1, %3, %cst {dimension_numbers = #tpu.dot_dimension_numbers<[1], [0], [0], [1], [0, 0, 1, 1], [], []>} : vector<8x800xbf16>, vector<800x32xbf16>, vector<8x32xf32> -> vector<8x32xf32>
    %c0_5 = arith.constant 0 : index
    %c0_6 = arith.constant 0 : index
    %c0_7 = arith.constant 0 : index
    %5 = vector.load %arg3[%c0_5, %c0_6, %c0_7] : memref<1x1x32xf32, #tpu.memory_space<vmem>>, vector<1x1x32xf32>
    %6 = vector.shape_cast %5 : vector<1x1x32xf32> to vector<1x32xf32>
    %7 = vector.broadcast %6 : vector<1x32xf32> to vector<8x32xf32>
    %8 = arith.addf %4, %7 : vector<8x32xf32>
    %cst_8 = arith.constant dense<0.000000e+00> : vector<32xf32>
    %9 = vector.multi_reduction <add>, %8, %cst_8 [0] : vector<8x32xf32> to vector<32xf32>
    %10 = vector.shape_cast %9 : vector<32xf32> to vector<1x32xf32>
    %cst_9 = arith.constant 8.000000e+00 : f32
    %11 = vector.broadcast %cst_9 : f32 to vector<1x32xf32>
    %12 = arith.divf %10, %11 : vector<1x32xf32>
    %13 = vector.broadcast %12 : vector<1x32xf32> to vector<8x32xf32>
    %14 = arith.subf %8, %13 : vector<8x32xf32>
    %15 = arith.mulf %14, %14 : vector<8x32xf32>
    %cst_10 = arith.constant dense<0.000000e+00> : vector<32xf32>
    %16 = vector.multi_reduction <add>, %15, %cst_10 [0] : vector<8x32xf32> to vector<32xf32>
    %17 = vector.shape_cast %16 : vector<32xf32> to vector<1x32xf32>
    %cst_11 = arith.constant 8.000000e+00 : f32
    %18 = vector.broadcast %cst_11 : f32 to vector<1x32xf32>
    %19 = arith.divf %17, %18 : vector<1x32xf32>
    %20 = vector.broadcast %12 : vector<1x32xf32> to vector<8x32xf32>
    %21 = arith.subf %8, %20 : vector<8x32xf32>
    %cst_12 = arith.constant 9.99999974E-6 : f32
    %22 = vector.broadcast %cst_12 : f32 to vector<1x32xf32>
    %23 = arith.addf %19, %22 : vector<1x32xf32>
    %24 = math.rsqrt %23 : vector<1x32xf32>
    %25 = vector.broadcast %24 : vector<1x32xf32> to vector<8x32xf32>
    %26 = arith.mulf %21, %25 : vector<8x32xf32>
    %c0_13 = arith.constant 0 : index
    %c0_14 = arith.constant 0 : index
    %c0_15 = arith.constant 0 : index
    %27 = vector.load %arg4[%c0_13, %c0_14, %c0_15] : memref<1x1x32xf32, #tpu.memory_space<vmem>>, vector<1x1x32xf32>
    %28 = vector.shape_cast %27 : vector<1x1x32xf32> to vector<1x32xf32>
    %29 = vector.broadcast %28 : vector<1x32xf32> to vector<8x32xf32>
    %30 = arith.mulf %26, %29 : vector<8x32xf32>
    %c0_16 = arith.constant 0 : index
    %c0_17 = arith.constant 0 : index
    %c0_18 = arith.constant 0 : index
    %31 = vector.load %arg5[%c0_16, %c0_17, %c0_18] : memref<1x1x32xf32, #tpu.memory_space<vmem>>, vector<1x1x32xf32>
    %32 = vector.shape_cast %31 : vector<1x1x32xf32> to vector<1x32xf32>
    %33 = vector.broadcast %32 : vector<1x32xf32> to vector<8x32xf32>
    %34 = arith.addf %30, %33 : vector<8x32xf32>
    %cst_19 = arith.constant 0.000000e+00 : f32
    %35 = vector.broadcast %cst_19 : f32 to vector<8x32xf32>
    %36 = arith.maximumf %34, %35 : vector<8x32xf32>
    %37 = arith.truncf %36 : vector<8x32xf32> to vector<8x32xbf16>
    %c0_20 = arith.constant 0 : index
    %c0_21 = arith.constant 0 : index
    %c0_22 = arith.constant 0 : index
    %38 = vector.load %arg6[%c0_20, %c0_21, %c0_22] : memref<1x8x32xbf16, #tpu.memory_space<vmem>>, vector<1x8x32xbf16>
    %39 = vector.shape_cast %38 : vector<1x8x32xbf16> to vector<8x32xbf16>
    %40 = vector.shape_cast %37 : vector<8x32xbf16> to vector<1x8x32xbf16>
    tpu.vector_store %arg6[%c0_20, %c0_21, %c0_22], %40 {strides = array<i32>} : memref<1x8x32xbf16, #tpu.memory_space<vmem>>, vector<1x8x32xbf16>,
    return
  }
  func.func @transform_0(%arg0: i32) -> (i32, i32, i32) {
    %c0_i32 = arith.constant 0 : i32
    %c0_i32_0 = arith.constant 0 : i32
    %c0_i32_1 = arith.constant 0 : i32
    return %arg0, %c0_i32, %c0_i32_0 : i32, i32, i32
  }
  func.func @transform_1(%arg0: i32) -> (i32, i32, i32) {
    %c0_i32 = arith.constant 0 : i32
    %c0_i32_0 = arith.constant 0 : i32
    %c0_i32_1 = arith.constant 0 : i32
    return %arg0, %c0_i32, %c0_i32_0 : i32, i32, i32
  }
  func.func @transform_2(%arg0: i32) -> (i32, i32, i32) {
    %c0_i32 = arith.constant 0 : i32
    %c0_i32_0 = arith.constant 0 : i32
    %c0_i32_1 = arith.constant 0 : i32
    return %arg0, %c0_i32, %c0_i32_0 : i32, i32, i32
  }
  func.func @transform_3(%arg0: i32) -> (i32, i32, i32) {
    %c0_i32 = arith.constant 0 : i32
    %c0_i32_0 = arith.constant 0 : i32
    %c0_i32_1 = arith.constant 0 : i32
    return %arg0, %c0_i32, %c0_i32_0 : i32, i32, i32
  }
  func.func @transform_4(%arg0: i32) -> (i32, i32, i32) {
    %c0_i32 = arith.constant 0 : i32
    %c0_i32_0 = arith.constant 0 : i32
    %c0_i32_1 = arith.constant 0 : i32
    return %arg0, %c0_i32, %c0_i32_0 : i32, i32, i32
  }
  func.func @transform_5(%arg0: i32) -> (i32, i32, i32) {
    %c0_i32 = arith.constant 0 : i32
    %c0_i32_0 = arith.constant 0 : i32
    %c0_i32_1 = arith.constant 0 : i32
    return %arg0, %c0_i32, %c0_i32_0 : i32, i32, i32
  }
}

module attributes {stable_mosaic.version = 11 : i64} {
  func.func @_single_head_kernel(%arg0: i32, %arg1: memref<1x2x128xbf16, #tpu.memory_space<vmem>>, %arg2: memref<1x2x64xf32, #tpu.memory_space<vmem>>, %arg3: memref<1x128x128xbf16, #tpu.memory_space<vmem>>, %arg4: memref<1x1x128xf32, #tpu.memory_space<vmem>>, %arg5: memref<1x128x64xbf16, #tpu.memory_space<vmem>>, %arg6: memref<1x1x64xf32, #tpu.memory_space<vmem>>, %arg7: memref<1x64x5xbf16, #tpu.memory_space<vmem>>, %arg8: memref<1x1x5xf32, #tpu.memory_space<vmem>>, %arg9: memref<1x2x128xf32, #tpu.memory_space<vmem>>, %arg10: memref<1x2x5xf32, #tpu.memory_space<vmem>>) attributes {dimension_semantics = [#tpu.dimension_semantics<parallel>], iteration_bounds = array<i64: 4>, scalar_prefetch = 0 : i64, scratch_operands = 0 : i64, tpu.core_type = #tpu.core_type<tc>, window_params = [{transform_indices = @transform_0, window_bounds = array<i64: 1, 2, 128>}, {transform_indices = @transform_1, window_bounds = array<i64: 1, 2, 64>}, {transform_indices = @transform_2, window_bounds = array<i64: 1, 128, 128>}, {transform_indices = @transform_3, window_bounds = array<i64: 1, 1, 128>}, {transform_indices = @transform_4, window_bounds = array<i64: 1, 128, 64>}, {transform_indices = @transform_5, window_bounds = array<i64: 1, 1, 64>}, {transform_indices = @transform_6, window_bounds = array<i64: 1, 64, 5>}, {transform_indices = @transform_7, window_bounds = array<i64: 1, 1, 5>}, {transform_indices = @transform_8, window_bounds = array<i64: 1, 2, 128>}, {transform_indices = @transform_9, window_bounds = array<i64: 1, 2, 5>}]} {
    %c0 = arith.constant 0 : index
    %c0_0 = arith.constant 0 : index
    %c0_1 = arith.constant 0 : index
    %0 = vector.load %arg1[%c0, %c0_0, %c0_1] : memref<1x2x128xbf16, #tpu.memory_space<vmem>>, vector<1x2x128xbf16>
    %1 = vector.shape_cast %0 : vector<1x2x128xbf16> to vector<2x128xbf16>
    %c0_2 = arith.constant 0 : index
    %c0_3 = arith.constant 0 : index
    %c0_4 = arith.constant 0 : index
    %2 = vector.load %arg3[%c0_2, %c0_3, %c0_4] : memref<1x128x128xbf16, #tpu.memory_space<vmem>>, vector<1x128x128xbf16>
    %3 = vector.shape_cast %2 : vector<1x128x128xbf16> to vector<128x128xbf16>
    %cst = arith.constant dense<0.000000e+00> : vector<2x128xf32>
    %4 = tpu.matmul %1, %3, %cst {dimension_numbers = #tpu.dot_dimension_numbers<[1], [0], [0], [1], [0, 0, 1, 1], [], []>} : vector<2x128xbf16>, vector<128x128xbf16>, vector<2x128xf32> -> vector<2x128xf32>
    %c0_5 = arith.constant 0 : index
    %c0_6 = arith.constant 0 : index
    %c0_7 = arith.constant 0 : index
    %5 = vector.load %arg4[%c0_5, %c0_6, %c0_7] : memref<1x1x128xf32, #tpu.memory_space<vmem>>, vector<1x1x128xf32>
    %6 = vector.shape_cast %5 : vector<1x1x128xf32> to vector<1x128xf32>
    %7 = vector.broadcast %6 : vector<1x128xf32> to vector<2x128xf32>
    %8 = arith.addf %4, %7 : vector<2x128xf32>
    %cst_8 = arith.constant 0.000000e+00 : f32
    %9 = vector.broadcast %cst_8 : f32 to vector<2x128xf32>
    %10 = arith.subf %9, %8 : vector<2x128xf32>
    %11 = math.exp %10 : vector<2x128xf32>
    %cst_9 = arith.constant 1.000000e+00 : f32
    %12 = vector.broadcast %cst_9 : f32 to vector<2x128xf32>
    %13 = arith.addf %12, %11 : vector<2x128xf32>
    %cst_10 = arith.constant 1.000000e+00 : f32
    %14 = vector.broadcast %cst_10 : f32 to vector<2x128xf32>
    %15 = arith.divf %14, %13 : vector<2x128xf32>
    %16 = arith.mulf %8, %15 : vector<2x128xf32>
    %c0_11 = arith.constant 0 : index
    %c0_12 = arith.constant 0 : index
    %c0_13 = arith.constant 0 : index
    %17 = vector.load %arg9[%c0_11, %c0_12, %c0_13] : memref<1x2x128xf32, #tpu.memory_space<vmem>>, vector<1x2x128xf32>
    %18 = vector.shape_cast %17 : vector<1x2x128xf32> to vector<2x128xf32>
    %19 = vector.shape_cast %16 : vector<2x128xf32> to vector<1x2x128xf32>
    tpu.vector_store %arg9[%c0_11, %c0_12, %c0_13], %19 {strides = array<i32>} : memref<1x2x128xf32, #tpu.memory_space<vmem>>, vector<1x2x128xf32>,
    %20 = arith.truncf %16 : vector<2x128xf32> to vector<2x128xbf16>
    %c0_14 = arith.constant 0 : index
    %c0_15 = arith.constant 0 : index
    %c0_16 = arith.constant 0 : index
    %21 = vector.load %arg5[%c0_14, %c0_15, %c0_16] : memref<1x128x64xbf16, #tpu.memory_space<vmem>>, vector<1x128x64xbf16>
    %22 = vector.shape_cast %21 : vector<1x128x64xbf16> to vector<128x64xbf16>
    %cst_17 = arith.constant dense<0.000000e+00> : vector<2x64xf32>
    %23 = tpu.matmul %20, %22, %cst_17 {dimension_numbers = #tpu.dot_dimension_numbers<[1], [0], [0], [1], [0, 0, 1, 1], [], []>} : vector<2x128xbf16>, vector<128x64xbf16>, vector<2x64xf32> -> vector<2x64xf32>
    %c0_18 = arith.constant 0 : index
    %c0_19 = arith.constant 0 : index
    %c0_20 = arith.constant 0 : index
    %24 = vector.load %arg6[%c0_18, %c0_19, %c0_20] : memref<1x1x64xf32, #tpu.memory_space<vmem>>, vector<1x1x64xf32>
    %25 = vector.shape_cast %24 : vector<1x1x64xf32> to vector<1x64xf32>
    %26 = vector.broadcast %25 : vector<1x64xf32> to vector<2x64xf32>
    %27 = arith.addf %23, %26 : vector<2x64xf32>
    %c0_21 = arith.constant 0 : index
    %c0_22 = arith.constant 0 : index
    %c0_23 = arith.constant 0 : index
    %28 = vector.load %arg2[%c0_21, %c0_22, %c0_23] : memref<1x2x64xf32, #tpu.memory_space<vmem>>, vector<1x2x64xf32>
    %29 = vector.shape_cast %28 : vector<1x2x64xf32> to vector<2x64xf32>
    %30 = arith.mulf %27, %29 : vector<2x64xf32>
    %31 = arith.truncf %30 : vector<2x64xf32> to vector<2x64xbf16>
    %c0_24 = arith.constant 0 : index
    %c0_25 = arith.constant 0 : index
    %c0_26 = arith.constant 0 : index
    %32 = vector.load %arg7[%c0_24, %c0_25, %c0_26] : memref<1x64x5xbf16, #tpu.memory_space<vmem>>, vector<1x64x5xbf16>
    %33 = vector.shape_cast %32 : vector<1x64x5xbf16> to vector<64x5xbf16>
    %cst_27 = arith.constant dense<0.000000e+00> : vector<2x5xf32>
    %34 = tpu.matmul %31, %33, %cst_27 {dimension_numbers = #tpu.dot_dimension_numbers<[1], [0], [0], [1], [0, 0, 1, 1], [], []>} : vector<2x64xbf16>, vector<64x5xbf16>, vector<2x5xf32> -> vector<2x5xf32>
    %c0_28 = arith.constant 0 : index
    %c0_29 = arith.constant 0 : index
    %c0_30 = arith.constant 0 : index
    %35 = vector.load %arg8[%c0_28, %c0_29, %c0_30] : memref<1x1x5xf32, #tpu.memory_space<vmem>>, vector<1x1x5xf32>
    %36 = vector.shape_cast %35 : vector<1x1x5xf32> to vector<1x5xf32>
    %37 = vector.broadcast %36 : vector<1x5xf32> to vector<2x5xf32>
    %38 = arith.addf %34, %37 : vector<2x5xf32>
    %cst_31 = arith.constant 0.000000e+00 : f32
    %39 = vector.broadcast %cst_31 : f32 to vector<2x5xf32>
    %40 = arith.maximumf %38, %39 : vector<2x5xf32>
    %c0_32 = arith.constant 0 : index
    %c0_33 = arith.constant 0 : index
    %c0_34 = arith.constant 0 : index
    %41 = vector.load %arg10[%c0_32, %c0_33, %c0_34] : memref<1x2x5xf32, #tpu.memory_space<vmem>>, vector<1x2x5xf32>
    %42 = vector.shape_cast %41 : vector<1x2x5xf32> to vector<2x5xf32>
    %43 = vector.shape_cast %40 : vector<2x5xf32> to vector<1x2x5xf32>
    tpu.vector_store %arg10[%c0_32, %c0_33, %c0_34], %43 {strides = array<i32>} : memref<1x2x5xf32, #tpu.memory_space<vmem>>, vector<1x2x5xf32>,
    return
  }
  func.func @transform_0(%arg0: i32) -> (i32, i32, i32) {
    %c0_i32 = arith.constant 0 : i32
    %c0_i32_0 = arith.constant 0 : i32
    %c0_i32_1 = arith.constant 0 : i32
    return %arg0, %c0_i32, %c0_i32_0 : i32, i32, i32
  }
  func.func @transform_1(%arg0: i32) -> (i32, i32, i32) {
    %c0_i32 = arith.constant 0 : i32
    %c0_i32_0 = arith.constant 0 : i32
    %c0_i32_1 = arith.constant 0 : i32
    return %arg0, %c0_i32, %c0_i32_0 : i32, i32, i32
  }
  func.func @transform_2(%arg0: i32) -> (i32, i32, i32) {
    %c0_i32 = arith.constant 0 : i32
    %c0_i32_0 = arith.constant 0 : i32
    %c0_i32_1 = arith.constant 0 : i32
    return %arg0, %c0_i32, %c0_i32_0 : i32, i32, i32
  }
  func.func @transform_3(%arg0: i32) -> (i32, i32, i32) {
    %c0_i32 = arith.constant 0 : i32
    %c0_i32_0 = arith.constant 0 : i32
    %c0_i32_1 = arith.constant 0 : i32
    return %arg0, %c0_i32, %c0_i32_0 : i32, i32, i32
  }
  func.func @transform_4(%arg0: i32) -> (i32, i32, i32) {
    %c0_i32 = arith.constant 0 : i32
    %c0_i32_0 = arith.constant 0 : i32
    %c0_i32_1 = arith.constant 0 : i32
    return %arg0, %c0_i32, %c0_i32_0 : i32, i32, i32
  }
  func.func @transform_5(%arg0: i32) -> (i32, i32, i32) {
    %c0_i32 = arith.constant 0 : i32
    %c0_i32_0 = arith.constant 0 : i32
    %c0_i32_1 = arith.constant 0 : i32
    return %arg0, %c0_i32, %c0_i32_0 : i32, i32, i32
  }
  func.func @transform_6(%arg0: i32) -> (i32, i32, i32) {
    %c0_i32 = arith.constant 0 : i32
    %c0_i32_0 = arith.constant 0 : i32
    %c0_i32_1 = arith.constant 0 : i32
    return %arg0, %c0_i32, %c0_i32_0 : i32, i32, i32
  }
  func.func @transform_7(%arg0: i32) -> (i32, i32, i32) {
    %c0_i32 = arith.constant 0 : i32
    %c0_i32_0 = arith.constant 0 : i32
    %c0_i32_1 = arith.constant 0 : i32
    return %arg0, %c0_i32, %c0_i32_0 : i32, i32, i32
  }
  func.func @transform_8(%arg0: i32) -> (i32, i32, i32) {
    %c0_i32 = arith.constant 0 : i32
    %c0_i32_0 = arith.constant 0 : i32
    %c0_i32_1 = arith.constant 0 : i32
    return %arg0, %c0_i32, %c0_i32_0 : i32, i32, i32
  }
  func.func @transform_9(%arg0: i32) -> (i32, i32, i32) {
    %c0_i32 = arith.constant 0 : i32
    %c0_i32_0 = arith.constant 0 : i32
    %c0_i32_1 = arith.constant 0 : i32
    return %arg0, %c0_i32, %c0_i32_0 : i32, i32, i32
  }
}

module attributes {stable_mosaic.version = 11 : i64} {
  func.func @_joint_v_kernel(%arg0: memref<2x64xf32, #tpu.memory_space<vmem>>, %arg1: memref<64x32xbf16, #tpu.memory_space<vmem>>, %arg2: memref<1x32xf32, #tpu.memory_space<vmem>>, %arg3: memref<32x64xbf16, #tpu.memory_space<vmem>>, %arg4: memref<1x64xf32, #tpu.memory_space<vmem>>, %arg5: memref<64x4xbf16, #tpu.memory_space<vmem>>, %arg6: memref<1x4xf32, #tpu.memory_space<vmem>>, %arg7: memref<1x1xf32, #tpu.memory_space<vmem>>) attributes {dimension_semantics = [], scalar_prefetch = 0 : i64, scratch_operands = 0 : i64, tpu.core_type = #tpu.core_type<tc>} {
    %c0 = arith.constant 0 : index
    %c0_0 = arith.constant 0 : index
    %0 = vector.load %arg0[%c0, %c0_0] : memref<2x64xf32, #tpu.memory_space<vmem>>, vector<2x64xf32>
    %1 = arith.truncf %0 : vector<2x64xf32> to vector<2x64xbf16>
    %c0_1 = arith.constant 0 : index
    %c0_2 = arith.constant 0 : index
    %2 = vector.load %arg1[%c0_1, %c0_2] : memref<64x32xbf16, #tpu.memory_space<vmem>>, vector<64x32xbf16>
    %cst = arith.constant dense<0.000000e+00> : vector<2x32xf32>
    %3 = tpu.matmul %1, %2, %cst {dimension_numbers = #tpu.dot_dimension_numbers<[1], [0], [0], [1], [0, 0, 1, 1], [], []>} : vector<2x64xbf16>, vector<64x32xbf16>, vector<2x32xf32> -> vector<2x32xf32>
    %c0_3 = arith.constant 0 : index
    %c0_4 = arith.constant 0 : index
    %4 = vector.load %arg2[%c0_3, %c0_4] : memref<1x32xf32, #tpu.memory_space<vmem>>, vector<1x32xf32>
    %5 = vector.broadcast %4 : vector<1x32xf32> to vector<2x32xf32>
    %6 = arith.addf %3, %5 : vector<2x32xf32>
    %cst_5 = arith.constant 0.000000e+00 : f32
    %7 = vector.broadcast %cst_5 : f32 to vector<2x32xf32>
    %8 = arith.maximumf %6, %7 : vector<2x32xf32>
    %9 = arith.truncf %8 : vector<2x32xf32> to vector<2x32xbf16>
    %c0_6 = arith.constant 0 : index
    %c0_7 = arith.constant 0 : index
    %10 = vector.load %arg3[%c0_6, %c0_7] : memref<32x64xbf16, #tpu.memory_space<vmem>>, vector<32x64xbf16>
    %cst_8 = arith.constant dense<0.000000e+00> : vector<2x64xf32>
    %11 = tpu.matmul %9, %10, %cst_8 {dimension_numbers = #tpu.dot_dimension_numbers<[1], [0], [0], [1], [0, 0, 1, 1], [], []>} : vector<2x32xbf16>, vector<32x64xbf16>, vector<2x64xf32> -> vector<2x64xf32>
    %c0_9 = arith.constant 0 : index
    %c0_10 = arith.constant 0 : index
    %12 = vector.load %arg4[%c0_9, %c0_10] : memref<1x64xf32, #tpu.memory_space<vmem>>, vector<1x64xf32>
    %13 = vector.broadcast %12 : vector<1x64xf32> to vector<2x64xf32>
    %14 = arith.addf %11, %13 : vector<2x64xf32>
    %cst_11 = arith.constant 0.000000e+00 : f32
    %15 = vector.broadcast %cst_11 : f32 to vector<2x64xf32>
    %16 = arith.maximumf %14, %15 : vector<2x64xf32>
    %17 = arith.truncf %16 : vector<2x64xf32> to vector<2x64xbf16>
    %c0_12 = arith.constant 0 : index
    %c0_13 = arith.constant 0 : index
    %18 = vector.load %arg5[%c0_12, %c0_13] : memref<64x4xbf16, #tpu.memory_space<vmem>>, vector<64x4xbf16>
    %cst_14 = arith.constant dense<0.000000e+00> : vector<2x4xf32>
    %19 = tpu.matmul %17, %18, %cst_14 {dimension_numbers = #tpu.dot_dimension_numbers<[1], [0], [0], [1], [0, 0, 1, 1], [], []>} : vector<2x64xbf16>, vector<64x4xbf16>, vector<2x4xf32> -> vector<2x4xf32>
    %c0_15 = arith.constant 0 : index
    %c0_16 = arith.constant 0 : index
    %20 = vector.load %arg6[%c0_15, %c0_16] : memref<1x4xf32, #tpu.memory_space<vmem>>, vector<1x4xf32>
    %21 = vector.broadcast %20 : vector<1x4xf32> to vector<2x4xf32>
    %22 = arith.addf %19, %21 : vector<2x4xf32>
    %cst_17 = arith.constant 0.000000e+00 : f32
    %23 = vector.broadcast %cst_17 : f32 to vector<2x4xf32>
    %24 = arith.maximumf %22, %23 : vector<2x4xf32>
    %cst_18 = arith.constant dense<0.000000e+00> : vector<2xf32>
    %25 = vector.multi_reduction <add>, %24, %cst_18 [1] : vector<2x4xf32> to vector<2xf32>
    %26 = vector.shape_cast %25 : vector<2xf32> to vector<2x1xf32>
    %cst_19 = arith.constant dense<0.000000e+00> : vector<1xf32>
    %27 = vector.multi_reduction <add>, %26, %cst_19 [0] : vector<2x1xf32> to vector<1xf32>
    %28 = vector.shape_cast %27 : vector<1xf32> to vector<1x1xf32>
    %cst_20 = arith.constant 1.250000e-01 : f32
    %29 = vector.broadcast %cst_20 : f32 to vector<1x1xf32>
    %30 = arith.mulf %28, %29 : vector<1x1xf32>
    %c0_21 = arith.constant 0 : index
    %c0_22 = arith.constant 0 : index
    %31 = vector.load %arg7[%c0_21, %c0_22] : memref<1x1xf32, #tpu.memory_space<vmem>>, vector<1x1xf32>
    tpu.vector_store %arg7[%c0_21, %c0_22], %30 {strides = array<i32>} : memref<1x1xf32, #tpu.memory_space<vmem>>, vector<1x1xf32>,
    return
  }
}

module attributes {stable_mosaic.version = 11 : i64} {
  func.func @_joint_q_kernel(%arg0: memref<2x64xf32, #tpu.memory_space<vmem>>, %arg1: memref<64x32xbf16, #tpu.memory_space<vmem>>, %arg2: memref<1x32xf32, #tpu.memory_space<vmem>>, %arg3: memref<32x64xbf16, #tpu.memory_space<vmem>>, %arg4: memref<1x64xf32, #tpu.memory_space<vmem>>, %arg5: memref<64x640xbf16, #tpu.memory_space<vmem>>, %arg6: memref<1x640xf32, #tpu.memory_space<vmem>>, %arg7: memref<2x640xf32, #tpu.memory_space<vmem>>) attributes {dimension_semantics = [], scalar_prefetch = 0 : i64, scratch_operands = 0 : i64, tpu.core_type = #tpu.core_type<tc>} {
    %c0 = arith.constant 0 : index
    %c0_0 = arith.constant 0 : index
    %0 = vector.load %arg0[%c0, %c0_0] : memref<2x64xf32, #tpu.memory_space<vmem>>, vector<2x64xf32>
    %1 = arith.truncf %0 : vector<2x64xf32> to vector<2x64xbf16>
    %c0_1 = arith.constant 0 : index
    %c0_2 = arith.constant 0 : index
    %2 = vector.load %arg1[%c0_1, %c0_2] : memref<64x32xbf16, #tpu.memory_space<vmem>>, vector<64x32xbf16>
    %cst = arith.constant dense<0.000000e+00> : vector<2x32xf32>
    %3 = tpu.matmul %1, %2, %cst {dimension_numbers = #tpu.dot_dimension_numbers<[1], [0], [0], [1], [0, 0, 1, 1], [], []>} : vector<2x64xbf16>, vector<64x32xbf16>, vector<2x32xf32> -> vector<2x32xf32>
    %c0_3 = arith.constant 0 : index
    %c0_4 = arith.constant 0 : index
    %4 = vector.load %arg2[%c0_3, %c0_4] : memref<1x32xf32, #tpu.memory_space<vmem>>, vector<1x32xf32>
    %5 = vector.broadcast %4 : vector<1x32xf32> to vector<2x32xf32>
    %6 = arith.addf %3, %5 : vector<2x32xf32>
    %cst_5 = arith.constant 0.000000e+00 : f32
    %7 = vector.broadcast %cst_5 : f32 to vector<2x32xf32>
    %8 = arith.maximumf %6, %7 : vector<2x32xf32>
    %9 = arith.truncf %8 : vector<2x32xf32> to vector<2x32xbf16>
    %c0_6 = arith.constant 0 : index
    %c0_7 = arith.constant 0 : index
    %10 = vector.load %arg3[%c0_6, %c0_7] : memref<32x64xbf16, #tpu.memory_space<vmem>>, vector<32x64xbf16>
    %cst_8 = arith.constant dense<0.000000e+00> : vector<2x64xf32>
    %11 = tpu.matmul %9, %10, %cst_8 {dimension_numbers = #tpu.dot_dimension_numbers<[1], [0], [0], [1], [0, 0, 1, 1], [], []>} : vector<2x32xbf16>, vector<32x64xbf16>, vector<2x64xf32> -> vector<2x64xf32>
    %c0_9 = arith.constant 0 : index
    %c0_10 = arith.constant 0 : index
    %12 = vector.load %arg4[%c0_9, %c0_10] : memref<1x64xf32, #tpu.memory_space<vmem>>, vector<1x64xf32>
    %13 = vector.broadcast %12 : vector<1x64xf32> to vector<2x64xf32>
    %14 = arith.addf %11, %13 : vector<2x64xf32>
    %cst_11 = arith.constant 0.000000e+00 : f32
    %15 = vector.broadcast %cst_11 : f32 to vector<2x64xf32>
    %16 = arith.maximumf %14, %15 : vector<2x64xf32>
    %17 = arith.truncf %16 : vector<2x64xf32> to vector<2x64xbf16>
    %c0_12 = arith.constant 0 : index
    %c0_13 = arith.constant 0 : index
    %18 = vector.load %arg5[%c0_12, %c0_13] : memref<64x640xbf16, #tpu.memory_space<vmem>>, vector<64x640xbf16>
    %cst_14 = arith.constant dense<0.000000e+00> : vector<2x640xf32>
    %19 = tpu.matmul %17, %18, %cst_14 {dimension_numbers = #tpu.dot_dimension_numbers<[1], [0], [0], [1], [0, 0, 1, 1], [], []>} : vector<2x64xbf16>, vector<64x640xbf16>, vector<2x640xf32> -> vector<2x640xf32>
    %c0_15 = arith.constant 0 : index
    %c0_16 = arith.constant 0 : index
    %20 = vector.load %arg6[%c0_15, %c0_16] : memref<1x640xf32, #tpu.memory_space<vmem>>, vector<1x640xf32>
    %21 = vector.broadcast %20 : vector<1x640xf32> to vector<2x640xf32>
    %22 = arith.addf %19, %21 : vector<2x640xf32>
    %cst_17 = arith.constant 0.000000e+00 : f32
    %23 = vector.broadcast %cst_17 : f32 to vector<2x640xf32>
    %24 = arith.maximumf %22, %23 : vector<2x640xf32>
    %c0_18 = arith.constant 0 : index
    %c0_19 = arith.constant 0 : index
    %25 = vector.load %arg7[%c0_18, %c0_19] : memref<2x640xf32, #tpu.memory_space<vmem>>, vector<2x640xf32>
    tpu.vector_store %arg7[%c0_18, %c0_19], %24 {strides = array<i32>} : memref<2x640xf32, #tpu.memory_space<vmem>>, vector<2x640xf32>,
    return
  }
}

</mosaic_0001>

<bundles_post_ra>
// kernel: central_forward.6
= control target key start
LH: loop header
LB: loop body
LE: loop exit
PB: predicated region body
PF: predicated region fallthrough
CT: control target
= control target key end

     0   :  { %s2958_s18 = smov 0   ;;  %s5708_s0 = inlined_call_operand.vmem [shape: bf16[4,648,128], index: 0, kind: input, shape index: {}]   ;;  %s5709_s1 = inlined_call_operand.vmem [shape: bf16[4,128,16], index: 1, kind: input, shape index: {}]   ;;  %s5710_s2 = inlined_call_operand.vmem [shape: f32[4,1,16], index: 2, kind: input, shape index: {}]   ;;  %s5711_s3 = inlined_call_operand.vmem [shape: f32[4,1,16], index: 3, kind: input, shape index: {}]   ;;  %s5712_s4 = inlined_call_operand.vmem [shape: f32[4,1,16], index: 4, kind: input, shape index: {}]   ;;  %s5713_s5 = inlined_call_operand.vmem [shape: bf16[4,648,16], index: 5, kind: output, shape index: {}]  }
   0x1 LB: > { %s2385_s19 = sadd.s32 4294967295, %s2924_s18   ;;  %p2389_p0 = scmp.ge.s32.totalorder %s2924_s18, 1  ;;  %s2924_s18 = sphi %s2958_s18, %s15_s18  }
   0x2   : > { %p221_p1 = scmp.lt.s32.totalorder %s2924_s18, 5 }
   0x4   : > { %p222_p2 = pnand %p2389_p0, %p221_p1 }
   0x6   : > { %225 = sbr.rel (%p222_p2) target bundleno = 845 (0x34d), region = 40 }
   0xd   : > { %p263_p3 = scmp.lt.s32.totalorder %s2385_s19, 3  ;;  %v2926_v0 = vmov 0.0   ;;  %vm2927_vm0 = vmmov 0   ;;  %vm1044_vm1 = vcmask 130048   ;;  %vm2209_vm2 = vcmask 125952  }
   0xe   : > { %2660 = vmatprep.subr.bf16.mxu0 %v2926_v0  ;;  %2676 = vmatprep.mubr.msk.bf16.mxu0 %vm2927_vm0, %v2926_v0 }
   0xf   : > { %s6268_s19 = smov (!%p263_p3, %s2385_s19), 3  ;;  %2840 = vmatprep.subr.bf16.mxu1 %v2926_v0  ;;  %2760 = vmatprep.mubr.msk.bf16.mxu1 %vm2927_vm0, %v2926_v0 }
  0x10   : > { %s2529_s20 = sshll.u32 %s6268_s19, 6  ;;  %s2856_s24 = smul.u32 324, %s6268_s19 }
  0x11   : > { %s2978_s23 = scalar_lea.vmem %s5709_s1, %s2529_s20  ;;  %s275_s30 = scalar_lea.vmem %s5710_s2, %s6268_s19 }
  0x12   : > { %v2867_v1 = vld [vmem:[%s2978_s23] sm:$0xff]   ;;  %v2868_v2 = vld [vmem:[%s2978_s23 + $0x8] sm:$0xff]   ;;  %v2869_v3 = vld [vmem:[%s2978_s23 + $0x10] sm:$0xff]   ;;  %s2992_s27 = scalar_lea.vmem %s5708_s0, %s2856_s24  ;;  %s278_s8 = scalar_lea.vmem %s5711_s3, %s6268_s19 }
  0x13   : > { %2661 = vmatpush3.bf16.msra.mxu0 %v2867_v1  ;;  %2848 = vmatpush3.bf16.msra.mxu1 %v2867_v1  ;;  %v2870_v4 = vld [vmem:[%s2978_s23 + $0x18] sm:$0xff]   ;;  %v2871_v5 = vld [vmem:[%s2978_s23 + $0x20] sm:$0xff]   ;;  %v2872_v6 = vld [vmem:[%s2978_s23 + $0x28] sm:$0xff]   ;;  %s281_s11 = scalar_lea.vmem %s5712_s4, %s6268_s19  ;;  %s5294_s14 = scalar_lea.vmem %s5713_s5, %s2856_s24 }
  0x14   : > { %2662 = vmatprep.subr.bf16.mxu0 %v2926_v0  ;;  %2841 = vmatprep.subr.bf16.mxu1 %v2926_v0  ;;  %v2873_v7 = vld [vmem:[%s2978_s23 + $0x30] sm:$0xff]   ;;  %v2874_v8 = vld [vmem:[%s2978_s23 + $0x38] sm:$0xff]   ;;  %v2875_v9 = vld [vmem:[%s2992_s27] sm:$0xff]  }
  0x15   : > { %v2886_v10 = vld [vmem:[%s2992_s27 + $0xa8] sm:$0xff]   ;;  %v2888_v12 = vld [vmem:[%s2992_s27 + $0xb0] sm:$0xff]   ;;  %v2890_v14 = vld [vmem:[%s2992_s27 + $0xb8] sm:$0xff]  }
  0x16   : > { %v2876_v11 = vld [vmem:[%s2992_s27 + $0x8] sm:$0xff]   ;;  %v2877_v13 = vld [vmem:[%s2992_s27 + $0x10] sm:$0xff]   ;;  %v2878_v15 = vld [vmem:[%s2992_s27 + $0x18] sm:$0xff]  }
  0x17   : > { %2663 = vmatpush3.bf16.msra.mxu0 %v2868_v2  ;;  %2849 = vmatpush3.bf16.msra.mxu1 %v2868_v2  ;;  %v2892_v16 = vld [vmem:[%s2992_s27 + $0xc0] sm:$0xff]   ;;  %v2894_v18 = vld [vmem:[%s2992_s27 + $0xc8] sm:$0xff]   ;;  %v2896_v20 = vld [vmem:[%s2992_s27 + $0xd0] sm:$0xff]  }
  0x18   : > { %2664 = vmatprep.subr.bf16.mxu0 %v2926_v0  ;;  %2842 = vmatprep.subr.bf16.mxu1 %v2926_v0  ;;  %v2879_v17 = vld [vmem:[%s2992_s27 + $0x20] sm:$0xff]   ;;  %v2880_v19 = vld [vmem:[%s2992_s27 + $0x28] sm:$0xff]   ;;  %v2881_v21 = vld [vmem:[%s2992_s27 + $0x30] sm:$0xff]  }
  0x19   : > { %v2898_v22 = vld [vmem:[%s2992_s27 + $0xd8] sm:$0xff]   ;;  %v2900_v24 = vld [vmem:[%s2992_s27 + $0xe0] sm:$0xff]   ;;  %v2902_v26 = vld [vmem:[%s2992_s27 + $0xe8] sm:$0xff]  }
  0x1a   : > { %v2882_v23 = vld [vmem:[%s2992_s27 + $0x38] sm:$0xff]   ;;  %v2883_v25 = vld [vmem:[%s2992_s27 + $0x40] sm:$0xff]   ;;  %v2884_v27 = vld [vmem:[%s2992_s27 + $0x48] sm:$0xff]  }
  0x1b   : > { %2665 = vmatpush3.bf16.msra.mxu0 %v2869_v3  ;;  %2850 = vmatpush3.bf16.msra.mxu1 %v2869_v3  ;;  %v2904_v28 = vld [vmem:[%s2992_s27 + $0xf0] sm:$0xff]   ;;  %v2906_v30 = vld [vmem:[%s2992_s27 + $0xf8] sm:$0xff]   ;;  %v2907_v32 = vld [vmem:[%s2992_s27 + $0x100] sm:$0xff]  }
  0x1c   : > { %2666 = vmatprep.subr.bf16.mxu0 %v2926_v0  ;;  %2843 = vmatprep.subr.bf16.mxu1 %v2926_v0  ;;  %v2885_v29 = vld [vmem:[%s2992_s27 + $0x50] sm:$0xff]   ;;  %v2887_v31 = vld [vmem:[%s2992_s27 + $0x58] sm:$0xff]   ;;  %v2889_v33 = vld [vmem:[%s2992_s27 + $0x60] sm:$0xff]  }
  0x1d   : > { %v2908_v34 = vld [vmem:[%s2992_s27 + $0x108] sm:$0xff]   ;;  %v2909_v36 = vld [vmem:[%s2992_s27 + $0x110] sm:$0xff]   ;;  %v2910_v38 = vld [vmem:[%s2992_s27 + $0x118] sm:$0xff]  }
  0x1e   : > { %v2891_v35 = vld [vmem:[%s2992_s27 + $0x68] sm:$0xff]   ;;  %v2893_v37 = vld [vmem:[%s2992_s27 + $0x70] sm:$0xff]   ;;  %v2895_v39 = vld [vmem:[%s2992_s27 + $0x78] sm:$0xff]  }
  0x1f   : > { %2667 = vmatpush3.bf16.msra.mxu0 %v2870_v4  ;;  %2851 = vmatpush3.bf16.msra.mxu1 %v2870_v4  ;;  %v2911_v40 = vld [vmem:[%s2992_s27 + $0x120] sm:$0xff]   ;;  %v2912_v42 = vld [vmem:[%s2992_s27 + $0x128] sm:$0xff]   ;;  %v2913_v44 = vld [vmem:[%s2992_s27 + $0x130] sm:$0xff]  }
  0x20   : > { %2668 = vmatprep.subr.bf16.mxu0 %v2926_v0  ;;  %2844 = vmatprep.subr.bf16.mxu1 %v2926_v0  ;;  %v2897_v41 = vld [vmem:[%s2992_s27 + $0x80] sm:$0xff]   ;;  %v2899_v43 = vld [vmem:[%s2992_s27 + $0x88] sm:$0xff]   ;;  %v2901_v45 = vld [vmem:[%s2992_s27 + $0x90] sm:$0xff]  }
  0x21   : > { %v2914_v46 = vld [vmem:[%s2992_s27 + $0x138] sm:$0xff]   ;;  %v2915_v48 = vld [vmem:[%s2992_s27 + $0x140] ss:$0 sps:$4 sm:$0xff]  }
  0x22   : > { %v2903_v47 = vld [vmem:[%s2992_s27 + $0x98] sm:$0xff]   ;;  %v2905_v49 = vld [vmem:[%s2992_s27 + $0xa0] sm:$0xff]  }
  0x23   : > { %2669 = vmatpush3.bf16.msra.mxu0 %v2871_v5  ;;  %2852 = vmatpush3.bf16.msra.mxu1 %v2871_v5 }
  0x24   : > { %2670 = vmatprep.subr.bf16.mxu0 %v2926_v0  ;;  %2845 = vmatprep.subr.bf16.mxu1 %v2926_v0 }
  0x27   : > { %2671 = vmatpush3.bf16.msra.mxu0 %v2872_v6  ;;  %2853 = vmatpush3.bf16.msra.mxu1 %v2872_v6 }
  0x28   : > { %2672 = vmatprep.subr.bf16.mxu0 %v2926_v0  ;;  %2846 = vmatprep.subr.bf16.mxu1 %v2926_v0 }
  0x2b   : > { %2673 = vmatpush3.bf16.msra.mxu0 %v2873_v7  ;;  %2854 = vmatpush3.bf16.msra.mxu1 %v2873_v7 }
  0x2c   : > { %2674 = vmatprep.subr.bf16.mxu0 %v2926_v0  ;;  %2847 = vmatprep.subr.bf16.mxu1 %v2926_v0 }
  0x2f   : > { %2675 = vmatpush3.bf16.msra.mxu0 %v2874_v8  ;;  %2855 = vmatpush3.bf16.msra.mxu1 %v2874_v8 }
  0x32   : > { %2677 = vmatmul.mubr.bf16.vlgmr.msra.gmra.mrb[0].mxu0 %v2875_v9  ;;  %2761 = vmatmul.mubr.bf16.vlgmr.msra.gmra.mrb[0].mxu1 %v2886_v10 }
  0x33   : > { %2680 = vmatprep.mubr.msk.bf16.mxu0 %vm2927_vm0, %v2926_v0  ;;  %2764 = vmatprep.mubr.msk.bf16.mxu1 %vm2927_vm0, %v2926_v0 }
  0x3a   : > { %2681 = vmatmul.mubr.bf16.gmra.mrb[4].mxu0 %v2876_v11  ;;  %2765 = vmatmul.mubr.bf16.gmra.mrb[4].mxu1 %v2888_v12 }
  0x3b   : > { %2684 = vmatprep.mubr.msk.bf16.mxu0 %vm2927_vm0, %v2926_v0  ;;  %2768 = vmatprep.mubr.msk.bf16.mxu1 %vm2927_vm0, %v2926_v0 }
  0x42   : > { %2685 = vmatmul.mubr.bf16.gmra.mrb[8].mxu0 %v2877_v13  ;;  %2769 = vmatmul.mubr.bf16.gmra.mrb[8].mxu1 %v2890_v14 }
  0x43   : > { %2688 = vmatprep.mubr.msk.bf16.mxu0 %vm2927_vm0, %v2926_v0  ;;  %2772 = vmatprep.mubr.msk.bf16.mxu1 %vm2927_vm0, %v2926_v0 }
  0x4a   : > { %2689 = vmatmul.mubr.bf16.gmra.mrb[12].mxu0 %v2878_v15  ;;  %2773 = vmatmul.mubr.bf16.gmra.mrb[12].mxu1 %v2892_v16 }
  0x4b   : > { %2692 = vmatprep.mubr.msk.bf16.mxu0 %vm2927_vm0, %v2926_v0  ;;  %2776 = vmatprep.mubr.msk.bf16.mxu1 %vm2927_vm0, %v2926_v0 }
  0x52   : > { %2693 = vmatmul.mubr.bf16.gmra.mrb[16].mxu0 %v2879_v17  ;;  %2777 = vmatmul.mubr.bf16.gmra.mrb[16].mxu1 %v2894_v18 }
  0x53   : > { %2696 = vmatprep.mubr.msk.bf16.mxu0 %vm2927_vm0, %v2926_v0  ;;  %2780 = vmatprep.mubr.msk.bf16.mxu1 %vm2927_vm0, %v2926_v0 }
  0x5a   : > { %2697 = vmatmul.mubr.bf16.gmra.mrb[20].mxu0 %v2880_v19  ;;  %2781 = vmatmul.mubr.bf16.gmra.mrb[20].mxu1 %v2896_v20 }
  0x5b   : > { %2700 = vmatprep.mubr.msk.bf16.mxu0 %vm2927_vm0, %v2926_v0  ;;  %2784 = vmatprep.mubr.msk.bf16.mxu1 %vm2927_vm0, %v2926_v0 }
  0x62   : > { %2701 = vmatmul.mubr.bf16.gmra.mrb[24].mxu0 %v2881_v21  ;;  %2785 = vmatmul.mubr.bf16.gmra.mrb[24].mxu1 %v2898_v22 }
  0x63   : > { %2704 = vmatprep.mubr.msk.bf16.mxu0 %vm2927_vm0, %v2926_v0  ;;  %2788 = vmatprep.mubr.msk.bf16.mxu1 %vm2927_vm0, %v2926_v0 }
  0x6a   : > { %2705 = vmatmul.mubr.bf16.gmra.mrb[28].mxu0 %v2882_v23  ;;  %2789 = vmatmul.mubr.bf16.gmra.mrb[28].mxu1 %v2900_v24 }
  0x6b   : > { %2708 = vmatprep.mubr.msk.bf16.mxu0 %vm2927_vm0, %v2926_v0  ;;  %2792 = vmatprep.mubr.msk.bf16.mxu1 %vm2927_vm0, %v2926_v0 }
  0x72   : > { %2709 = vmatmul.mubr.bf16.gmra.mrb[32].mxu0 %v2883_v25  ;;  %2793 = vmatmul.mubr.bf16.gmra.mrb[32].mxu1 %v2902_v26  ;;  %v3153_v26 = vld [vmem:[%s275_s30] ss:$0 sm:$0xff] }
  0x73   : > { %2712 = vmatprep.mubr.msk.bf16.mxu0 %vm2927_vm0, %v2926_v0  ;;  %2796 = vmatprep.mubr.msk.bf16.mxu1 %vm2927_vm0, %v2926_v0 }
  0x7a   : > { %2713 = vmatmul.mubr.bf16.gmra.mrb[36].mxu0 %v2884_v27  ;;  %2797 = vmatmul.mubr.bf16.gmra.mrb[36].mxu1 %v2904_v28 }
  0x7b   : > { %2716 = vmatprep.mubr.msk.bf16.mxu0 %vm2927_vm0, %v2926_v0  ;;  %2800 = vmatprep.mubr.msk.bf16.mxu1 %vm2927_vm0, %v2926_v0 }
  0x82   : > { %2717 = vmatmul.mubr.bf16.gmra.mrb[40].mxu0 %v2885_v29  ;;  %2801 = vmatmul.mubr.bf16.gmra.mrb[40].mxu1 %v2906_v30 }
  0x83   : > { %2720 = vmatprep.mubr.msk.bf16.mxu0 %vm2927_vm0, %v2926_v0  ;;  %2804 = vmatprep.mubr.msk.bf16.mxu1 %vm2927_vm0, %v2926_v0 }
  0x8a   : > { %2721 = vmatmul.mubr.bf16.gmra.mrb[44].mxu0 %v2887_v31  ;;  %2805 = vmatmul.mubr.bf16.gmra.mrb[44].mxu1 %v2907_v32 }
  0x8b   : > { %2724 = vmatprep.mubr.msk.bf16.mxu0 %vm2927_vm0, %v2926_v0  ;;  %2808 = vmatprep.mubr.msk.bf16.mxu1 %vm2927_vm0, %v2926_v0 }
  0x92   : > { %2725 = vmatmul.mubr.bf16.gmra.mrb[48].mxu0 %v2889_v33  ;;  %2809 = vmatmul.mubr.bf16.gmra.mrb[48].mxu1 %v2908_v34 }
  0x93   : > { %2728 = vmatprep.mubr.msk.bf16.mxu0 %vm2927_vm0, %v2926_v0  ;;  %2812 = vmatprep.mubr.msk.bf16.mxu1 %vm2927_vm0, %v2926_v0 }
  0x9a   : > { %2729 = vmatmul.mubr.bf16.gmra.mrb[52].mxu0 %v2891_v35  ;;  %2813 = vmatmul.mubr.bf16.gmra.mrb[52].mxu1 %v2909_v36 }
  0x9b   : > { %2732 = vmatprep.mubr.msk.bf16.mxu0 %vm2927_vm0, %v2926_v0  ;;  %2816 = vmatprep.mubr.msk.bf16.mxu1 %vm2927_vm0, %v2926_v0 }
  0xa2   : > { %2733 = vmatmul.mubr.bf16.gmra.mrb[56].mxu0 %v2893_v37  ;;  %2817 = vmatmul.mubr.bf16.gmra.mrb[56].mxu1 %v2910_v38 }
  0xa3   : > { %2736 = vmatprep.mubr.msk.bf16.mxu0 %vm2927_vm0, %v2926_v0  ;;  %2820 = vmatprep.mubr.msk.bf16.mxu1 %vm2927_vm0, %v2926_v0 }
  0xaa   : > { %2737 = vmatmul.mubr.bf16.gmra.mrb[60].mxu0 %v2895_v39  ;;  %2821 = vmatmul.mubr.bf16.gmra.mrb[60].mxu1 %v2911_v40 }
  0xab   : > { %2740 = vmatprep.mubr.msk.bf16.mxu0 %vm2927_vm0, %v2926_v0  ;;  %2824 = vmatprep.mubr.msk.bf16.mxu1 %vm2927_vm0, %v2926_v0 }
  0xb2   : > { %2741 = vmatmul.mubr.bf16.gmra.mrb[64].mxu0 %v2897_v41  ;;  %2825 = vmatmul.mubr.bf16.gmra.mrb[64].mxu1 %v2912_v42 }
  0xb3   : > { %2744 = vmatprep.mubr.msk.bf16.mxu0 %vm2927_vm0, %v2926_v0  ;;  %2828 = vmatprep.mubr.msk.bf16.mxu1 %vm2927_vm0, %v2926_v0 }
  0xba   : > { %2745 = vmatmul.mubr.bf16.gmra.mrb[68].mxu0 %v2899_v43  ;;  %2829 = vmatmul.mubr.bf16.gmra.mrb[68].mxu1 %v2913_v44 }
  0xbb   : > { %2748 = vmatprep.mubr.msk.bf16.mxu0 %vm2927_vm0, %v2926_v0  ;;  %2832 = vmatprep.mubr.msk.bf16.mxu1 %vm2927_vm0, %v2926_v0 }
  0xc2   : > { %2749 = vmatmul.mubr.bf16.gmra.mrb[72].mxu0 %v2901_v45  ;;  %2833 = vmatmul.mubr.bf16.gmra.mrb[72].mxu1 %v2914_v46 }
  0xc3   : > { %2752 = vmatprep.mubr.msk.bf16.mxu0 %vm2927_vm0, %v2926_v0  ;;  %2836 = vmatprep.mubr.msk.bf16.mxu1 %vm2927_vm0, %v2926_v0 }
  0xca   : > { %2753 = vmatmul.mubr.bf16.gmra.mrb[76].mxu0 %v2903_v47  ;;  %2837 = vmatmul.mubr.bf16.gmra.mrb[76].mxu1 %v2915_v48 }
  0xcb   : > { %2756 = vmatprep.mubr.msk.bf16.mxu0 %vm2927_vm0, %v2926_v0 }
  0xd2   : > { %2757 = vmatmul.mubr.bf16.gmra.mrb[80].mxu0 %v2905_v49 }
 0x105   : > { %v718_v50 = vpop.f32.mrb[0].mxu0  ;;  %v3129_v51 = vpop.f32.mrb[0].mxu1 }
 0x106   : > { %v2678_v52 = vpop.f32.mrb[1].mxu0  ;;  %v2762_v53 = vpop.f32.mrb[1].mxu1  ;;  %v3163_v34 = vadd.f32 %v3153_v26, %v718_v50 }
 0x107   : > { %v721_v54 = vpop.f32.mrb[2].mxu0  ;;  %v3131_v55 = vpop.f32.mrb[2].mxu1 }
 0x108   : > { %v2679_v56 = vpop.f32.mrb[3].mxu0  ;;  %v2763_v57 = vpop.f32.mrb[3].mxu1  ;;  %v3158_v29 = vadd.f32 %v3153_v26, %v721_v54  ;;  %v1045_v39 = vsel %vm1044_vm1, %v3163_v34, 0.0 }
 0x10a   : > { %v1046_v38 = vsel %vm1044_vm1, %v3158_v29, 0.0 }
 0x10b   : > { %v1047_v42 = vadd.f32 %v1046_v38, %v1045_v39 }
 0x10d   : > { %v726_v58 = vpop.f32.mrb[4].mxu0  ;;  %v3133_v59 = vpop.f32.mrb[4].mxu1 }
 0x10e   : > { %v2682_v60 = vpop.f32.mrb[5].mxu0  ;;  %v2766_v61 = vpop.f32.mrb[5].mxu1  ;;  %v3166_v35 = vadd.f32 %v3153_v26, %v726_v58 }
 0x10f   : > { %v729_v62 = vpop.f32.mrb[6].mxu0  ;;  %v3135_v63 = vpop.f32.mrb[6].mxu1 }
 0x110   : > { %v2683_v0 = vpop.f32.mrb[7].mxu0  ;;  %v2767_v1 = vpop.f32.mrb[7].mxu1  ;;  %v1048_v40 = vsel %vm1044_vm1, %v3166_v35, 0.0  ;;  %v3175_v41 = vadd.f32 %v3153_v26, %v729_v62 }
 0x111   : > { %v1049_v48 = vadd.f32 %v1048_v40, %v1047_v42 }
 0x112   : > { %v1050_v52 = vsel %vm1044_vm1, %v3175_v41, 0.0 }
 0x113   : > { %v1051_v58 = vadd.f32 %v1050_v52, %v1049_v48 }
 0x115   : > { %v734_v2 = vpop.f32.mrb[8].mxu0  ;;  %v3137_v3 = vpop.f32.mrb[8].mxu1 }
 0x116   : > { %v2686_v4 = vpop.f32.mrb[9].mxu0  ;;  %v2770_v5 = vpop.f32.mrb[9].mxu1  ;;  %v3180_v45 = vadd.f32 %v3153_v26, %v734_v2 }
 0x117   : > { %v737_v6 = vpop.f32.mrb[10].mxu0  ;;  %v3139_v7 = vpop.f32.mrb[10].mxu1 }
 0x118   : > { %v2687_v8 = vpop.f32.mrb[11].mxu0  ;;  %v2771_v9 = vpop.f32.mrb[11].mxu1  ;;  %v1052_v56 = vsel %vm1044_vm1, %v3180_v45, 0.0  ;;  %v3189_v57 = vadd.f32 %v3153_v26, %v737_v6 }
 0x119   : > { %v1053_v61 = vadd.f32 %v1052_v56, %v1051_v58 }
 0x11a   : > { %v1054_v1 = vsel %vm1044_vm1, %v3189_v57, 0.0 }
 0x11d   : > { %v742_v10 = vpop.f32.mrb[12].mxu0  ;;  %v3141_v11 = vpop.f32.mrb[12].mxu1 }
 0x11e   : > { %v2690_v12 = vpop.f32.mrb[13].mxu0  ;;  %v2774_v13 = vpop.f32.mrb[13].mxu1  ;;  %v3192_v60 = vadd.f32 %v3153_v26, %v742_v10 }
 0x11f   : > { %v745_v14 = vpop.f32.mrb[14].mxu0  ;;  %v3143_v15 = vpop.f32.mrb[14].mxu1  ;;  %v1055_v13 = vadd.f32 %v1054_v1, %v1053_v61 }
 0x120   : > { %v2691_v16 = vpop.f32.mrb[15].mxu0  ;;  %v2775_v17 = vpop.f32.mrb[15].mxu1  ;;  %v1056_v6 = vsel %vm1044_vm1, %v3192_v60, 0.0  ;;  %v3203_v9 = vadd.f32 %v3153_v26, %v745_v14 }
 0x121   : > { %v1057_v17 = vadd.f32 %v1056_v6, %v1055_v13 }
 0x125   : > { %v750_v18 = vpop.f32.mrb[16].mxu0  ;;  %v3145_v19 = vpop.f32.mrb[16].mxu1 }
 0x126   : > { %v2694_v20 = vpop.f32.mrb[17].mxu0  ;;  %v2778_v21 = vpop.f32.mrb[17].mxu1  ;;  %v3206_v16 = vadd.f32 %v3153_v26, %v750_v18 }
 0x127   : > { %v753_v22 = vpop.f32.mrb[18].mxu0  ;;  %v3147_v23 = vpop.f32.mrb[18].mxu1  ;;  %v1058_v20 = vsel %vm1044_vm1, %v3203_v9, 0.0 }
 0x128   : > { %v2695_v24 = vpop.f32.mrb[19].mxu0  ;;  %v2779_v25 = vpop.f32.mrb[19].mxu1  ;;  %5834 = vst [vmem:[#allocation2_spill] sm:$0xff] %v3206_v16 }
 0x129   : > { %v1060_v25 = vsel %vm1044_vm1, %v3206_v16, 0.0 }
 0x12d   : > { %v758_v27 = vpop.f32.mrb[20].mxu0  ;;  %v3155_v28 = vpop.f32.mrb[20].mxu1 }
 0x12e   : > { %v2698_v30 = vpop.f32.mrb[21].mxu0  ;;  %v2782_v31 = vpop.f32.mrb[21].mxu1  ;;  %v3220_v18 = vadd.f32 %v3153_v26, %v758_v27 }
 0x12f   : > { %v761_v32 = vpop.f32.mrb[22].mxu0  ;;  %v3160_v33 = vpop.f32.mrb[22].mxu1  ;;  %v3215_v30 = vadd.f32 %v3153_v26, %v753_v22 }
 0x130   : > { %v2699_v36 = vpop.f32.mrb[23].mxu0  ;;  %v2783_v37 = vpop.f32.mrb[23].mxu1  ;;  %5836 = vst [vmem:[#allocation4_spill] sm:$0xff] %v3220_v18  ;;  %v3227_v22 = vadd.f32 %v3153_v26, %v761_v32 }
 0x131   : > { %5835 = vst [vmem:[#allocation3_spill] sm:$0xff] %v3215_v30  ;;  %v1059_v36 = vadd.f32 %v1058_v20, %v1057_v17 }
 0x132   : > { %5837 = vst [vmem:[#allocation5_spill] sm:$0xff] %v3227_v22 }
 0x133   : > { %v1061_v42 = vadd.f32 %v1060_v25, %v1059_v36 }
 0x135   : > { %v766_v43 = vpop.f32.mrb[24].mxu0  ;;  %v3177_v44 = vpop.f32.mrb[24].mxu1 }
 0x136   : > { %v2702_v46 = vpop.f32.mrb[25].mxu0  ;;  %v2786_v47 = vpop.f32.mrb[25].mxu1 }
 0x137   : > { %v769_v49 = vpop.f32.mrb[26].mxu0  ;;  %v3182_v50 = vpop.f32.mrb[26].mxu1  ;;  %v1062_v46 = vsel %vm1044_vm1, %v3215_v30, 0.0  ;;  %v1064_v47 = vsel %vm1044_vm1, %v3220_v18, 0.0 }
 0x138   : > { %v2703_v53 = vpop.f32.mrb[27].mxu0  ;;  %v2787_v54 = vpop.f32.mrb[27].mxu1  ;;  %v1063_v48 = vadd.f32 %v1062_v46, %v1061_v42 }
 0x139   : > { %v3232_v54 = vadd.f32 %v3153_v26, %v766_v43 }
 0x13a   : > { %v1065_v58 = vadd.f32 %v1064_v47, %v1063_v48 }
 0x13b   : > { %5838 = vst [vmem:[#allocation6_spill] sm:$0xff] %v3232_v54  ;;  %v1068_v32 = vsel %vm1044_vm1, %v3232_v54, 0.0 }
 0x13d   : > { %v774_v62 = vpop.f32.mrb[28].mxu0  ;;  %v3194_v0 = vpop.f32.mrb[28].mxu1 }
 0x13e   : > { %v2706_v2 = vpop.f32.mrb[29].mxu0  ;;  %v2790_v4 = vpop.f32.mrb[29].mxu1  ;;  %v3244_v43 = vadd.f32 %v3153_v26, %v774_v62 }
 0x13f   : > { %v777_v5 = vpop.f32.mrb[30].mxu0  ;;  %v3198_v8 = vpop.f32.mrb[30].mxu1  ;;  %v1066_v2 = vsel %vm1044_vm1, %v3227_v22, 0.0 }
 0x140   : > { %v2707_v10 = vpop.f32.mrb[31].mxu0  ;;  %v2791_v12 = vpop.f32.mrb[31].mxu1  ;;  %5840 = vst [vmem:[#allocation8_spill] sm:$0xff] %v3244_v43 }
 0x141   : > { %v3241_v10 = vadd.f32 %v3153_v26, %v769_v49  ;;  %v1067_v12 = vadd.f32 %v1066_v2, %v1065_v58  ;;  %v1072_v49 = vsel %vm1044_vm1, %v3244_v43, 0.0 }
 0x143   : > { %5839 = vst [vmem:[#allocation7_spill] sm:$0xff] %v3241_v10  ;;  %v1069_v13 = vadd.f32 %v1068_v32, %v1067_v12  ;;  %v1070_v25 = vsel %vm1044_vm1, %v3241_v10, 0.0 }
 0x145   : > { %v782_v21 = vpop.f32.mrb[32].mxu0  ;;  %v3210_v24 = vpop.f32.mrb[32].mxu1  ;;  %v1071_v46 = vadd.f32 %v1070_v25, %v1069_v13 }
 0x146   : > { %v2710_v14 = vpop.f32.mrb[33].mxu0  ;;  %v2794_v31 = vpop.f32.mrb[33].mxu1  ;;  %v3258_v47 = vadd.f32 %v3153_v26, %v782_v21 }
 0x147   : > { %v785_v37 = vpop.f32.mrb[34].mxu0  ;;  %v3217_v38 = vpop.f32.mrb[34].mxu1  ;;  %v1073_v48 = vadd.f32 %v1072_v49, %v1071_v46 }
 0x148   : > { %v2711_v39 = vpop.f32.mrb[35].mxu0  ;;  %v2795_v40 = vpop.f32.mrb[35].mxu1  ;;  %5842 = vst [vmem:[#allocation10_spill] sm:$0xff] %v3258_v47  ;;  %v1076_v2 = vsel %vm1044_vm1, %v3258_v47, 0.0 }
 0x149   : > { %v3255_v40 = vadd.f32 %v3153_v26, %v777_v5 }
 0x14b   : > { %5841 = vst [vmem:[#allocation9_spill] sm:$0xff] %v3255_v40 }
 0x14d   : > { %v790_v52 = vpop.f32.mrb[36].mxu0  ;;  %v3229_v53 = vpop.f32.mrb[36].mxu1 }
 0x14e   : > { %v2714_v27 = vpop.f32.mrb[37].mxu0  ;;  %v2798_v56 = vpop.f32.mrb[37].mxu1  ;;  %v3272_v21 = vadd.f32 %v3153_v26, %v790_v52 }
 0x14f   : > { %v793_v61 = vpop.f32.mrb[38].mxu0  ;;  %v3234_v1 = vpop.f32.mrb[38].mxu1  ;;  %v1074_v27 = vsel %vm1044_vm1, %v3255_v40, 0.0 }
 0x150   : > { %v2715_v4 = vpop.f32.mrb[39].mxu0  ;;  %v2799_v6 = vpop.f32.mrb[39].mxu1  ;;  %v1075_v32 = vadd.f32 %v1074_v27, %v1073_v48  ;;  %5844 = vst [vmem:[#allocation12_spill] sm:$0xff] %v3272_v21 }
 0x151   : > { %v3267_v4 = vadd.f32 %v3153_v26, %v785_v37  ;;  %v3279_v37 = vadd.f32 %v3153_v26, %v793_v61 }
 0x153   : > { %5843 = vst [vmem:[#allocation11_spill] sm:$0xff] %v3267_v4  ;;  %v1078_v49 = vsel %vm1044_vm1, %v3267_v4, 0.0  ;;  %5845 = vst [vmem:[#allocation13_spill] sm:$0xff] %v3279_v37 }
 0x155   : > { %v798_v17 = vpop.f32.mrb[40].mxu0  ;;  %v3246_v20 = vpop.f32.mrb[40].mxu1 }
 0x156   : > { %v2718_v14 = vpop.f32.mrb[41].mxu0  ;;  %v2802_v31 = vpop.f32.mrb[41].mxu1  ;;  %v3284_v27 = vadd.f32 %v3153_v26, %v798_v17 }
 0x157   : > { %v801_v36 = vpop.f32.mrb[42].mxu0  ;;  %v3250_v39 = vpop.f32.mrb[42].mxu1  ;;  %v1077_v31 = vadd.f32 %v1076_v2, %v1075_v32 }
 0x158   : > { %v2719_v62 = vpop.f32.mrb[43].mxu0  ;;  %v2803_v42 = vpop.f32.mrb[43].mxu1  ;;  %5846 = vst [vmem:[#allocation14_spill] sm:$0xff] %v3284_v27  ;;  %v1084_v61 = vsel %vm1044_vm1, %v3284_v27, 0.0 }
 0x159   : > { %v1080_v62 = vsel %vm1044_vm1, %v3272_v21, 0.0  ;;  %v1079_v42 = vadd.f32 %v1078_v49, %v1077_v31  ;;  %v3293_v31 = vadd.f32 %v3153_v26, %v801_v36 }
 0x15b   : > { %5847 = vst [vmem:[#allocation15_spill] sm:$0xff] %v3293_v31 }
 0x15d   : > { %v806_v56 = vpop.f32.mrb[44].mxu0  ;;  %v3262_v58 = vpop.f32.mrb[44].mxu1 }
 0x15e   : > { %v2722_v5 = vpop.f32.mrb[45].mxu0  ;;  %v2806_v6 = vpop.f32.mrb[45].mxu1  ;;  %v3296_v17 = vadd.f32 %v3153_v26, %v806_v56 }
 0x15f   : > { %v809_v12 = vpop.f32.mrb[46].mxu0  ;;  %v3269_v13 = vpop.f32.mrb[46].mxu1  ;;  %v1081_v6 = vadd.f32 %v1080_v62, %v1079_v42 }
 0x160   : > { %v2723_v25 = vpop.f32.mrb[47].mxu0  ;;  %v2807_v14 = vpop.f32.mrb[47].mxu1  ;;  %5848 = vst [vmem:[#allocation16_spill] sm:$0xff] %v3296_v17  ;;  %v1088_v36 = vsel %vm1044_vm1, %v3296_v17, 0.0 }
 0x161   : > { %v1082_v25 = vsel %vm1044_vm1, %v3279_v37, 0.0 }
 0x162   : > { %v1083_v49 = vadd.f32 %v1082_v25, %v1081_v6  ;;  %v3307_v6 = vadd.f32 %v3153_v26, %v809_v12 }
 0x164   : > { %5849 = vst [vmem:[#allocation17_spill] sm:$0xff] %v3307_v6 }
 0x165   : > { %v814_v46 = vpop.f32.mrb[48].mxu0  ;;  %v3281_v48 = vpop.f32.mrb[48].mxu1 }
 0x166   : > { %v2726_v52 = vpop.f32.mrb[49].mxu0  ;;  %v2810_v5 = vpop.f32.mrb[49].mxu1 }
 0x167   : > { %v817_v2 = vpop.f32.mrb[50].mxu0  ;;  %v3286_v32 = vpop.f32.mrb[50].mxu1  ;;  %v1085_v52 = vadd.f32 %v1084_v61, %v1083_v49  ;;  %v1086_v5 = vsel %vm1044_vm1, %v3293_v31, 0.0  ;;  %v3310_v49 = vadd.f32 %v3153_v26, %v814_v46 }
 0x168   : > { %v2727_v14 = vpop.f32.mrb[51].mxu0  ;;  %v2811_v21 = vpop.f32.mrb[51].mxu1  ;;  %v3319_v17 = vadd.f32 %v3153_v26, %v817_v2 }
 0x169   : > { %v1087_v61 = vadd.f32 %v1086_v5, %v1085_v52  ;;  %5850 = vst [vmem:[#allocation18_spill] sm:$0xff] %v3310_v49  ;;  %v1092_v47 = vsel %vm1044_vm1, %v3310_v49, 0.0 }
 0x16a   : > { %5851 = vst [vmem:[#allocation19_spill] sm:$0xff] %v3319_v17  ;;  %v1094_v40 = vsel %vm1044_vm1, %v3319_v17, 0.0 }
 0x16b   : > { %v1089_v27 = vadd.f32 %v1088_v36, %v1087_v61 }
 0x16d   : > { %v822_v62 = vpop.f32.mrb[52].mxu0  ;;  %v3298_v42 = vpop.f32.mrb[52].mxu1 }
 0x16e   : > { %v2730_v37 = vpop.f32.mrb[53].mxu0  ;;  %v2814_v14 = vpop.f32.mrb[53].mxu1  ;;  %v3324_v46 = vadd.f32 %v3153_v26, %v822_v62 }
 0x16f   : > { %v825_v21 = vpop.f32.mrb[54].mxu0  ;;  %v3302_v4 = vpop.f32.mrb[54].mxu1  ;;  %v1090_v37 = vsel %vm1044_vm1, %v3307_v6, 0.0 }
 0x170   : > { %v2731_v56 = vpop.f32.mrb[55].mxu0  ;;  %v2815_v25 = vpop.f32.mrb[55].mxu1  ;;  %5852 = vst [vmem:[#allocation20_spill] sm:$0xff] %v3324_v46  ;;  %v1096_v49 = vsel %vm1044_vm1, %v3324_v46, 0.0  ;;  %v3331_v2 = vadd.f32 %v3153_v26, %v825_v21 }
 0x171   : > { %v1091_v25 = vadd.f32 %v1090_v37, %v1089_v27 }
 0x172   : > { %5853 = vst [vmem:[#allocation21_spill] sm:$0xff] %v3331_v2  ;;  %v1098_v17 = vsel %vm1044_vm1, %v3331_v2, 0.0 }
 0x173   : > { %v1093_v6 = vadd.f32 %v1092_v47, %v1091_v25 }
 0x175   : > { %v830_v14 = vpop.f32.mrb[56].mxu0  ;;  %v3314_v31 = vpop.f32.mrb[56].mxu1 }
 0x176   : > { %v2734_v12 = vpop.f32.mrb[57].mxu0  ;;  %v2818_v56 = vpop.f32.mrb[57].mxu1 }
 0x177   : > { %v833_v52 = vpop.f32.mrb[58].mxu0  ;;  %v3321_v5 = vpop.f32.mrb[58].mxu1  ;;  %v1095_v12 = vadd.f32 %v1094_v40, %v1093_v6  ;;  %v3336_v56 = vadd.f32 %v3153_v26, %v830_v14 }
 0x178   : > { %v2735_v36 = vpop.f32.mrb[59].mxu0  ;;  %v2819_v61 = vpop.f32.mrb[59].mxu1  ;;  %v3345_v21 = vadd.f32 %v3153_v26, %v833_v52 }
 0x179   : > { %5854 = vst [vmem:[#allocation22_spill] sm:$0xff] %v3336_v56  ;;  %v1097_v61 = vadd.f32 %v1096_v49, %v1095_v12  ;;  %v1100_v40 = vsel %vm1044_vm1, %v3336_v56, 0.0 }
 0x17a   : > { %5855 = vst [vmem:[#allocation23_spill] sm:$0xff] %v3345_v21 }
 0x17b   : > { %v1099_v6 = vadd.f32 %v1098_v17, %v1097_v61 }
 0x17d   : > { %v838_v27 = vpop.f32.mrb[60].mxu0  ;;  %v3333_v37 = vpop.f32.mrb[60].mxu1 }
 0x17e   : > { %v2738_v62 = vpop.f32.mrb[61].mxu0  ;;  %v2822_v36 = vpop.f32.mrb[61].mxu1  ;;  %v3348_v14 = vadd.f32 %v3153_v26, %v838_v27 }
 0x17f   : > { %v841_v47 = vpop.f32.mrb[62].mxu0  ;;  %v3338_v25 = vpop.f32.mrb[62].mxu1  ;;  %v1101_v62 = vadd.f32 %v1100_v40, %v1099_v6  ;;  %v1102_v36 = vsel %vm1044_vm1, %v3345_v21, 0.0 }
 0x180   : > { %v2739_v46 = vpop.f32.mrb[63].mxu0  ;;  %v2823_v43 = vpop.f32.mrb[63].mxu1  ;;  %5856 = vst [vmem:[#allocation24_spill] sm:$0xff] %v3348_v14  ;;  %v1104_v52 = vsel %vm1044_vm1, %v3348_v14, 0.0  ;;  %v3359_v17 = vadd.f32 %v3153_v26, %v841_v47 }
 0x181   : > { %v1103_v40 = vadd.f32 %v1102_v36, %v1101_v62 }
 0x182   : > { %5857 = vst [vmem:[#allocation25_spill] sm:$0xff] %v3359_v17 }
 0x183   : > { %v1105_v56 = vadd.f32 %v1104_v52, %v1103_v40 }
 0x185   : > { %v846_v49 = vpop.f32.mrb[64].mxu0  ;;  %v3350_v12 = vpop.f32.mrb[64].mxu1 }
 0x186   : > { %v2742_v2 = vpop.f32.mrb[65].mxu0  ;;  %v2826_v46 = vpop.f32.mrb[65].mxu1  ;;  %v3362_v6 = vadd.f32 %v3153_v26, %v846_v49 }
 0x187   : > { %v849_v43 = vpop.f32.mrb[66].mxu0  ;;  %v3354_v10 = vpop.f32.mrb[66].mxu1  ;;  %v1106_v2 = vsel %vm1044_vm1, %v3359_v17, 0.0 }
 0x188   : > { %v2743_v27 = vpop.f32.mrb[67].mxu0  ;;  %v2827_v61 = vpop.f32.mrb[67].mxu1  ;;  %5858 = vst [vmem:[#allocation26_spill] sm:$0xff] %v3362_v6  ;;  %v1108_v54 = vsel %vm1044_vm1, %v3362_v6, 0.0  ;;  %v3371_v14 = vadd.f32 %v3153_v26, %v849_v43 }
 0x189   : > { %v1107_v61 = vadd.f32 %v1106_v2, %v1105_v56 }
 0x18a   : > { %5859 = vst [vmem:[#allocation27_spill] sm:$0xff] %v3371_v14  ;;  %v1110_v22 = vsel %vm1044_vm1, %v3371_v14, 0.0 }
 0x18b   : > { %v1109_v17 = vadd.f32 %v1108_v54, %v1107_v61 }
 0x18d   : > { %v854_v46 = vpop.f32.mrb[68].mxu0  ;;  %v3366_v21 = vpop.f32.mrb[68].mxu1 }
 0x18e   : > { %v2746_v47 = vpop.f32.mrb[69].mxu0  ;;  %v2830_v27 = vpop.f32.mrb[69].mxu1  ;;  %v3376_v49 = vadd.f32 %v3153_v26, %v854_v46 }
 0x18f   : > { %v857_v62 = vpop.f32.mrb[70].mxu0  ;;  %v3373_v36 = vpop.f32.mrb[70].mxu1  ;;  %v1111_v47 = vadd.f32 %v1110_v22, %v1109_v17 }
 0x190   : > { %5860 = vst [vmem:[#allocation28_spill] sm:$0xff] %v3376_v49  ;;  %v2747_v52 = vpop.f32.mrb[71].mxu0  ;;  %v2831_v40 = vpop.f32.mrb[71].mxu1  ;;  %v1112_v6 = vsel %vm1044_vm1, %v3376_v49, 0.0  ;;  %v3383_v43 = vadd.f32 %v3153_v26, %v857_v62 }
 0x191   : > { %v1113_v40 = vadd.f32 %v1112_v6, %v1111_v47 }
 0x192   : > { %5861 = vst [vmem:[#allocation29_spill] sm:$0xff] %v3383_v43  ;;  %v1114_v14 = vsel %vm1044_vm1, %v3383_v43, 0.0 }
 0x193   : > { %v1115_v62 = vadd.f32 %v1114_v14, %v1113_v40 }
 0x195   : > { %v862_v56 = vpop.f32.mrb[72].mxu0  ;;  %v3385_v2 = vpop.f32.mrb[72].mxu1 }
 0x196   : > { %v3388_v27 = vadd.f32 %v3153_v26, %v862_v56  ;;  %v2750_v46 = vpop.f32.mrb[73].mxu0  ;;  %v2834_v52 = vpop.f32.mrb[73].mxu1 }
 0x197   : > { %v865_v54 = vpop.f32.mrb[74].mxu0  ;;  %v3390_v61 = vpop.f32.mrb[74].mxu1 }
 0x198   : > { %5862 = vst [vmem:[#allocation30_spill] sm:$0xff] %v3388_v27  ;;  %v2751_v49 = vpop.f32.mrb[75].mxu0  ;;  %v2835_v18 = vpop.f32.mrb[75].mxu1  ;;  %v1116_v22 = vsel %vm1044_vm1, %v3388_v27, 0.0  ;;  %v3397_v17 = vadd.f32 %v3153_v26, %v865_v54 }
 0x199   : > { %v1117_v56 = vadd.f32 %v1116_v22, %v1115_v62 }
 0x19a   : > { %5863 = vst [vmem:[#allocation31_spill] sm:$0xff] %v3397_v17  ;;  %v1118_v6 = vsel %vm1044_vm1, %v3397_v17, 0.0 }
 0x19b   : > { %v1119_v22 = vadd.f32 %v1118_v6, %v1117_v56 }
 0x19d   : > { %v870_v30 = vpop.f32.mrb[76].mxu0  ;;  %v3399_v46 = vpop.f32.mrb[76].mxu1 }
 0x19e   : > { %v3404_v47 = vadd.f32 %v3153_v26, %v870_v30  ;;  %v2754_v52 = vpop.f32.mrb[77].mxu0  ;;  %v2838_v49 = vpop.f32.mrb[77].mxu1 }
 0x19f   : > { %v873_v18 = vpop.f32.mrb[78].mxu0  ;;  %v1041_v43 = vpop.f32.mrb[78].mxu1 }
 0x1a0   : > { %5864 = vst [vmem:[#allocation32_spill] sm:$0xff] %v3404_v47  ;;  %v1120_v27 = vsel %vm1044_vm1, %v3404_v47, 0.0  ;;  %v3409_v54 = vadd.f32 %v3153_v26, %v873_v18  ;;  %v2755_v14 = vpop.f32.mrb[79].mxu0  ;;  %v2839_v40 = vpop.f32.mrb[79].mxu1  ;;  %v3418_v47 = vadd.f32 %v3153_v26, %v3129_v51 }
 0x1a1   : > { %v1121_v62 = vadd.f32 %v1120_v27, %v1119_v22  ;;  %v3427_v14 = vadd.f32 %v3153_v26, %v3131_v55  ;;  %v3435_v40 = vadd.f32 %v3153_v26, %v3133_v59 }
 0x1a2   : > { %v1122_v17 = vsel %vm1044_vm1, %v3409_v54, 0.0  ;;  %v1128_v51 = vsel %vm1044_vm1, %v3418_v47, 0.0 }
 0x1a3   : > { %v1123_v49 = vadd.f32 %v1122_v17, %v1121_v62  ;;  %v1130_v62 = vsel %vm1044_vm1, %v3427_v14, 0.0 }
 0x1a5   : > { %v878_v16 = vpop.f32.mrb[80].mxu0 }
 0x1a6   : > { %v3414_v30 = vadd.f32 %v3153_v26, %v878_v16  ;;  %v2758_v52 = vpop.f32.mrb[81].mxu0 }
 0x1a7   : > { %v881_v43 = vpop.f32.mrb[82].mxu0  ;;  %v3441_v52 = vadd.f32 %v3153_v26, %v3135_v63 }
 0x1a8   : > { %v1124_v18 = vsel %vm1044_vm1, %v3414_v30, 0.0  ;;  %v3423_v56 = vadd.f32 %v3153_v26, %v881_v43  ;;  %v2759_v27 = vpop.f32.mrb[83].mxu0  ;;  %v3447_v43 = vadd.f32 %v3153_v26, %v3137_v3 }
 0x1a9   : > { %v1125_v6 = vadd.f32 %v1124_v18, %v1123_v49  ;;  %v1132_v49 = vsel %vm1044_vm1, %v3435_v40, 0.0  ;;  %v1134_v59 = vsel %vm1044_vm1, %v3441_v52, 0.0  ;;  %v3453_v27 = vadd.f32 %v3153_v26, %v3139_v7 }
 0x1aa   : > { %v1126_v16 = vsel %vm1044_vm1, %v3423_v56, 0.0  ;;  %v1136_v63 = vsel %vm1044_vm1, %v3447_v43, 0.0 }
 0x1ab   : > { %v1127_v17 = vadd.f32 %v1126_v16, %v1125_v6  ;;  %v3459_v16 = vadd.f32 %v3153_v26, %v3141_v11  ;;  %v1138_v3 = vsel %vm1044_vm1, %v3453_v27, 0.0 }
 0x1ad   : > { %v1129_v22 = vadd.f32 %v1128_v51, %v1127_v17  ;;  %v3465_v51 = vadd.f32 %v3153_v26, %v3143_v15  ;;  %v1140_v7 = vsel %vm1044_vm1, %v3459_v16, 0.0 }
 0x1af   : > { %v1131_v55 = vadd.f32 %v1130_v62, %v1129_v22  ;;  %v3471_v62 = vadd.f32 %v3153_v26, %v3145_v19  ;;  %v1142_v11 = vsel %vm1044_vm1, %v3465_v51, 0.0 }
 0x1b1   : > { %v1133_v18 = vadd.f32 %v1132_v49, %v1131_v55  ;;  %v3477_v49 = vadd.f32 %v3153_v26, %v3147_v23  ;;  %v1144_v15 = vsel %vm1044_vm1, %v3471_v62, 0.0 }
 0x1b3   : > { %v1135_v6 = vadd.f32 %v1134_v59, %v1133_v18  ;;  %v3483_v59 = vadd.f32 %v3153_v26, %v3155_v28  ;;  %v1146_v19 = vsel %vm1044_vm1, %v3477_v49, 0.0 }
 0x1b5   : > { %v1137_v17 = vadd.f32 %v1136_v63, %v1135_v6  ;;  %v3489_v63 = vadd.f32 %v3153_v26, %v3160_v33  ;;  %v1148_v23 = vsel %vm1044_vm1, %v3483_v59, 0.0 }
 0x1b7   : > { %v1139_v22 = vadd.f32 %v1138_v3, %v1137_v17  ;;  %v3495_v3 = vadd.f32 %v3153_v26, %v3177_v44  ;;  %v1150_v28 = vsel %vm1044_vm1, %v3489_v63, 0.0 }
 0x1b9   : > { %v1141_v55 = vadd.f32 %v1140_v7, %v1139_v22  ;;  %v3501_v7 = vadd.f32 %v3153_v26, %v3182_v50  ;;  %v1152_v33 = vsel %vm1044_vm1, %v3495_v3, 0.0 }
 0x1bb   : > { %v1143_v18 = vadd.f32 %v1142_v11, %v1141_v55  ;;  %v3507_v11 = vadd.f32 %v3153_v26, %v3194_v0  ;;  %v1154_v44 = vsel %vm1044_vm1, %v3501_v7, 0.0 }
 0x1bd   : > { %v1145_v6 = vadd.f32 %v1144_v15, %v1143_v18  ;;  %v3513_v15 = vadd.f32 %v3153_v26, %v3198_v8  ;;  %v1156_v50 = vsel %vm1044_vm1, %v3507_v11, 0.0 }
 0x1bf   : > { %v1147_v17 = vadd.f32 %v1146_v19, %v1145_v6  ;;  %v3519_v19 = vadd.f32 %v3153_v26, %v3210_v24  ;;  %v1158_v0 = vsel %vm1044_vm1, %v3513_v15, 0.0 }
 0x1c1   : > { %v1149_v22 = vadd.f32 %v1148_v23, %v1147_v17  ;;  %v3525_v23 = vadd.f32 %v3153_v26, %v3217_v38  ;;  %v1160_v8 = vsel %vm1044_vm1, %v3519_v19, 0.0 }
 0x1c3   : > { %v1151_v55 = vadd.f32 %v1150_v28, %v1149_v22  ;;  %v3531_v28 = vadd.f32 %v3153_v26, %v3229_v53  ;;  %v1162_v24 = vsel %vm1044_vm1, %v3525_v23, 0.0 }
 0x1c5   : > { %v1153_v18 = vadd.f32 %v1152_v33, %v1151_v55  ;;  %v3537_v33 = vadd.f32 %v3153_v26, %v3234_v1  ;;  %v1164_v38 = vsel %vm1044_vm1, %v3531_v28, 0.0 }
 0x1c7   : > { %v1155_v6 = vadd.f32 %v1154_v44, %v1153_v18  ;;  %v3543_v44 = vadd.f32 %v3153_v26, %v3246_v20  ;;  %v1166_v53 = vsel %vm1044_vm1, %v3537_v33, 0.0 }
 0x1c9   : > { %v1157_v17 = vadd.f32 %v1156_v50, %v1155_v6  ;;  %v3549_v50 = vadd.f32 %v3153_v26, %v3250_v39  ;;  %v1168_v1 = vsel %vm1044_vm1, %v3543_v44, 0.0 }
 0x1cb   : > { %v1159_v22 = vadd.f32 %v1158_v0, %v1157_v17  ;;  %v3555_v0 = vadd.f32 %v3153_v26, %v3262_v58  ;;  %v1170_v20 = vsel %vm1044_vm1, %v3549_v50, 0.0 }
 0x1cd   : > { %v1161_v55 = vadd.f32 %v1160_v8, %v1159_v22  ;;  %v3561_v8 = vadd.f32 %v3153_v26, %v3269_v13  ;;  %v1172_v39 = vsel %vm1044_vm1, %v3555_v0, 0.0 }
 0x1cf   : > { %v1163_v18 = vadd.f32 %v1162_v24, %v1161_v55  ;;  %v3567_v24 = vadd.f32 %v3153_v26, %v3281_v48  ;;  %v1174_v58 = vsel %vm1044_vm1, %v3561_v8, 0.0 }
 0x1d1   : > { %v1165_v6 = vadd.f32 %v1164_v38, %v1163_v18  ;;  %v3573_v38 = vadd.f32 %v3153_v26, %v3286_v32  ;;  %v1176_v13 = vsel %vm1044_vm1, %v3567_v24, 0.0 }
 0x1d3   : > { %v1167_v17 = vadd.f32 %v1166_v53, %v1165_v6  ;;  %v3579_v53 = vadd.f32 %v3153_v26, %v3298_v42  ;;  %v1178_v48 = vsel %vm1044_vm1, %v3573_v38, 0.0 }
 0x1d5   : > { %v1169_v22 = vadd.f32 %v1168_v1, %v1167_v17  ;;  %v3585_v1 = vadd.f32 %v3153_v26, %v3302_v4  ;;  %v1180_v32 = vsel %vm1044_vm1, %v3579_v53, 0.0 }
 0x1d7   : > { %v1171_v55 = vadd.f32 %v1170_v20, %v1169_v22  ;;  %v3591_v20 = vadd.f32 %v3153_v26, %v3314_v31  ;;  %v1182_v42 = vsel %vm1044_vm1, %v3585_v1, 0.0 }
 0x1d9   : > { %v1173_v18 = vadd.f32 %v1172_v39, %v1171_v55  ;;  %v3597_v39 = vadd.f32 %v3153_v26, %v3321_v5  ;;  %v1184_v4 = vsel %vm1044_vm1, %v3591_v20, 0.0  ;;  %v3611_v5 = vadd.f32 %v3153_v26, %v3338_v25 }
 0x1db   : > { %v1175_v6 = vadd.f32 %v1174_v58, %v1173_v18  ;;  %v3603_v58 = vadd.f32 %v3153_v26, %v3333_v37  ;;  %v1186_v31 = vsel %vm1044_vm1, %v3597_v39, 0.0  ;;  %v3617_v37 = vadd.f32 %v3153_v26, %v3350_v12 }
 0x1dd   : > { %v1177_v17 = vadd.f32 %v1176_v13, %v1175_v6 }
 0x1df   : > { %v1179_v22 = vadd.f32 %v1178_v48, %v1177_v17  ;;  %v1188_v17 = vsel %vm1044_vm1, %v3603_v58, 0.0 }
 0x1e1   : > { %v1181_v55 = vadd.f32 %v1180_v32, %v1179_v22  ;;  %v1190_v22 = vsel %vm1044_vm1, %v3611_v5, 0.0 }
 0x1e3   : > { %v1183_v18 = vadd.f32 %v1182_v42, %v1181_v55  ;;  %v1192_v55 = vsel %vm1044_vm1, %v3617_v37, 0.0  ;;  %v3623_v42 = vadd.f32 %v3153_v26, %v3354_v10 }
 0x1e5   : > { %v1185_v6 = vadd.f32 %v1184_v4, %v1183_v18  ;;  %v1194_v25 = vsel %vm1044_vm1, %v3623_v42, 0.0  ;;  %v3629_v4 = vadd.f32 %v3153_v26, %v3366_v21 }
 0x1e7   : > { %v1187_v13 = vadd.f32 %v1186_v31, %v1185_v6  ;;  %v1196_v12 = vsel %vm1044_vm1, %v3629_v4, 0.0  ;;  %v3635_v31 = vadd.f32 %v3153_v26, %v3373_v36  ;;  %v3651_v36 = vadd.f32 %v3153_v26, %v3399_v46 }
 0x1e9   : > { %v1189_v48 = vadd.f32 %v1188_v17, %v1187_v13  ;;  %5865 = vst [vmem:[#allocation33_spill] sm:$0xff] %v3635_v31  ;;  %v1198_v10 = vsel %vm1044_vm1, %v3635_v31, 0.0  ;;  %v3641_v17 = vadd.f32 %v3153_v26, %v3385_v2  ;;  %v1204_v2 = vsel %vm1044_vm1, %v3651_v36, 0.0 }
 0x1eb   : > { %v1191_v32 = vadd.f32 %v1190_v22, %v1189_v48  ;;  %5866 = vst [vmem:[#allocation34_spill] sm:$0xff] %v3641_v17  ;;  %v1200_v21 = vsel %vm1044_vm1, %v3641_v17, 0.0  ;;  %v3647_v22 = vadd.f32 %v3153_v26, %v3390_v61 }
 0x1ed   : > { %v1193_v18 = vadd.f32 %v1192_v55, %v1191_v32  ;;  %v1202_v55 = vsel %vm1044_vm1, %v3647_v22, 0.0 }
 0x1ef   : > { %v1195_v6 = vadd.f32 %v1194_v25, %v1193_v18 }
 0x1f1   : > { %v1197_v13 = vadd.f32 %v1196_v12, %v1195_v6 }
 0x1f3   : > { %v1199_v48 = vadd.f32 %v1198_v10, %v1197_v13 }
 0x1f5   : > { %v1201_v32 = vadd.f32 %v1200_v21, %v1199_v48 }
 0x1f7   : > { %v1203_v18 = vadd.f32 %v1202_v55, %v1201_v32 }
 0x1f9   : > { %v1205_v25 = vadd.f32 %v1204_v2, %v1203_v18 }
 0x1fb   : > { %v1206_v6 = vrot.slane %v1205_v25, 4 }
 0x1fd   : > { %v1207_v12 = vadd.f32 %v1206_v6, %v1205_v25 }
 0x1ff   : > { %v1208_v13 = vrot.slane %v1207_v12, 2 }
 0x201   : > { %v1209_v10 = vadd.f32 %v1208_v13, %v1207_v12 }
 0x203   : > { %v1210_v17 = vrot.slane %v1209_v10, 1 }
 0x205   : > { %v1211_v61 = vadd.f32 %v1210_v17, %v1209_v10 }
 0x207   : > { %v3657_v31 = vmul.f32 0.0015432099, %v1211_v61 }
 0x209   : > { %v3661_v26 = vsub.f32 %v3163_v34, %v3657_v31  ;;  %v3665_v46 = vsub.f32 %v3158_v29, %v3657_v31  ;;  %v3669_v48 = vsub.f32 %v3166_v35, %v3657_v31  ;;  %v3673_v21 = vsub.f32 %v3175_v41, %v3657_v31 }
 0x20a   : > { %v3681_v34 = vsub.f32 %v3180_v45, %v3657_v31  ;;  %v3687_v35 = vsub.f32 %v3189_v57, %v3657_v31  ;;  %v3695_v25 = vsub.f32 %v3192_v60, %v3657_v31  ;;  %v3702_v57 = vsub.f32 %v3203_v9, %v3657_v31 }
 0x20b   : > { %v1295_v17 = vmul.f32 %v3661_v26, %v3661_v26  ;;  %v1296_v32 = vmul.f32 %v3665_v46, %v3665_v46  ;;  %v1297_v29 = vmul.f32 %v3669_v48, %v3669_v48  ;;  %v1298_v41 = vmul.f32 %v3673_v21, %v3673_v21 }
 0x20c   : > { %v1299_v45 = vmul.f32 %v3681_v34, %v3681_v34  ;;  %5867 = vst [vmem:[#allocation35_spill] sm:$0xff] %v3702_v57  ;;  %v1300_v13 = vmul.f32 %v3687_v35, %v3687_v35 }
 0x20d   : > { %v1376_v55 = vsel %vm1044_vm1, %v1295_v17, 0.0  ;;  %v1377_v18 = vsel %vm1044_vm1, %v1296_v32, 0.0  ;;  %v1379_v6 = vsel %vm1044_vm1, %v1297_v29, 0.0  ;;  %v1381_v10 = vsel %vm1044_vm1, %v1298_v41, 0.0  ;;  %v5868_v17 = vld [vmem:[#allocation2_spill] sm:$0xff] }
 0x20e   : > { %v1378_v2 = vadd.f32 %v1377_v18, %v1376_v55  ;;  %v3709_v60 = vsub.f32 %v5868_v17, %v3657_v31  ;;  %v1301_v32 = vmul.f32 %v3695_v25, %v3695_v25  ;;  %v1383_v29 = vsel %vm1044_vm1, %v1299_v45, 0.0  ;;  %v5870_v18 = vld [vmem:[#allocation3_spill] sm:$0xff] }
 0x20f   : > { %v3716_v9 = vsub.f32 %v5870_v18, %v3657_v31  ;;  %v1385_v41 = vsel %vm1044_vm1, %v1300_v13, 0.0 }
 0x210   : > { %v1380_v12 = vadd.f32 %v1379_v6, %v1378_v2  ;;  %5869 = vst [vmem:[#allocation2_spill] sm:$0xff] %v3709_v60  ;;  %v1302_v2 = vmul.f32 %v3702_v57, %v3702_v57  ;;  %v1303_v17 = vmul.f32 %v3709_v60, %v3709_v60  ;;  %v1387_v45 = vsel %vm1044_vm1, %v1301_v32, 0.0 }
 0x211   : > { %5871 = vst [vmem:[#allocation3_spill] sm:$0xff] %v3716_v9  ;;  %v1304_v57 = vmul.f32 %v3716_v9, %v3716_v9 }
 0x212   : > { %v1382_v61 = vadd.f32 %v1381_v10, %v1380_v12  ;;  %v5872_v12 = vld [vmem:[#allocation4_spill] sm:$0xff]  ;;  %v1389_v13 = vsel %vm1044_vm1, %v1302_v2, 0.0  ;;  %v1391_v32 = vsel %vm1044_vm1, %v1303_v17, 0.0 }
 0x213   : > { %v3723_v10 = vsub.f32 %v5872_v12, %v3657_v31  ;;  %v1393_v2 = vsel %vm1044_vm1, %v1304_v57, 0.0 }
 0x214   : > { %v1384_v55 = vadd.f32 %v1383_v29, %v1382_v61  ;;  %v5874_v29 = vld [vmem:[#allocation5_spill] sm:$0xff] }
 0x215   : > { %5873 = vst [vmem:[#allocation4_spill] sm:$0xff] %v3723_v10  ;;  %v3730_v18 = vsub.f32 %v5874_v29, %v3657_v31  ;;  %v1305_v60 = vmul.f32 %v3723_v10, %v3723_v10 }
 0x216   : > { %v1386_v6 = vadd.f32 %v1385_v41, %v1384_v55  ;;  %v5876_v41 = vld [vmem:[#allocation6_spill] sm:$0xff] }
 0x217   : > { %5875 = vst [vmem:[#allocation5_spill] sm:$0xff] %v3730_v18  ;;  %v3737_v12 = vsub.f32 %v5876_v41, %v3657_v31  ;;  %v1306_v9 = vmul.f32 %v3730_v18, %v3730_v18  ;;  %v1395_v17 = vsel %vm1044_vm1, %v1305_v60, 0.0 }
 0x218   : > { %v1388_v61 = vadd.f32 %v1387_v45, %v1386_v6  ;;  %v5878_v45 = vld [vmem:[#allocation7_spill] sm:$0xff] }
 0x219   : > { %5877 = vst [vmem:[#allocation6_spill] sm:$0xff] %v3737_v12  ;;  %v3744_v29 = vsub.f32 %v5878_v45, %v3657_v31  ;;  %v1307_v10 = vmul.f32 %v3737_v12, %v3737_v12  ;;  %v1397_v57 = vsel %vm1044_vm1, %v1306_v9, 0.0 }
 0x21a   : > { %v1390_v55 = vadd.f32 %v1389_v13, %v1388_v61  ;;  %v5880_v13 = vld [vmem:[#allocation8_spill] sm:$0xff] }
 0x21b   : > { %5879 = vst [vmem:[#allocation7_spill] sm:$0xff] %v3744_v29  ;;  %v3751_v41 = vsub.f32 %v5880_v13, %v3657_v31  ;;  %v1308_v18 = vmul.f32 %v3744_v29, %v3744_v29  ;;  %v1399_v60 = vsel %vm1044_vm1, %v1307_v10, 0.0 }
 0x21c   : > { %v1392_v6 = vadd.f32 %v1391_v32, %v1390_v55  ;;  %v5882_v32 = vld [vmem:[#allocation9_spill] sm:$0xff] }
 0x21d   : > { %5881 = vst [vmem:[#allocation8_spill] sm:$0xff] %v3751_v41  ;;  %v3758_v45 = vsub.f32 %v5882_v32, %v3657_v31  ;;  %v1309_v12 = vmul.f32 %v3751_v41, %v3751_v41  ;;  %v1401_v9 = vsel %vm1044_vm1, %v1308_v18, 0.0 }
 0x21e   : > { %v1394_v61 = vadd.f32 %v1393_v2, %v1392_v6  ;;  %v5884_v2 = vld [vmem:[#allocation10_spill] sm:$0xff] }
 0x21f   : > { %5883 = vst [vmem:[#allocation9_spill] sm:$0xff] %v3758_v45  ;;  %v3765_v13 = vsub.f32 %v5884_v2, %v3657_v31  ;;  %v1310_v29 = vmul.f32 %v3758_v45, %v3758_v45  ;;  %v1403_v10 = vsel %vm1044_vm1, %v1309_v12, 0.0 }
 0x220   : > { %v1396_v55 = vadd.f32 %v1395_v17, %v1394_v61  ;;  %v5886_v17 = vld [vmem:[#allocation11_spill] sm:$0xff] }
 0x221   : > { %5885 = vst [vmem:[#allocation10_spill] sm:$0xff] %v3765_v13  ;;  %v3772_v32 = vsub.f32 %v5886_v17, %v3657_v31  ;;  %v1311_v41 = vmul.f32 %v3765_v13, %v3765_v13  ;;  %v1405_v18 = vsel %vm1044_vm1, %v1310_v29, 0.0 }
 0x222   : > { %v1398_v6 = vadd.f32 %v1397_v57, %v1396_v55  ;;  %v5888_v57 = vld [vmem:[#allocation12_spill] sm:$0xff] }
 0x223   : > { %5887 = vst [vmem:[#allocation11_spill] sm:$0xff] %v3772_v32  ;;  %v3779_v2 = vsub.f32 %v5888_v57, %v3657_v31  ;;  %v1312_v45 = vmul.f32 %v3772_v32, %v3772_v32  ;;  %v1407_v12 = vsel %vm1044_vm1, %v1311_v41, 0.0 }
 0x224   : > { %v1400_v61 = vadd.f32 %v1399_v60, %v1398_v6  ;;  %v5890_v60 = vld [vmem:[#allocation13_spill] sm:$0xff] }
 0x225   : > { %5889 = vst [vmem:[#allocation12_spill] sm:$0xff] %v3779_v2  ;;  %v3786_v17 = vsub.f32 %v5890_v60, %v3657_v31  ;;  %v1313_v13 = vmul.f32 %v3779_v2, %v3779_v2  ;;  %v1409_v29 = vsel %vm1044_vm1, %v1312_v45, 0.0 }
 0x226   : > { %v1402_v55 = vadd.f32 %v1401_v9, %v1400_v61  ;;  %v5892_v9 = vld [vmem:[#allocation14_spill] sm:$0xff] }
 0x227   : > { %5891 = vst [vmem:[#allocation13_spill] sm:$0xff] %v3786_v17  ;;  %v3793_v57 = vsub.f32 %v5892_v9, %v3657_v31  ;;  %v1314_v32 = vmul.f32 %v3786_v17, %v3786_v17  ;;  %v1411_v41 = vsel %vm1044_vm1, %v1313_v13, 0.0 }
 0x228   : > { %v1404_v6 = vadd.f32 %v1403_v10, %v1402_v55  ;;  %v5894_v10 = vld [vmem:[#allocation15_spill] sm:$0xff] }
 0x229   : > { %5893 = vst [vmem:[#allocation14_spill] sm:$0xff] %v3793_v57  ;;  %v3800_v60 = vsub.f32 %v5894_v10, %v3657_v31  ;;  %v1315_v2 = vmul.f32 %v3793_v57, %v3793_v57  ;;  %v1413_v45 = vsel %vm1044_vm1, %v1314_v32, 0.0 }
 0x22a   : > { %v1406_v61 = vadd.f32 %v1405_v18, %v1404_v6  ;;  %v5896_v18 = vld [vmem:[#allocation16_spill] sm:$0xff] }
 0x22b   : > { %5895 = vst [vmem:[#allocation15_spill] sm:$0xff] %v3800_v60  ;;  %v3807_v9 = vsub.f32 %v5896_v18, %v3657_v31  ;;  %v1316_v17 = vmul.f32 %v3800_v60, %v3800_v60  ;;  %v1415_v13 = vsel %vm1044_vm1, %v1315_v2, 0.0 }
 0x22c   : > { %v1408_v55 = vadd.f32 %v1407_v12, %v1406_v61  ;;  %v5898_v12 = vld [vmem:[#allocation17_spill] sm:$0xff] }
 0x22d   : > { %5897 = vst [vmem:[#allocation16_spill] sm:$0xff] %v3807_v9  ;;  %v3814_v10 = vsub.f32 %v5898_v12, %v3657_v31  ;;  %v1317_v57 = vmul.f32 %v3807_v9, %v3807_v9  ;;  %v1417_v32 = vsel %vm1044_vm1, %v1316_v17, 0.0 }
 0x22e   : > { %v1410_v6 = vadd.f32 %v1409_v29, %v1408_v55  ;;  %v5900_v29 = vld [vmem:[#allocation18_spill] sm:$0xff] }
 0x22f   : > { %5899 = vst [vmem:[#allocation17_spill] sm:$0xff] %v3814_v10  ;;  %v3821_v18 = vsub.f32 %v5900_v29, %v3657_v31  ;;  %v1318_v60 = vmul.f32 %v3814_v10, %v3814_v10  ;;  %v1419_v2 = vsel %vm1044_vm1, %v1317_v57, 0.0 }
 0x230   : > { %v1412_v61 = vadd.f32 %v1411_v41, %v1410_v6  ;;  %v5902_v41 = vld [vmem:[#allocation19_spill] sm:$0xff] }
 0x231   : > { %5901 = vst [vmem:[#allocation18_spill] sm:$0xff] %v3821_v18  ;;  %v3828_v12 = vsub.f32 %v5902_v41, %v3657_v31  ;;  %v1319_v9 = vmul.f32 %v3821_v18, %v3821_v18  ;;  %v1421_v17 = vsel %vm1044_vm1, %v1318_v60, 0.0 }
 0x232   : > { %v1414_v55 = vadd.f32 %v1413_v45, %v1412_v61  ;;  %v5904_v45 = vld [vmem:[#allocation20_spill] sm:$0xff] }
 0x233   : > { %5903 = vst [vmem:[#allocation19_spill] sm:$0xff] %v3828_v12  ;;  %v3835_v29 = vsub.f32 %v5904_v45, %v3657_v31  ;;  %v1320_v10 = vmul.f32 %v3828_v12, %v3828_v12  ;;  %v1423_v57 = vsel %vm1044_vm1, %v1319_v9, 0.0 }
 0x234   : > { %v1416_v6 = vadd.f32 %v1415_v13, %v1414_v55  ;;  %v5906_v13 = vld [vmem:[#allocation21_spill] sm:$0xff] }
 0x235   : > { %5905 = vst [vmem:[#allocation20_spill] sm:$0xff] %v3835_v29  ;;  %v3842_v41 = vsub.f32 %v5906_v13, %v3657_v31  ;;  %v1321_v18 = vmul.f32 %v3835_v29, %v3835_v29  ;;  %v1425_v60 = vsel %vm1044_vm1, %v1320_v10, 0.0 }
 0x236   : > { %v1418_v61 = vadd.f32 %v1417_v32, %v1416_v6  ;;  %v5908_v32 = vld [vmem:[#allocation22_spill] sm:$0xff] }
 0x237   : > { %5907 = vst [vmem:[#allocation21_spill] sm:$0xff] %v3842_v41  ;;  %v3849_v45 = vsub.f32 %v5908_v32, %v3657_v31  ;;  %v1322_v12 = vmul.f32 %v3842_v41, %v3842_v41  ;;  %v1427_v9 = vsel %vm1044_vm1, %v1321_v18, 0.0 }
 0x238   : > { %v1420_v55 = vadd.f32 %v1419_v2, %v1418_v61  ;;  %v5910_v2 = vld [vmem:[#allocation23_spill] sm:$0xff] }
 0x239   : > { %5909 = vst [vmem:[#allocation22_spill] sm:$0xff] %v3849_v45  ;;  %v3856_v13 = vsub.f32 %v5910_v2, %v3657_v31  ;;  %v1323_v29 = vmul.f32 %v3849_v45, %v3849_v45  ;;  %v1429_v10 = vsel %vm1044_vm1, %v1322_v12, 0.0 }
 0x23a   : > { %v1422_v6 = vadd.f32 %v1421_v17, %v1420_v55  ;;  %v5912_v17 = vld [vmem:[#allocation24_spill] sm:$0xff] }
 0x23b   : > { %5911 = vst [vmem:[#allocation23_spill] sm:$0xff] %v3856_v13  ;;  %v3863_v32 = vsub.f32 %v5912_v17, %v3657_v31  ;;  %v1324_v41 = vmul.f32 %v3856_v13, %v3856_v13  ;;  %v1431_v18 = vsel %vm1044_vm1, %v1323_v29, 0.0 }
 0x23c   : > { %v1424_v61 = vadd.f32 %v1423_v57, %v1422_v6  ;;  %v5914_v57 = vld [vmem:[#allocation25_spill] sm:$0xff] }
 0x23d   : > { %5913 = vst [vmem:[#allocation24_spill] sm:$0xff] %v3863_v32  ;;  %v3870_v2 = vsub.f32 %v5914_v57, %v3657_v31  ;;  %v1325_v45 = vmul.f32 %v3863_v32, %v3863_v32  ;;  %v1433_v12 = vsel %vm1044_vm1, %v1324_v41, 0.0 }
 0x23e   : > { %v1426_v55 = vadd.f32 %v1425_v60, %v1424_v61  ;;  %v5916_v60 = vld [vmem:[#allocation26_spill] sm:$0xff] }
 0x23f   : > { %5915 = vst [vmem:[#allocation25_spill] sm:$0xff] %v3870_v2  ;;  %v3877_v17 = vsub.f32 %v5916_v60, %v3657_v31  ;;  %v1326_v13 = vmul.f32 %v3870_v2, %v3870_v2  ;;  %v1435_v29 = vsel %vm1044_vm1, %v1325_v45, 0.0 }
 0x240   : > { %v1428_v6 = vadd.f32 %v1427_v9, %v1426_v55  ;;  %v5918_v9 = vld [vmem:[#allocation27_spill] sm:$0xff] }
 0x241   : > { %5917 = vst [vmem:[#allocation26_spill] sm:$0xff] %v3877_v17  ;;  %v3884_v57 = vsub.f32 %v5918_v9, %v3657_v31  ;;  %v1327_v32 = vmul.f32 %v3877_v17, %v3877_v17  ;;  %v1437_v41 = vsel %vm1044_vm1, %v1326_v13, 0.0 }
 0x242   : > { %v1430_v61 = vadd.f32 %v1429_v10, %v1428_v6  ;;  %v5920_v10 = vld [vmem:[#allocation28_spill] sm:$0xff] }
 0x243   : > { %5919 = vst [vmem:[#allocation27_spill] sm:$0xff] %v3884_v57  ;;  %v3891_v60 = vsub.f32 %v5920_v10, %v3657_v31  ;;  %v1328_v2 = vmul.f32 %v3884_v57, %v3884_v57  ;;  %v1439_v45 = vsel %vm1044_vm1, %v1327_v32, 0.0 }
 0x244   : > { %v1432_v55 = vadd.f32 %v1431_v18, %v1430_v61  ;;  %v5922_v18 = vld [vmem:[#allocation29_spill] sm:$0xff] }
 0x245   : > { %5921 = vst [vmem:[#allocation28_spill] sm:$0xff] %v3891_v60  ;;  %v3898_v9 = vsub.f32 %v5922_v18, %v3657_v31  ;;  %v1329_v17 = vmul.f32 %v3891_v60, %v3891_v60  ;;  %v1441_v13 = vsel %vm1044_vm1, %v1328_v2, 0.0 }
 0x246   : > { %v1434_v6 = vadd.f32 %v1433_v12, %v1432_v55  ;;  %v5923_v12 = vld [vmem:[#allocation30_spill] sm:$0xff] }
 0x247   : > { %v3905_v10 = vsub.f32 %v5923_v12, %v3657_v31  ;;  %v1330_v57 = vmul.f32 %v3898_v9, %v3898_v9  ;;  %v1443_v32 = vsel %vm1044_vm1, %v1329_v17, 0.0 }
 0x248   : > { %v1436_v61 = vadd.f32 %v1435_v29, %v1434_v6  ;;  %v5924_v29 = vld [vmem:[#allocation31_spill] sm:$0xff] }
 0x249   : > { %v3912_v18 = vsub.f32 %v5924_v29, %v3657_v31  ;;  %v1331_v60 = vmul.f32 %v3905_v10, %v3905_v10  ;;  %v1445_v2 = vsel %vm1044_vm1, %v1330_v57, 0.0 }
 0x24a   : > { %v1438_v55 = vadd.f32 %v1437_v41, %v1436_v61  ;;  %v5925_v41 = vld [vmem:[#allocation32_spill] sm:$0xff] }
 0x24b   : > { %v3919_v12 = vsub.f32 %v5925_v41, %v3657_v31  ;;  %v1332_v29 = vmul.f32 %v3912_v18, %v3912_v18  ;;  %v1447_v17 = vsel %vm1044_vm1, %v1331_v60, 0.0 }
 0x24c   : > { %v1440_v6 = vadd.f32 %v1439_v45, %v1438_v55  ;;  %v3926_v45 = vsub.f32 %v3409_v54, %v3657_v31  ;;  %v3940_v54 = vsub.f32 %v3423_v56, %v3657_v31  ;;  %v3954_v56 = vsub.f32 %v3427_v14, %v3657_v31 }
 0x24d   : > { %v1333_v41 = vmul.f32 %v3919_v12, %v3919_v12  ;;  %v1449_v57 = vsel %vm1044_vm1, %v1332_v29, 0.0  ;;  %v3968_v14 = vsub.f32 %v3441_v52, %v3657_v31  ;;  %v3982_v52 = vsub.f32 %v3453_v27, %v3657_v31 }
 0x24e   : > { %v1442_v61 = vadd.f32 %v1441_v13, %v1440_v6  ;;  %v3933_v13 = vsub.f32 %v3414_v30, %v3657_v31  ;;  %v3947_v30 = vsub.f32 %v3418_v47, %v3657_v31  ;;  %v3961_v47 = vsub.f32 %v3435_v40, %v3657_v31 }
 0x24f   : > { %v1451_v60 = vsel %vm1044_vm1, %v1333_v41, 0.0  ;;  %v3975_v40 = vsub.f32 %v3447_v43, %v3657_v31  ;;  %v3989_v43 = vsub.f32 %v3459_v16, %v3657_v31  ;;  %v3996_v27 = vsub.f32 %v3465_v51, %v3657_v31 }
 0x250   : > { %v1444_v55 = vadd.f32 %v1443_v32, %v1442_v61  ;;  %v1334_v32 = vmul.f32 %v3926_v45, %v3926_v45  ;;  %v4003_v16 = vsub.f32 %v3471_v62, %v3657_v31  ;;  %v4010_v51 = vsub.f32 %v3477_v49, %v3657_v31 }
 0x251   : > { %v4017_v62 = vsub.f32 %v3483_v59, %v3657_v31  ;;  %v4024_v49 = vsub.f32 %v3489_v63, %v3657_v31  ;;  %v4031_v59 = vsub.f32 %v3495_v3, %v3657_v31  ;;  %v4038_v63 = vsub.f32 %v3501_v7, %v3657_v31 }
 0x252   : > { %v1446_v6 = vadd.f32 %v1445_v2, %v1444_v55  ;;  %v1335_v2 = vmul.f32 %v3933_v13, %v3933_v13  ;;  %v1453_v29 = vsel %vm1044_vm1, %v1334_v32, 0.0  ;;  %v4045_v3 = vsub.f32 %v3507_v11, %v3657_v31 }
 0x253   : > { %v4052_v7 = vsub.f32 %v3513_v15, %v3657_v31  ;;  %v4059_v11 = vsub.f32 %v3519_v19, %v3657_v31  ;;  %v4066_v15 = vsub.f32 %v3525_v23, %v3657_v31  ;;  %v4073_v19 = vsub.f32 %v3531_v28, %v3657_v31 }
 0x254   : > { %v1448_v61 = vadd.f32 %v1447_v17, %v1446_v6  ;;  %v1336_v17 = vmul.f32 %v3940_v54, %v3940_v54  ;;  %v1455_v41 = vsel %vm1044_vm1, %v1335_v2, 0.0  ;;  %v4080_v23 = vsub.f32 %v3537_v33, %v3657_v31 }
 0x255   : > { %v4087_v28 = vsub.f32 %v3543_v44, %v3657_v31  ;;  %v4094_v33 = vsub.f32 %v3549_v50, %v3657_v31  ;;  %v4101_v44 = vsub.f32 %v3555_v0, %v3657_v31  ;;  %v4108_v50 = vsub.f32 %v3561_v8, %v3657_v31 }
 0x256   : > { %v1450_v55 = vadd.f32 %v1449_v57, %v1448_v61  ;;  %v1337_v57 = vmul.f32 %v3947_v30, %v3947_v30  ;;  %v1457_v32 = vsel %vm1044_vm1, %v1336_v17, 0.0  ;;  %v4115_v0 = vsub.f32 %v3567_v24, %v3657_v31 }
 0x257   : > { %v4122_v8 = vsub.f32 %v3573_v38, %v3657_v31  ;;  %v4129_v24 = vsub.f32 %v3579_v53, %v3657_v31  ;;  %v4136_v38 = vsub.f32 %v3585_v1, %v3657_v31  ;;  %v4143_v53 = vsub.f32 %v3591_v20, %v3657_v31 }
 0x258   : > { %v1452_v6 = vadd.f32 %v1451_v60, %v1450_v55  ;;  %v1338_v60 = vmul.f32 %v3954_v56, %v3954_v56  ;;  %v1459_v2 = vsel %vm1044_vm1, %v1337_v57, 0.0  ;;  %v4150_v1 = vsub.f32 %v3597_v39, %v3657_v31 }
 0x259   : > { %v4157_v20 = vsub.f32 %v3603_v58, %v3657_v31  ;;  %v4164_v39 = vsub.f32 %v3611_v5, %v3657_v31  ;;  %v4171_v58 = vsub.f32 %v3617_v37, %v3657_v31  ;;  %v4178_v5 = vsub.f32 %v3623_v42, %v3657_v31 }
 0x25a   : > { %v1454_v61 = vadd.f32 %v1453_v29, %v1452_v6  ;;  %v1339_v29 = vmul.f32 %v3961_v47, %v3961_v47  ;;  %v1461_v17 = vsel %vm1044_vm1, %v1338_v60, 0.0  ;;  %v4185_v37 = vsub.f32 %v3629_v4, %v3657_v31 }
 0x25b   : > { %5926 = vst [vmem:[#allocation29_spill] sm:$0xff] %v4157_v20  ;;  %5927 = vst [vmem:[#allocation30_spill] sm:$0xff] %v4164_v39 }
 0x25c   : > { %v1456_v55 = vadd.f32 %v1455_v41, %v1454_v61  ;;  %v1340_v41 = vmul.f32 %v3968_v14, %v3968_v14  ;;  %v1463_v57 = vsel %vm1044_vm1, %v1339_v29, 0.0  ;;  %5928 = vst [vmem:[#allocation31_spill] sm:$0xff] %v4171_v58  ;;  %5929 = vst [vmem:[#allocation32_spill] sm:$0xff] %v4178_v5 }
 0x25d   : > { %5930 = vst [vmem:[#allocation36_spill] sm:$0xff] %v4185_v37 }
 0x25e   : > { %v1458_v6 = vadd.f32 %v1457_v32, %v1456_v55  ;;  %v1341_v32 = vmul.f32 %v3975_v40, %v3975_v40  ;;  %v1465_v60 = vsel %vm1044_vm1, %v1340_v41, 0.0 }
 0x260   : > { %v1460_v61 = vadd.f32 %v1459_v2, %v1458_v6  ;;  %v1342_v2 = vmul.f32 %v3982_v52, %v3982_v52  ;;  %v1467_v29 = vsel %vm1044_vm1, %v1341_v32, 0.0 }
 0x262   : > { %v1462_v55 = vadd.f32 %v1461_v17, %v1460_v61  ;;  %v1343_v17 = vmul.f32 %v3989_v43, %v3989_v43  ;;  %v1469_v41 = vsel %vm1044_vm1, %v1342_v2, 0.0 }
 0x264   : > { %v1464_v6 = vadd.f32 %v1463_v57, %v1462_v55  ;;  %v1344_v57 = vmul.f32 %v3996_v27, %v3996_v27  ;;  %v1471_v32 = vsel %vm1044_vm1, %v1343_v17, 0.0 }
 0x266   : > { %v1466_v61 = vadd.f32 %v1465_v60, %v1464_v6  ;;  %v1345_v60 = vmul.f32 %v4003_v16, %v4003_v16  ;;  %v1473_v2 = vsel %vm1044_vm1, %v1344_v57, 0.0 }
 0x268   : > { %v1468_v55 = vadd.f32 %v1467_v29, %v1466_v61  ;;  %v1346_v29 = vmul.f32 %v4010_v51, %v4010_v51  ;;  %v1475_v17 = vsel %vm1044_vm1, %v1345_v60, 0.0 }
 0x26a   : > { %v1470_v6 = vadd.f32 %v1469_v41, %v1468_v55  ;;  %v1347_v41 = vmul.f32 %v4017_v62, %v4017_v62  ;;  %v1477_v57 = vsel %vm1044_vm1, %v1346_v29, 0.0 }
 0x26c   : > { %v1472_v61 = vadd.f32 %v1471_v32, %v1470_v6  ;;  %v1348_v32 = vmul.f32 %v4024_v49, %v4024_v49  ;;  %v1479_v60 = vsel %vm1044_vm1, %v1347_v41, 0.0 }
 0x26e   : > { %v1474_v55 = vadd.f32 %v1473_v2, %v1472_v61  ;;  %v1349_v2 = vmul.f32 %v4031_v59, %v4031_v59  ;;  %v1481_v29 = vsel %vm1044_vm1, %v1348_v32, 0.0 }
 0x270   : > { %v1476_v6 = vadd.f32 %v1475_v17, %v1474_v55  ;;  %v1350_v17 = vmul.f32 %v4038_v63, %v4038_v63  ;;  %v1483_v41 = vsel %vm1044_vm1, %v1349_v2, 0.0 }
 0x272   : > { %v1478_v61 = vadd.f32 %v1477_v57, %v1476_v6  ;;  %v1351_v57 = vmul.f32 %v4045_v3, %v4045_v3  ;;  %v1485_v32 = vsel %vm1044_vm1, %v1350_v17, 0.0 }
 0x274   : > { %v1480_v55 = vadd.f32 %v1479_v60, %v1478_v61  ;;  %v1352_v60 = vmul.f32 %v4052_v7, %v4052_v7  ;;  %v1487_v2 = vsel %vm1044_vm1, %v1351_v57, 0.0 }
 0x276   : > { %v1482_v6 = vadd.f32 %v1481_v29, %v1480_v55  ;;  %v1353_v29 = vmul.f32 %v4059_v11, %v4059_v11  ;;  %v1489_v17 = vsel %vm1044_vm1, %v1352_v60, 0.0 }
 0x278   : > { %v1484_v61 = vadd.f32 %v1483_v41, %v1482_v6  ;;  %v1354_v41 = vmul.f32 %v4066_v15, %v4066_v15  ;;  %v1491_v57 = vsel %vm1044_vm1, %v1353_v29, 0.0 }
 0x27a   : > { %v1486_v55 = vadd.f32 %v1485_v32, %v1484_v61  ;;  %v1355_v32 = vmul.f32 %v4073_v19, %v4073_v19  ;;  %v1493_v60 = vsel %vm1044_vm1, %v1354_v41, 0.0 }
 0x27c   : > { %v1488_v6 = vadd.f32 %v1487_v2, %v1486_v55  ;;  %v1356_v2 = vmul.f32 %v4080_v23, %v4080_v23  ;;  %v1495_v29 = vsel %vm1044_vm1, %v1355_v32, 0.0 }
 0x27e   : > { %v1490_v61 = vadd.f32 %v1489_v17, %v1488_v6  ;;  %v1357_v17 = vmul.f32 %v4087_v28, %v4087_v28  ;;  %v1497_v41 = vsel %vm1044_vm1, %v1356_v2, 0.0 }
 0x280   : > { %v1492_v55 = vadd.f32 %v1491_v57, %v1490_v61  ;;  %v1358_v57 = vmul.f32 %v4094_v33, %v4094_v33  ;;  %v1499_v32 = vsel %vm1044_vm1, %v1357_v17, 0.0 }
 0x282   : > { %v1494_v6 = vadd.f32 %v1493_v60, %v1492_v55  ;;  %v1359_v60 = vmul.f32 %v4101_v44, %v4101_v44  ;;  %v1501_v2 = vsel %vm1044_vm1, %v1358_v57, 0.0 }
 0x284   : > { %v1496_v61 = vadd.f32 %v1495_v29, %v1494_v6  ;;  %v1360_v29 = vmul.f32 %v4108_v50, %v4108_v50  ;;  %v1503_v17 = vsel %vm1044_vm1, %v1359_v60, 0.0 }
 0x286   : > { %v1498_v55 = vadd.f32 %v1497_v41, %v1496_v61  ;;  %v1361_v41 = vmul.f32 %v4115_v0, %v4115_v0  ;;  %v1505_v57 = vsel %vm1044_vm1, %v1360_v29, 0.0 }
 0x288   : > { %v1500_v6 = vadd.f32 %v1499_v32, %v1498_v55  ;;  %v1362_v32 = vmul.f32 %v4122_v8, %v4122_v8  ;;  %v1507_v60 = vsel %vm1044_vm1, %v1361_v41, 0.0 }
 0x28a   : > { %v1502_v61 = vadd.f32 %v1501_v2, %v1500_v6  ;;  %v1363_v2 = vmul.f32 %v4129_v24, %v4129_v24  ;;  %v1509_v29 = vsel %vm1044_vm1, %v1362_v32, 0.0 }
 0x28c   : > { %v1504_v55 = vadd.f32 %v1503_v17, %v1502_v61  ;;  %v1364_v17 = vmul.f32 %v4136_v38, %v4136_v38  ;;  %v1511_v41 = vsel %vm1044_vm1, %v1363_v2, 0.0 }
 0x28e   : > { %v1506_v6 = vadd.f32 %v1505_v57, %v1504_v55  ;;  %v1365_v57 = vmul.f32 %v4143_v53, %v4143_v53  ;;  %v1513_v32 = vsel %vm1044_vm1, %v1364_v17, 0.0 }
 0x290   : > { %v1508_v61 = vadd.f32 %v1507_v60, %v1506_v6  ;;  %v1366_v60 = vmul.f32 %v4150_v1, %v4150_v1  ;;  %v1515_v2 = vsel %vm1044_vm1, %v1365_v57, 0.0 }
 0x292   : > { %v1510_v55 = vadd.f32 %v1509_v29, %v1508_v61  ;;  %v1367_v29 = vmul.f32 %v4157_v20, %v4157_v20  ;;  %v1517_v17 = vsel %vm1044_vm1, %v1366_v60, 0.0 }
 0x294   : > { %v1512_v6 = vadd.f32 %v1511_v41, %v1510_v55  ;;  %v1368_v41 = vmul.f32 %v4164_v39, %v4164_v39  ;;  %v1519_v57 = vsel %vm1044_vm1, %v1367_v29, 0.0  ;;  %v1370_v39 = vmul.f32 %v4178_v5, %v4178_v5 }
 0x296   : > { %v1514_v61 = vadd.f32 %v1513_v32, %v1512_v6  ;;  %v1369_v32 = vmul.f32 %v4171_v58, %v4171_v58  ;;  %v1521_v60 = vsel %vm1044_vm1, %v1368_v41, 0.0  ;;  %v1371_v58 = vmul.f32 %v4185_v37, %v4185_v37 }
 0x297   : > { %v1525_v41 = vsel %vm1044_vm1, %v1370_v39, 0.0 }
 0x298   : > { %v1516_v55 = vadd.f32 %v1515_v2, %v1514_v61  ;;  %v5931_v2 = vld [vmem:[#allocation33_spill] sm:$0xff]  ;;  %v1523_v29 = vsel %vm1044_vm1, %v1369_v32, 0.0  ;;  %v1527_v32 = vsel %vm1044_vm1, %v1371_v58, 0.0 }
 0x299   : > { %v4192_v42 = vsub.f32 %v5931_v2, %v3657_v31 }
 0x29a   : > { %v1518_v6 = vadd.f32 %v1517_v17, %v1516_v55  ;;  %v5933_v17 = vld [vmem:[#allocation34_spill] sm:$0xff] }
 0x29b   : > { %5932 = vst [vmem:[#allocation33_spill] sm:$0xff] %v4192_v42  ;;  %v4199_v4 = vsub.f32 %v5933_v17, %v3657_v31  ;;  %v1372_v2 = vmul.f32 %v4192_v42, %v4192_v42 }
 0x29c   : > { %v1520_v61 = vadd.f32 %v1519_v57, %v1518_v6  ;;  %v4206_v57 = vsub.f32 %v3647_v22, %v3657_v31 }
 0x29d   : > { %5934 = vst [vmem:[#allocation34_spill] sm:$0xff] %v4199_v4  ;;  %v1373_v17 = vmul.f32 %v4199_v4, %v4199_v4 }
 0x29e   : > { %v1522_v55 = vadd.f32 %v1521_v60, %v1520_v61  ;;  %5935 = vst [vmem:[#allocation37_spill] sm:$0xff] %v4206_v57  ;;  %v4213_v60 = vsub.f32 %v3651_v36, %v3657_v31  ;;  %v1374_v22 = vmul.f32 %v4206_v57, %v4206_v57 }
 0x2a0   : > { %v1524_v6 = vadd.f32 %v1523_v29, %v1522_v55  ;;  %v1529_v29 = vsel %vm1044_vm1, %v1372_v2, 0.0  ;;  %v1375_v39 = vmul.f32 %v4213_v60, %v4213_v60  ;;  %v1533_v31 = vsel %vm1044_vm1, %v1374_v22, 0.0  ;;  %v5938_v22 = vld [vmem:[#allocation3_spill] sm:$0xff] }
 0x2a2   : > { %v1526_v61 = vadd.f32 %v1525_v41, %v1524_v6  ;;  %v1531_v6 = vsel %vm1044_vm1, %v1373_v17, 0.0  ;;  %v1535_v4 = vsel %vm1044_vm1, %v1375_v39, 0.0  ;;  %v5939_v39 = vld [vmem:[#allocation4_spill] sm:$0xff] }
 0x2a4   : > { %v1528_v55 = vadd.f32 %v1527_v32, %v1526_v61 }
 0x2a6   : > { %v1530_v37 = vadd.f32 %v1529_v29, %v1528_v55 }
 0x2a8   : > { %v1532_v41 = vadd.f32 %v1531_v6, %v1530_v37  ;;  %v5940_v6 = vld [vmem:[#allocation5_spill] sm:$0xff] }
 0x2aa   : > { %v1534_v36 = vadd.f32 %v1533_v31, %v1532_v41  ;;  %v5941_v41 = vld [vmem:[#allocation6_spill] sm:$0xff] }
 0x2ac   : > { %v1536_v42 = vadd.f32 %v1535_v4, %v1534_v36  ;;  %v5936_v4 = vld [vmem:[#allocation35_spill] sm:$0xff] }
 0x2ad   : > { %v5942_v36 = vld [vmem:[#allocation7_spill] sm:$0xff] }
 0x2ae   : > { %v1537_v58 = vrot.slane %v1536_v42, 4 }
 0x2b0   : > { %v1538_v61 = vadd.f32 %v1537_v58, %v1536_v42 }
 0x2b2   : > { %v1539_v32 = vrot.slane %v1538_v61, 2 }
 0x2b4   : > { %v1540_v5 = vadd.f32 %v1539_v32, %v1538_v61  ;;  %v5943_v61 = vld [vmem:[#allocation8_spill] sm:$0xff] }
 0x2b6   : > { %v1541_v57 = vrot.slane %v1540_v5, 1 }
 0x2b8   : > { %v1542_v20 = vadd.f32 %v1541_v57, %v1540_v5  ;;  %v5937_v57 = vld [vmem:[#allocation2_spill] sm:$0xff] }
 0x2ba   : > { %v1543_v2 = vmul.f32 0.0015432099, %v1542_v20 }
 0x2bc   : > { %v1544_v55 = vadd.f32 1e-05, %v1543_v2  ;;  %v5945_v2 = vld [vmem:[#allocation9_spill] sm:$0xff] }
 0x2be   : > { %2916 = vrsqrt.f32 %v1544_v55 }
 0x2c8   : > { %v4226_v29 = vpop.eup %2916 }
 0x2c9   : > { %v4230_v37 = vmul.f32 %v4226_v29, %v3661_v26  ;;  %v4234_v17 = vmul.f32 %v4226_v29, %v3665_v46  ;;  %v4238_v42 = vmul.f32 %v4226_v29, %v3669_v48  ;;  %v4242_v5 = vmul.f32 %v4226_v29, %v3673_v21 }
 0x2ca   : > { %v4246_v20 = vmul.f32 %v4226_v29, %v3681_v34  ;;  %v4250_v26 = vmul.f32 %v4226_v29, %v3687_v35  ;;  %v4254_v46 = vmul.f32 %v4226_v29, %v3695_v25  ;;  %v4258_v48 = vmul.f32 %v4226_v29, %v5936_v4  ;;  %v5947_v4 = vld [vmem:[#allocation10_spill] sm:$0xff] }
 0x2cb   : > { %v4262_v21 = vmul.f32 %v4226_v29, %v5937_v57  ;;  %v4266_v34 = vmul.f32 %v4226_v29, %v5938_v22  ;;  %v4270_v35 = vmul.f32 %v4226_v29, %v5939_v39  ;;  %v4274_v25 = vmul.f32 %v4226_v29, %v5940_v6  ;;  %v5949_v22 = vld [vmem:[#allocation11_spill] sm:$0xff]  ;;  %v5951_v6 = vld [vmem:[#allocation12_spill] sm:$0xff] }
 0x2cc   : > { %v4278_v31 = vmul.f32 %v4226_v29, %v5941_v41  ;;  %v4282_v58 = vmul.f32 %v4226_v29, %v5942_v36  ;;  %v4286_v32 = vmul.f32 %v4226_v29, %v5943_v61  ;;  %v4290_v55 = vmul.f32 %v4226_v29, %v5945_v2  ;;  %v5953_v36 = vld [vmem:[#allocation13_spill] sm:$0xff] }
 0x2cd   : > { %v4294_v57 = vmul.f32 %v4226_v29, %v5947_v4  ;;  %v4298_v39 = vmul.f32 %v4226_v29, %v5949_v22  ;;  %v4302_v41 = vmul.f32 %v4226_v29, %v5951_v6  ;;  %v4306_v61 = vmul.f32 %v4226_v29, %v5953_v36 }
 0x2ce   : > { %5944 = vst [vmem:[#allocation35_spill] sm:$0xff] %v4286_v32  ;;  %5946 = vst [vmem:[#allocation2_spill] sm:$0xff] %v4290_v55  ;;  %v5955_v32 = vld [vmem:[#allocation14_spill] sm:$0xff]  ;;  %v5957_v55 = vld [vmem:[#allocation15_spill] sm:$0xff] }
 0x2cf   : > { %5948 = vst [vmem:[#allocation3_spill] sm:$0xff] %v4294_v57  ;;  %5950 = vst [vmem:[#allocation4_spill] sm:$0xff] %v4298_v39  ;;  %v4310_v2 = vmul.f32 %v4226_v29, %v5955_v32  ;;  %v4314_v4 = vmul.f32 %v4226_v29, %v5957_v55  ;;  %v5959_v57 = vld [vmem:[#allocation16_spill] sm:$0xff]  ;;  %v5961_v39 = vld [vmem:[#allocation17_spill] sm:$0xff] }
 0x2d0   : > { %5952 = vst [vmem:[#allocation5_spill] sm:$0xff] %v4302_v41  ;;  %5954 = vst [vmem:[#allocation6_spill] sm:$0xff] %v4306_v61  ;;  %v4318_v22 = vmul.f32 %v4226_v29, %v5959_v57  ;;  %v4322_v6 = vmul.f32 %v4226_v29, %v5961_v39  ;;  %v5963_v41 = vld [vmem:[#allocation18_spill] sm:$0xff]  ;;  %v5965_v61 = vld [vmem:[#allocation19_spill] sm:$0xff] }
 0x2d1   : > { %5956 = vst [vmem:[#allocation7_spill] sm:$0xff] %v4310_v2  ;;  %5958 = vst [vmem:[#allocation8_spill] sm:$0xff] %v4314_v4  ;;  %v4326_v36 = vmul.f32 %v4226_v29, %v5963_v41  ;;  %v4330_v32 = vmul.f32 %v4226_v29, %v5965_v61  ;;  %v5967_v2 = vld [vmem:[#allocation20_spill] sm:$0xff]  ;;  %v5969_v4 = vld [vmem:[#allocation21_spill] sm:$0xff] }
 0x2d2   : > { %5960 = vst [vmem:[#allocation9_spill] sm:$0xff] %v4318_v22  ;;  %5962 = vst [vmem:[#allocation10_spill] sm:$0xff] %v4322_v6  ;;  %v4334_v55 = vmul.f32 %v4226_v29, %v5967_v2  ;;  %v4338_v57 = vmul.f32 %v4226_v29, %v5969_v4  ;;  %v5971_v22 = vld [vmem:[#allocation22_spill] sm:$0xff]  ;;  %v5973_v6 = vld [vmem:[#allocation23_spill] sm:$0xff] }
 0x2d3   : > { %5964 = vst [vmem:[#allocation11_spill] sm:$0xff] %v4326_v36  ;;  %5966 = vst [vmem:[#allocation12_spill] sm:$0xff] %v4330_v32  ;;  %v4342_v39 = vmul.f32 %v4226_v29, %v5971_v22  ;;  %v4346_v41 = vmul.f32 %v4226_v29, %v5973_v6  ;;  %v5974_v36 = vld [vmem:[#allocation24_spill] sm:$0xff]  ;;  %v5975_v32 = vld [vmem:[#allocation25_spill] sm:$0xff] }
 0x2d4   : > { %5968 = vst [vmem:[#allocation13_spill] sm:$0xff] %v4334_v55  ;;  %5970 = vst [vmem:[#allocation14_spill] sm:$0xff] %v4338_v57  ;;  %v4350_v61 = vmul.f32 %v4226_v29, %v5974_v36  ;;  %v4354_v2 = vmul.f32 %v4226_v29, %v5975_v32  ;;  %v5976_v55 = vld [vmem:[#allocation26_spill] sm:$0xff]  ;;  %v5977_v57 = vld [vmem:[#allocation27_spill] sm:$0xff]  ;;  %v4370_v36 = vmul.f32 %v4226_v29, %v3898_v9 }
 0x2d5   : > { %5972 = vst [vmem:[#allocation15_spill] sm:$0xff] %v4342_v39  ;;  %v4358_v4 = vmul.f32 %v4226_v29, %v5976_v55  ;;  %v4362_v22 = vmul.f32 %v4226_v29, %v5977_v57  ;;  %v5978_v39 = vld [vmem:[#allocation28_spill] sm:$0xff]  ;;  %v4374_v32 = vmul.f32 %v4226_v29, %v3905_v10  ;;  %v4378_v55 = vmul.f32 %v4226_v29, %v3912_v18 }
 0x2d6   : > { %v4366_v6 = vmul.f32 %v4226_v29, %v5978_v39  ;;  %v4382_v57 = vmul.f32 %v4226_v29, %v3919_v12  ;;  %v4386_v39 = vmul.f32 %v4226_v29, %v3926_v45  ;;  %v4390_v9 = vmul.f32 %v4226_v29, %v3933_v13 }
 0x2d7   : > { %v4394_v10 = vmul.f32 %v4226_v29, %v3940_v54  ;;  %v4398_v18 = vmul.f32 %v4226_v29, %v3947_v30  ;;  %v4402_v12 = vmul.f32 %v4226_v29, %v3954_v56  ;;  %v4406_v45 = vmul.f32 %v4226_v29, %v3961_v47 }
 0x2d8   : > { %v4410_v13 = vmul.f32 %v4226_v29, %v3968_v14  ;;  %v4414_v54 = vmul.f32 %v4226_v29, %v3975_v40  ;;  %v4418_v30 = vmul.f32 %v4226_v29, %v3982_v52  ;;  %v4422_v56 = vmul.f32 %v4226_v29, %v3989_v43 }
 0x2d9   : > { %v4426_v47 = vmul.f32 %v4226_v29, %v3996_v27  ;;  %v4430_v14 = vmul.f32 %v4226_v29, %v4003_v16  ;;  %v4434_v40 = vmul.f32 %v4226_v29, %v4010_v51  ;;  %v4438_v52 = vmul.f32 %v4226_v29, %v4017_v62 }
 0x2da   : > { %v4442_v43 = vmul.f32 %v4226_v29, %v4024_v49  ;;  %v4446_v27 = vmul.f32 %v4226_v29, %v4031_v59  ;;  %v4450_v16 = vmul.f32 %v4226_v29, %v4038_v63  ;;  %v4458_v51 = vmul.f32 %v4226_v29, %v4045_v3 }
 0x2db   : > { %v4462_v62 = vmul.f32 %v4226_v29, %v4052_v7  ;;  %v4466_v49 = vmul.f32 %v4226_v29, %v4059_v11  ;;  %v4470_v59 = vmul.f32 %v4226_v29, %v4066_v15  ;;  %v4474_v63 = vmul.f32 %v4226_v29, %v4073_v19 }
 0x2dc   : > { %v4478_v3 = vmul.f32 %v4226_v29, %v4080_v23  ;;  %v4482_v7 = vmul.f32 %v4226_v29, %v4087_v28  ;;  %v4486_v11 = vmul.f32 %v4226_v29, %v4094_v33  ;;  %v4490_v15 = vmul.f32 %v4226_v29, %v4101_v44 }
 0x2dd   : > { %v4494_v19 = vmul.f32 %v4226_v29, %v4108_v50  ;;  %v4498_v23 = vmul.f32 %v4226_v29, %v4115_v0  ;;  %v4502_v28 = vmul.f32 %v4226_v29, %v4122_v8  ;;  %v4506_v33 = vmul.f32 %v4226_v29, %v4129_v24  ;;  %v5986_v8 = vld [vmem:[#allocation29_spill] sm:$0xff]  ;;  %v5988_v24 = vld [vmem:[#allocation30_spill] sm:$0xff] }
 0x2de   : > { %v4510_v44 = vmul.f32 %v4226_v29, %v4136_v38  ;;  %v4514_v50 = vmul.f32 %v4226_v29, %v4143_v53  ;;  %v4518_v0 = vmul.f32 %v4226_v29, %v4150_v1  ;;  %v5990_v38 = vld [vmem:[#allocation31_spill] sm:$0xff]  ;;  %v5991_v53 = vld [vmem:[#allocation32_spill] sm:$0xff] }
 0x2df   : > { %5979 = vst [vmem:[#allocation16_spill] sm:$0xff] %v4494_v19  ;;  %5980 = vst [vmem:[#allocation17_spill] sm:$0xff] %v4498_v23  ;;  %v4520_v23 = vld [vmem:[%s278_s8] ss:$0 sm:$0xff]  ;;  %v5992_v1 = vld [vmem:[#allocation36_spill] sm:$0xff] }
 0x2e0   : > { %5981 = vst [vmem:[#allocation18_spill] sm:$0xff] %v4502_v28  ;;  %5982 = vst [vmem:[#allocation19_spill] sm:$0xff] %v4506_v33  ;;  %v4524_v28 = vmul.f32 %v4226_v29, %v5986_v8  ;;  %v4528_v33 = vmul.f32 %v4226_v29, %v5988_v24  ;;  %v5993_v19 = vld [vmem:[#allocation33_spill] sm:$0xff] }
 0x2e1   : > { %5983 = vst [vmem:[#allocation20_spill] sm:$0xff] %v4510_v44  ;;  %5984 = vst [vmem:[#allocation21_spill] sm:$0xff] %v4514_v50  ;;  %v4532_v44 = vmul.f32 %v4226_v29, %v5990_v38  ;;  %v4536_v50 = vmul.f32 %v4226_v29, %v5991_v53  ;;  %v4544_v8 = vmul.f32 %v4226_v29, %v5993_v19 }
 0x2e2   : > { %5985 = vst [vmem:[#allocation22_spill] sm:$0xff] %v4518_v0  ;;  %5987 = vst [vmem:[#allocation23_spill] sm:$0xff] %v4524_v28  ;;  %v4540_v0 = vmul.f32 %v4226_v29, %v5992_v1  ;;  %v5994_v28 = vld [vmem:[#allocation34_spill] sm:$0xff]  ;;  %v4556_v53 = vmul.f32 %v4226_v29, %v4213_v60  ;;  %v4560_v1 = vmul.f32 %v4520_v23, %v4230_v37 }
 0x2e3   : > { %5989 = vst [vmem:[#allocation24_spill] sm:$0xff] %v4528_v33  ;;  %v4548_v24 = vmul.f32 %v4226_v29, %v5994_v28  ;;  %v5995_v33 = vld [vmem:[#allocation37_spill] sm:$0xff]  ;;  %v4564_v19 = vmul.f32 %v4520_v23, %v4234_v17  ;;  %v4568_v28 = vmul.f32 %v4520_v23, %v4238_v42  ;;  %v4576_v60 = vmul.f32 %v4520_v23, %v4246_v20 }
 0x2e4   : > { %v4552_v38 = vmul.f32 %v4226_v29, %v5995_v33  ;;  %v4572_v33 = vmul.f32 %v4520_v23, %v4242_v5  ;;  %v4580_v29 = vmul.f32 %v4520_v23, %v4250_v26  ;;  %v4584_v37 = vmul.f32 %v4520_v23, %v4254_v46 }
 0x2e5   : > { %v4588_v17 = vmul.f32 %v4520_v23, %v4258_v48  ;;  %v4592_v42 = vmul.f32 %v4520_v23, %v4262_v21  ;;  %v4596_v5 = vmul.f32 %v4520_v23, %v4266_v34  ;;  %v4600_v20 = vmul.f32 %v4520_v23, %v4270_v35  ;;  %v6001_v21 = vld [vmem:[#allocation35_spill] sm:$0xff] }
 0x2e6   : > { %v4604_v26 = vmul.f32 %v4520_v23, %v4274_v25  ;;  %v4608_v46 = vmul.f32 %v4520_v23, %v4278_v31  ;;  %v4612_v48 = vmul.f32 %v4520_v23, %v4282_v58  ;;  %v4616_v34 = vmul.f32 %v4520_v23, %v6001_v21 }
 0x2e7   : > { %5996 = vst [vmem:[#allocation25_spill] sm:$0xff] %v4596_v5  ;;  %5997 = vst [vmem:[#allocation26_spill] sm:$0xff] %v4600_v20  ;;  %v6003_v5 = vld [vmem:[#allocation2_spill] sm:$0xff]  ;;  %v6005_v20 = vld [vmem:[#allocation3_spill] sm:$0xff] }
 0x2e8   : > { %5998 = vst [vmem:[#allocation27_spill] sm:$0xff] %v4604_v26  ;;  %5999 = vst [vmem:[#allocation28_spill] sm:$0xff] %v4608_v46  ;;  %v4620_v35 = vmul.f32 %v4520_v23, %v6003_v5  ;;  %v4624_v25 = vmul.f32 %v4520_v23, %v6005_v20  ;;  %v6007_v26 = vld [vmem:[#allocation4_spill] sm:$0xff]  ;;  %v6009_v46 = vld [vmem:[#allocation5_spill] sm:$0xff] }
 0x2e9   : > { %6000 = vst [vmem:[#allocation29_spill] sm:$0xff] %v4612_v48  ;;  %6002 = vst [vmem:[#allocation30_spill] sm:$0xff] %v4616_v34  ;;  %v4628_v31 = vmul.f32 %v4520_v23, %v6007_v26  ;;  %v4632_v58 = vmul.f32 %v4520_v23, %v6009_v46  ;;  %v6011_v48 = vld [vmem:[#allocation6_spill] sm:$0xff]  ;;  %v6013_v34 = vld [vmem:[#allocation7_spill] sm:$0xff] }
 0x2ea   : > { %6004 = vst [vmem:[#allocation31_spill] sm:$0xff] %v4620_v35  ;;  %6006 = vst [vmem:[#allocation32_spill] sm:$0xff] %v4624_v25  ;;  %v4636_v21 = vmul.f32 %v4520_v23, %v6011_v48  ;;  %v4640_v5 = vmul.f32 %v4520_v23, %v6013_v34  ;;  %v6015_v35 = vld [vmem:[#allocation8_spill] sm:$0xff]  ;;  %v6017_v25 = vld [vmem:[#allocation9_spill] sm:$0xff] }
 0x2eb   : > { %6008 = vst [vmem:[#allocation36_spill] sm:$0xff] %v4628_v31  ;;  %6010 = vst [vmem:[#allocation33_spill] sm:$0xff] %v4632_v58  ;;  %v4644_v20 = vmul.f32 %v4520_v23, %v6015_v35  ;;  %v4648_v26 = vmul.f32 %v4520_v23, %v6017_v25  ;;  %v6019_v31 = vld [vmem:[#allocation10_spill] sm:$0xff]  ;;  %v6020_v58 = vld [vmem:[#allocation11_spill] sm:$0xff] }
 0x2ec   : > { %6012 = vst [vmem:[#allocation34_spill] sm:$0xff] %v4636_v21  ;;  %6014 = vst [vmem:[#allocation37_spill] sm:$0xff] %v4640_v5  ;;  %v4652_v46 = vmul.f32 %v4520_v23, %v6019_v31  ;;  %v4656_v48 = vmul.f32 %v4520_v23, %v6020_v58  ;;  %v6021_v21 = vld [vmem:[#allocation12_spill] sm:$0xff]  ;;  %v6022_v5 = vld [vmem:[#allocation13_spill] sm:$0xff]  ;;  %v4676_v58 = vmul.f32 %v4520_v23, %v4346_v41 }
 0x2ed   : > { %6016 = vst [vmem:[#allocation35_spill] sm:$0xff] %v4644_v20  ;;  %6018 = vst [vmem:[#allocation2_spill] sm:$0xff] %v4648_v26  ;;  %v4660_v34 = vmul.f32 %v4520_v23, %v6021_v21  ;;  %v4664_v35 = vmul.f32 %v4520_v23, %v6022_v5  ;;  %v6023_v20 = vld [vmem:[#allocation14_spill] sm:$0xff]  ;;  %v6024_v26 = vld [vmem:[#allocation15_spill] sm:$0xff]  ;;  %v4680_v21 = vmul.f32 %v4520_v23, %v4350_v61 }
 0x2ee   : > { %v4668_v25 = vmul.f32 %v4520_v23, %v6023_v20  ;;  %v4672_v31 = vmul.f32 %v4520_v23, %v6024_v26  ;;  %v4684_v5 = vmul.f32 %v4520_v23, %v4354_v2  ;;  %v4688_v20 = vmul.f32 %v4520_v23, %v4358_v4 }
 0x2ef   : > { %v4692_v26 = vmul.f32 %v4520_v23, %v4362_v22  ;;  %v4696_v41 = vmul.f32 %v4520_v23, %v4366_v6  ;;  %v4700_v61 = vmul.f32 %v4520_v23, %v4370_v36  ;;  %v4704_v2 = vmul.f32 %v4520_v23, %v4374_v32 }
 0x2f0   : > { %v4708_v4 = vmul.f32 %v4520_v23, %v4378_v55  ;;  %v4712_v22 = vmul.f32 %v4520_v23, %v4382_v57  ;;  %v4716_v6 = vmul.f32 %v4520_v23, %v4386_v39  ;;  %v4720_v36 = vmul.f32 %v4520_v23, %v4390_v9 }
 0x2f1   : > { %v4724_v32 = vmul.f32 %v4520_v23, %v4394_v10  ;;  %v4728_v55 = vmul.f32 %v4520_v23, %v4398_v18  ;;  %v4732_v57 = vmul.f32 %v4520_v23, %v4402_v12  ;;  %v4736_v39 = vmul.f32 %v4520_v23, %v4406_v45 }
 0x2f2   : > { %v4740_v9 = vmul.f32 %v4520_v23, %v4410_v13  ;;  %v4744_v10 = vmul.f32 %v4520_v23, %v4414_v54  ;;  %v4748_v18 = vmul.f32 %v4520_v23, %v4418_v30  ;;  %v4752_v12 = vmul.f32 %v4520_v23, %v4422_v56 }
 0x2f3   : > { %v4756_v45 = vmul.f32 %v4520_v23, %v4426_v47  ;;  %v4760_v13 = vmul.f32 %v4520_v23, %v4430_v14  ;;  %v4764_v54 = vmul.f32 %v4520_v23, %v4434_v40  ;;  %v4768_v30 = vmul.f32 %v4520_v23, %v4438_v52 }
 0x2f4   : > { %v4772_v56 = vmul.f32 %v4520_v23, %v4442_v43  ;;  %v4776_v47 = vmul.f32 %v4520_v23, %v4446_v27  ;;  %v4784_v14 = vmul.f32 %v4520_v23, %v4450_v16  ;;  %v4788_v40 = vmul.f32 %v4520_v23, %v4458_v51 }
 0x2f5   : > { %v4792_v52 = vmul.f32 %v4520_v23, %v4462_v62  ;;  %v4796_v43 = vmul.f32 %v4520_v23, %v4466_v49  ;;  %v4800_v27 = vmul.f32 %v4520_v23, %v4470_v59  ;;  %v4804_v16 = vmul.f32 %v4520_v23, %v4474_v63 }
 0x2f6   : > { %v4808_v51 = vmul.f32 %v4520_v23, %v4478_v3  ;;  %v4812_v62 = vmul.f32 %v4520_v23, %v4482_v7  ;;  %v4816_v49 = vmul.f32 %v4520_v23, %v4486_v11  ;;  %v4820_v59 = vmul.f32 %v4520_v23, %v4490_v15 }
 0x2f7   : > { %6025 = vst [vmem:[#allocation3_spill] sm:$0xff] %v4800_v27  ;;  %6026 = vst [vmem:[#allocation4_spill] sm:$0xff] %v4804_v16  ;;  %v6031_v27 = vld [vmem:[#allocation16_spill] sm:$0xff]  ;;  %v6033_v16 = vld [vmem:[#allocation17_spill] sm:$0xff] }
 0x2f8   : > { %6027 = vst [vmem:[#allocation5_spill] sm:$0xff] %v4808_v51  ;;  %6028 = vst [vmem:[#allocation6_spill] sm:$0xff] %v4812_v62  ;;  %v4824_v63 = vmul.f32 %v4520_v23, %v6031_v27  ;;  %v4828_v3 = vmul.f32 %v4520_v23, %v6033_v16  ;;  %v6035_v51 = vld [vmem:[#allocation18_spill] sm:$0xff]  ;;  %v6037_v62 = vld [vmem:[#allocation19_spill] sm:$0xff] }
 0x2f9   : > { %6029 = vst [vmem:[#allocation7_spill] sm:$0xff] %v4816_v49  ;;  %6030 = vst [vmem:[#allocation8_spill] sm:$0xff] %v4820_v59  ;;  %v4832_v7 = vmul.f32 %v4520_v23, %v6035_v51  ;;  %v4836_v11 = vmul.f32 %v4520_v23, %v6037_v62  ;;  %v6039_v49 = vld [vmem:[#allocation20_spill] sm:$0xff]  ;;  %v6040_v59 = vld [vmem:[#allocation21_spill] sm:$0xff] }
 0x2fa   : > { %6032 = vst [vmem:[#allocation9_spill] sm:$0xff] %v4824_v63  ;;  %6034 = vst [vmem:[#allocation10_spill] sm:$0xff] %v4828_v3  ;;  %v4840_v15 = vmul.f32 %v4520_v23, %v6039_v49  ;;  %v4844_v27 = vmul.f32 %v4520_v23, %v6040_v59  ;;  %v4846_v63 = vld [vmem:[%s281_s11] ss:$0 sm:$0xff]  ;;  %v6042_v51 = vld [vmem:[#allocation23_spill] sm:$0xff]  ;;  %v4862_v49 = vmul.f32 %v4520_v23, %v4532_v44 }
 0x2fb   : > { %6036 = vst [vmem:[#allocation11_spill] sm:$0xff] %v4832_v7  ;;  %6038 = vst [vmem:[#allocation12_spill] sm:$0xff] %v4836_v11  ;;  %v6041_v16 = vld [vmem:[#allocation22_spill] sm:$0xff]  ;;  %v4854_v7 = vmul.f32 %v4520_v23, %v6042_v51  ;;  %v6043_v62 = vld [vmem:[#allocation24_spill] sm:$0xff]  ;;  %v4866_v59 = vmul.f32 %v4520_v23, %v4536_v50  ;;  %v4874_v51 = vmul.f32 %v4520_v23, %v4544_v8 }
 0x2fc   : > { %v4850_v3 = vmul.f32 %v4520_v23, %v6041_v16  ;;  %v4858_v11 = vmul.f32 %v4520_v23, %v6043_v62  ;;  %v4870_v16 = vmul.f32 %v4520_v23, %v4540_v0  ;;  %v4878_v62 = vmul.f32 %v4520_v23, %v4548_v24 }
 0x2fd   : > { %v4882_v44 = vmul.f32 %v4520_v23, %v4552_v38  ;;  %v4886_v50 = vmul.f32 %v4520_v23, %v4556_v53  ;;  %v4890_v0 = vadd.f32 %v4846_v63, %v4560_v1  ;;  %v4894_v8 = vadd.f32 %v4846_v63, %v4564_v19 }
 0x2fe   : > { %v4898_v24 = vadd.f32 %v4846_v63, %v4568_v28  ;;  %v4902_v38 = vadd.f32 %v4846_v63, %v4572_v33  ;;  %v4906_v23 = vadd.f32 %v4846_v63, %v4576_v60  ;;  %v4910_v53 = vadd.f32 %v4846_v63, %v4580_v29  ;;  %v6053_v33 = vld [vmem:[#allocation25_spill] sm:$0xff] }
 0x2ff   : > { %6044 = vst [vmem:[#allocation13_spill] sm:$0xff] %v4890_v0  ;;  %6045 = vst [vmem:[#allocation14_spill] sm:$0xff] %v4894_v8  ;;  %v4914_v1 = vadd.f32 %v4846_v63, %v4584_v37  ;;  %v4918_v19 = vadd.f32 %v4846_v63, %v4588_v17  ;;  %v4922_v28 = vadd.f32 %v4846_v63, %v4592_v42 }
 0x300   : > { %6046 = vst [vmem:[#allocation15_spill] sm:$0xff] %v4898_v24  ;;  %6047 = vst [vmem:[#allocation16_spill] sm:$0xff] %v4902_v38  ;;  %v4926_v60 = vadd.f32 %v4846_v63, %v6053_v33 }
 0x301   : > { %6048 = vst [vmem:[#allocation17_spill] sm:$0xff] %v4906_v23  ;;  %6049 = vst [vmem:[#allocation18_spill] sm:$0xff] %v4910_v53  ;;  %v6055_v23 = vld [vmem:[#allocation26_spill] sm:$0xff]  ;;  %v6057_v53 = vld [vmem:[#allocation27_spill] sm:$0xff] }
 0x302   : > { %6050 = vst [vmem:[#allocation19_spill] sm:$0xff] %v4914_v1  ;;  %6051 = vst [vmem:[#allocation20_spill] sm:$0xff] %v4918_v19  ;;  %v4930_v29 = vadd.f32 %v4846_v63, %v6055_v23  ;;  %v4934_v37 = vadd.f32 %v4846_v63, %v6057_v53  ;;  %v6059_v1 = vld [vmem:[#allocation28_spill] sm:$0xff]  ;;  %v6061_v19 = vld [vmem:[#allocation29_spill] sm:$0xff] }
 0x303   : > { %6052 = vst [vmem:[#allocation21_spill] sm:$0xff] %v4922_v28  ;;  %6054 = vst [vmem:[#allocation22_spill] sm:$0xff] %v4926_v60  ;;  %v4938_v17 = vadd.f32 %v4846_v63, %v6059_v1  ;;  %v4942_v42 = vadd.f32 %v4846_v63, %v6061_v19  ;;  %v6063_v28 = vld [vmem:[#allocation30_spill] sm:$0xff]  ;;  %v6065_v60 = vld [vmem:[#allocation31_spill] sm:$0xff] }
 0x304   : > { %6056 = vst [vmem:[#allocation23_spill] sm:$0xff] %v4930_v29  ;;  %6058 = vst [vmem:[#allocation24_spill] sm:$0xff] %v4934_v37  ;;  %v4946_v33 = vadd.f32 %v4846_v63, %v6063_v28  ;;  %v4950_v23 = vadd.f32 %v4846_v63, %v6065_v60  ;;  %v6067_v29 = vld [vmem:[#allocation32_spill] sm:$0xff] }
 0x305   : > { %6060 = vst [vmem:[#allocation25_spill] sm:$0xff] %v4938_v17  ;;  %6062 = vst [vmem:[#allocation26_spill] sm:$0xff] %v4942_v42  ;;  %v4954_v53 = vadd.f32 %v4846_v63, %v6067_v29  ;;  %v6069_v37 = vld [vmem:[#allocation36_spill] sm:$0xff]  ;;  %v6070_v17 = vld [vmem:[#allocation33_spill] sm:$0xff] }
 0x306   : > { %6064 = vst [vmem:[#allocation27_spill] sm:$0xff] %v4946_v33  ;;  %6066 = vst [vmem:[#allocation28_spill] sm:$0xff] %v4950_v23  ;;  %v4958_v1 = vadd.f32 %v4846_v63, %v6069_v37  ;;  %v4962_v19 = vadd.f32 %v4846_v63, %v6070_v17  ;;  %v6071_v42 = vld [vmem:[#allocation34_spill] sm:$0xff]  ;;  %v6072_v33 = vld [vmem:[#allocation37_spill] sm:$0xff]  ;;  %v4982_v17 = vadd.f32 %v4846_v63, %v4652_v46 }
 0x307   : > { %6068 = vst [vmem:[#allocation29_spill] sm:$0xff] %v4954_v53  ;;  %v4966_v28 = vadd.f32 %v4846_v63, %v6071_v42  ;;  %v4970_v60 = vadd.f32 %v4846_v63, %v6072_v33  ;;  %v6073_v23 = vld [vmem:[#allocation35_spill] sm:$0xff]  ;;  %v6074_v53 = vld [vmem:[#allocation2_spill] sm:$0xff]  ;;  %v4986_v42 = vadd.f32 %v4846_v63, %v4656_v48  ;;  %v4990_v33 = vadd.f32 %v4846_v63, %v4660_v34 }
 0x308   : > { %v4974_v29 = vadd.f32 %v4846_v63, %v6073_v23  ;;  %v4978_v37 = vadd.f32 %v4846_v63, %v6074_v53  ;;  %v4994_v23 = vadd.f32 %v4846_v63, %v4664_v35  ;;  %v4998_v53 = vadd.f32 %v4846_v63, %v4668_v25 }
 0x309   : > { %v5002_v46 = vadd.f32 %v4846_v63, %v4672_v31  ;;  %v5006_v48 = vadd.f32 %v4846_v63, %v4676_v58  ;;  %v5010_v34 = vadd.f32 %v4846_v63, %v4680_v21  ;;  %v5014_v35 = vadd.f32 %v4846_v63, %v4684_v5 }
 0x30a   : > { %v5018_v25 = vadd.f32 %v4846_v63, %v4688_v20  ;;  %v5022_v31 = vadd.f32 %v4846_v63, %v4692_v26  ;;  %v5026_v58 = vadd.f32 %v4846_v63, %v4696_v41  ;;  %v5030_v21 = vadd.f32 %v4846_v63, %v4700_v61 }
 0x30b   : > { %v5034_v5 = vadd.f32 %v4846_v63, %v4704_v2  ;;  %v5038_v20 = vadd.f32 %v4846_v63, %v4708_v4  ;;  %v5042_v26 = vadd.f32 %v4846_v63, %v4712_v22  ;;  %v5046_v41 = vadd.f32 %v4846_v63, %v4716_v6  ;;  %v6126_v0 = vld [vmem:[#allocation24_spill] sm:$0xff] }
 0x30c   : > { %v5050_v61 = vadd.f32 %v4846_v63, %v4720_v36  ;;  %v5054_v2 = vadd.f32 %v4846_v63, %v4724_v32  ;;  %v5058_v4 = vadd.f32 %v4846_v63, %v4728_v55  ;;  %v5062_v22 = vadd.f32 %v4846_v63, %v4732_v57  ;;  %v6127_v8 = vld [vmem:[#allocation25_spill] sm:$0xff]  ;;  %v6128_v24 = vld [vmem:[#allocation26_spill] sm:$0xff] }
 0x30d   : > { %v5066_v6 = vadd.f32 %v4846_v63, %v4736_v39  ;;  %v5070_v36 = vadd.f32 %v4846_v63, %v4740_v9  ;;  %v5074_v32 = vadd.f32 %v4846_v63, %v4744_v10  ;;  %v5078_v55 = vadd.f32 %v4846_v63, %v4748_v18  ;;  %v6129_v38 = vld [vmem:[#allocation27_spill] sm:$0xff] }
 0x30e   : > { %6075 = vst [vmem:[#allocation30_spill] sm:$0xff] %v5058_v4  ;;  %6076 = vst [vmem:[#allocation31_spill] sm:$0xff] %v5062_v22  ;;  %v5082_v57 = vadd.f32 %v4846_v63, %v4752_v12  ;;  %v5086_v39 = vadd.f32 %v4846_v63, %v4756_v45  ;;  %v5090_v9 = vadd.f32 %v4846_v63, %v4760_v13  ;;  %v6157_v4 = vld [vmem:[#allocation15_spill] sm:$0xff] }
 0x30f   : > { %6077 = vst [vmem:[#allocation32_spill] sm:$0xff] %v5066_v6  ;;  %6078 = vst [vmem:[#allocation36_spill] sm:$0xff] %v5070_v36  ;;  %v5094_v10 = vadd.f32 %v4846_v63, %v4764_v54  ;;  %v5098_v18 = vadd.f32 %v4846_v63, %v4768_v30  ;;  %v5102_v12 = vadd.f32 %v4846_v63, %v4772_v56  ;;  %v6153_v36 = vld [vmem:[#allocation13_spill] sm:$0xff] }
 0x310   : > { %6079 = vst [vmem:[#allocation33_spill] sm:$0xff] %v5074_v32  ;;  %6080 = vst [vmem:[#allocation34_spill] sm:$0xff] %v5078_v55  ;;  %v5106_v45 = vadd.f32 %v4846_v63, %v4776_v47  ;;  %v5110_v13 = vadd.f32 %v4846_v63, %v4784_v14  ;;  %v5114_v54 = vadd.f32 %v4846_v63, %v4788_v40 }
 0x311   : > { %6081 = vst [vmem:[#allocation37_spill] sm:$0xff] %v5082_v57  ;;  %6082 = vst [vmem:[#allocation35_spill] sm:$0xff] %v5086_v39  ;;  %v5118_v30 = vadd.f32 %v4846_v63, %v4792_v52  ;;  %v5122_v56 = vadd.f32 %v4846_v63, %v4796_v43  ;;  %v6158_v39 = vmax.f32 %v6157_v4, 0.0 }
 0x312   : > { %6083 = vst [vmem:[#allocation2_spill] sm:$0xff] %v5090_v9  ;;  %6084 = vst [vmem:[#allocation38_spill] sm:$0xff] %v5094_v10  ;;  %v6159_v9 = vld [vmem:[#allocation16_spill] sm:$0xff] }
 0x313   : > { %6085 = vst [vmem:[#allocation39_spill] sm:$0xff] %v5102_v12  ;;  %6086 = vst [vmem:[#allocation40_spill] sm:$0xff] %v5106_v45  ;;  %v6091_v12 = vld [vmem:[#allocation3_spill] sm:$0xff]  ;;  %v6093_v45 = vld [vmem:[#allocation4_spill] sm:$0xff]  ;;  %v6160_v57 = vmax.f32 %v6159_v9, 0.0 }
 0x314   : > { %6087 = vst [vmem:[#allocation41_spill] sm:$0xff] %v5110_v13  ;;  %6088 = vst [vmem:[#allocation42_spill] sm:$0xff] %v5114_v54  ;;  %v5126_v47 = vadd.f32 %v4846_v63, %v6091_v12  ;;  %v5130_v14 = vadd.f32 %v4846_v63, %v6093_v45  ;;  %v6095_v13 = vld [vmem:[#allocation5_spill] sm:$0xff]  ;;  %v6097_v54 = vld [vmem:[#allocation6_spill] sm:$0xff] }
 0x315   : > { %6089 = vst [vmem:[#allocation43_spill] sm:$0xff] %v5118_v30  ;;  %6090 = vst [vmem:[#allocation44_spill] sm:$0xff] %v5122_v56  ;;  %v5134_v40 = vadd.f32 %v4846_v63, %v6095_v13  ;;  %v5138_v52 = vadd.f32 %v4846_v63, %v6097_v54  ;;  %v6099_v30 = vld [vmem:[#allocation7_spill] sm:$0xff]  ;;  %v6101_v56 = vld [vmem:[#allocation8_spill] sm:$0xff]  ;;  %v2533_v22 = vpack.c.bf16 %v6160_v57, %v6160_v57 }
 0x316   : > { %6092 = vst [vmem:[#allocation3_spill] sm:$0xff] %v5126_v47  ;;  %6094 = vst [vmem:[#allocation4_spill] sm:$0xff] %v5130_v14  ;;  %v5142_v43 = vadd.f32 %v4846_v63, %v6099_v30  ;;  %v5146_v12 = vadd.f32 %v4846_v63, %v6101_v56  ;;  %v6103_v47 = vld [vmem:[#allocation9_spill] sm:$0xff]  ;;  %v6105_v14 = vld [vmem:[#allocation10_spill] sm:$0xff]  ;;  %v5166_v56 = vadd.f32 %v4846_v63, %v4840_v15 }
 0x317   : > { %6096 = vst [vmem:[#allocation5_spill] sm:$0xff] %v5134_v40  ;;  %6098 = vst [vmem:[#allocation6_spill] sm:$0xff] %v5138_v52  ;;  %v5150_v45 = vadd.f32 %v4846_v63, %v6103_v47  ;;  %v5154_v13 = vadd.f32 %v4846_v63, %v6105_v14  ;;  %v6106_v40 = vld [vmem:[#allocation11_spill] sm:$0xff]  ;;  %v6107_v52 = vld [vmem:[#allocation12_spill] sm:$0xff]  ;;  %v5170_v47 = vadd.f32 %v4846_v63, %v4844_v27 }
 0x318   : > { %6100 = vst [vmem:[#allocation7_spill] sm:$0xff] %v5142_v43  ;;  %6102 = vst [vmem:[#allocation8_spill] sm:$0xff] %v5146_v12  ;;  %v5158_v54 = vadd.f32 %v4846_v63, %v6106_v40  ;;  %v5162_v30 = vadd.f32 %v4846_v63, %v6107_v52  ;;  %v5174_v14 = vadd.f32 %v4846_v63, %v4850_v3  ;;  %v6154_v12 = vmax.f32 %v6153_v36, 0.0  ;;  %v6163_v36 = vld [vmem:[#allocation18_spill] sm:$0xff] }
 0x319   : > { %6104 = vst [vmem:[#allocation9_spill] sm:$0xff] %v5150_v45  ;;  %6108 = vst [vmem:[#allocation10_spill] sm:$0xff] %v5170_v47  ;;  %v5178_v40 = vadd.f32 %v4846_v63, %v4854_v7  ;;  %v5182_v52 = vadd.f32 %v4846_v63, %v4858_v11  ;;  %v5186_v15 = vadd.f32 %v4846_v63, %v4862_v49  ;;  %v6155_v45 = vld [vmem:[#allocation14_spill] sm:$0xff]  ;;  %v6164_v55 = vmax.f32 %v6163_v36, 0.0 }
 0x31a   : > { %6109 = vst [vmem:[#allocation11_spill] sm:$0xff] %v5174_v14  ;;  %v5190_v27 = vadd.f32 %v4846_v63, %v4866_v59  ;;  %v5194_v3 = vadd.f32 %v4846_v63, %v4870_v16  ;;  %v5198_v7 = vadd.f32 %v4846_v63, %v4874_v51  ;;  %v5202_v11 = vadd.f32 %v4846_v63, %v4878_v62  ;;  %v6123_v14 = vld [vmem:[#allocation21_spill] sm:$0xff]  ;;  %v6132_v51 = vld [vmem:[#allocation39_spill] sm:$0xff] }
 0x31b   : > { %6110 = vst [vmem:[#allocation12_spill] sm:$0xff] %v5178_v40  ;;  %6111 = vst [vmem:[#allocation45_spill] sm:$0xff] %v5182_v52  ;;  %v5206_v49 = vadd.f32 %v4846_v63, %v4882_v44  ;;  %v5210_v59 = vadd.f32 %v4846_v63, %v4886_v50  ;;  %v6121_v52 = vld [vmem:[#allocation19_spill] sm:$0xff]  ;;  %v6122_v44 = vld [vmem:[#allocation20_spill] sm:$0xff]  ;;  %v2530_v32 = vpack.c.bf16 %v6154_v12, %v6154_v12  ;;  %v6156_v43 = vmax.f32 %v6155_v45, 0.0 }
 0x31c   : > { %6112 = vst [vmem:[#allocation46_spill] sm:$0xff] %v5186_v15  ;;  %6113 = vst [vmem:[#allocation47_spill] sm:$0xff] %v5190_v27  ;;  %v6124_v63 = vld [vmem:[#allocation22_spill] sm:$0xff]  ;;  %v6131_v62 = vld [vmem:[#allocation29_spill] sm:$0xff]  ;;  %v2532_v50 = vpack.c.bf16 %v6158_v39, %v6158_v39  ;;  %v2535_v12 = vpack.c.bf16 %v6164_v55, %v6164_v55  ;;  %v6165_v45 = vmax.f32 %v6121_v52, 0.0  ;;  %v6166_v39 = vmax.f32 %v6122_v44, 0.0 }
 0x31d   : > { %6114 = vst [vmem:[#allocation48_spill] sm:$0xff] %v5194_v3  ;;  %6115 = vst [vmem:[#allocation49_spill] sm:$0xff] %v5198_v7  ;;  %v6130_v7 = vld [vmem:[#allocation28_spill] sm:$0xff]  ;;  %v6135_v40 = vld [vmem:[#allocation42_spill] sm:$0xff]  ;;  %v2531_v10 = vpack.c.bf16 %v6156_v43, %v6156_v43  ;;  %v6167_v57 = vmax.f32 %v6123_v14, 0.0  ;;  %v6170_v36 = vmax.f32 %v6126_v0, 0.0 }
 0x31e   : > { %6116 = vst [vmem:[#allocation50_spill] sm:$0xff] %v5202_v11  ;;  %6117 = vst [vmem:[#allocation51_spill] sm:$0xff] %v5206_v49  ;;  %v6133_v15 = vld [vmem:[#allocation40_spill] sm:$0xff]  ;;  %v6134_v11 = vld [vmem:[#allocation41_spill] sm:$0xff]  ;;  %v2536_v4 = vpack.c.bf16 %v6165_v45, %v6165_v45  ;;  %v2537_v9 = vpack.c.bf16 %v6166_v39, %v6166_v39  ;;  %v6171_v14 = vmax.f32 %v6127_v8, 0.0  ;;  %v6172_v0 = vmax.f32 %v6128_v24, 0.0 }
 0x31f   : > { %6118 = vst [vmem:[#allocation52_spill] sm:$0xff] %v5210_v59  ;;  %v6125_v59 = vld [vmem:[#allocation23_spill] sm:$0xff]  ;;  %v6137_v47 = vld [vmem:[#allocation44_spill] sm:$0xff]  ;;  %v6161_v3 = vld [vmem:[#allocation17_spill] sm:$0xff]  ;;  %v2538_v43 = vpack.c.bf16 %v6167_v57, %v6167_v57  ;;  %v2541_v44 = vpack.c.bf16 %v6170_v36, %v6170_v36  ;;  %v6175_v8 = vmax.f32 %v6131_v62, 0.0  ;;  %v6181_v39 = vmax.f32 %v4978_v37, 0.0 }
 0x320   : > { %v6136_v49 = vld [vmem:[#allocation43_spill] sm:$0xff]  ;;  %v6142_v27 = vld [vmem:[#allocation10_spill] sm:$0xff]  ;;  %v6162_v16 = vmax.f32 %v6161_v3, 0.0  ;;  %v6168_v3 = vmax.f32 %v6124_v63, 0.0  ;;  %v6169_v55 = vmax.f32 %v6125_v59, 0.0  ;;  %v2542_v59 = vpack.c.bf16 %v6171_v14, %v6171_v14 }
 0x321   : > { %2210 = vst.msk [vmem:[%s5294_s14] sm:$0xf] %vm2209_vm2, %v2530_v32  ;;  %2211 = vst.msk [vmem:[%s5294_s14 + $0x4] sm:$0xf] %vm2209_vm2, %v2531_v10  ;;  %v2543_v63 = vpack.c.bf16 %v6172_v0, %v6172_v0  ;;  %v6173_v32 = vmax.f32 %v6129_v38, 0.0  ;;  %v6174_v10 = vmax.f32 %v6130_v7, 0.0  ;;  %v2546_v24 = vpack.c.bf16 %v6175_v8, %v6175_v8 }
 0x322   : > { %v2534_v6 = vpack.c.bf16 %v6162_v16, %v6162_v16  ;;  %v2539_v16 = vpack.c.bf16 %v6168_v3, %v6168_v3  ;;  %v2540_v52 = vpack.c.bf16 %v6169_v55, %v6169_v55  ;;  %2212 = vst.msk [vmem:[%s5294_s14 + $0x8] sm:$0xf] %vm2209_vm2, %v2532_v50  ;;  %2213 = vst.msk [vmem:[%s5294_s14 + $0xc] sm:$0xf] %vm2209_vm2, %v2533_v22  ;;  %v6176_v38 = vmax.f32 %v4958_v1, 0.0 }
 0x323   : > { %v2544_v45 = vpack.c.bf16 %v6173_v32, %v6173_v32  ;;  %v2545_v50 = vpack.c.bf16 %v6174_v10, %v6174_v10  ;;  %2215 = vst.msk [vmem:[%s5294_s14 + $0x14] sm:$0xf] %vm2209_vm2, %v2535_v12  ;;  %2216 = vst.msk [vmem:[%s5294_s14 + $0x18] sm:$0xf] %vm2209_vm2, %v2536_v4  ;;  %v6178_v12 = vmax.f32 %v4966_v28, 0.0  ;;  %v6179_v1 = vmax.f32 %v4970_v60, 0.0 }
 0x324   : > { %2214 = vst.msk [vmem:[%s5294_s14 + $0x10] sm:$0xf] %vm2209_vm2, %v2534_v6  ;;  %2217 = vst.msk [vmem:[%s5294_s14 + $0x1c] sm:$0xf] %vm2209_vm2, %v2537_v9  ;;  %v2547_v22 = vpack.c.bf16 %v6176_v38, %v6176_v38  ;;  %v6177_v6 = vmax.f32 %v4962_v19, 0.0  ;;  %v6180_v28 = vmax.f32 %v4974_v29, 0.0  ;;  %v2552_v9 = vpack.c.bf16 %v6181_v39, %v6181_v39 }
 0x325   : > { %v2549_v4 = vpack.c.bf16 %v6178_v12, %v6178_v12  ;;  %2218 = vst.msk [vmem:[%s5294_s14 + $0x20] sm:$0xf] %vm2209_vm2, %v2538_v43  ;;  %2219 = vst.msk [vmem:[%s5294_s14 + $0x24] sm:$0xf] %vm2209_vm2, %v2539_v16  ;;  %v2550_v19 = vpack.c.bf16 %v6179_v1, %v6179_v1  ;;  %v6182_v57 = vmax.f32 %v4982_v17, 0.0  ;;  %v6183_v60 = vmax.f32 %v4986_v42, 0.0 }
 0x326   : > { %v2548_v7 = vpack.c.bf16 %v6177_v6, %v6177_v6  ;;  %2220 = vst.msk [vmem:[%s5294_s14 + $0x28] sm:$0xf] %vm2209_vm2, %v2540_v52  ;;  %2221 = vst.msk [vmem:[%s5294_s14 + $0x2c] sm:$0xf] %vm2209_vm2, %v2541_v44  ;;  %v2551_v62 = vpack.c.bf16 %v6180_v28, %v6180_v28  ;;  %v6184_v37 = vmax.f32 %v4990_v33, 0.0  ;;  %v6185_v3 = vmax.f32 %v4994_v23, 0.0 }
 0x327   : > { %v2553_v43 = vpack.c.bf16 %v6182_v57, %v6182_v57  ;;  %2222 = vst.msk [vmem:[%s5294_s14 + $0x30] sm:$0xf] %vm2209_vm2, %v2542_v59  ;;  %2223 = vst.msk [vmem:[%s5294_s14 + $0x34] sm:$0xf] %vm2209_vm2, %v2543_v63  ;;  %v2554_v29 = vpack.c.bf16 %v6183_v60, %v6183_v60  ;;  %v6186_v55 = vmax.f32 %v4998_v53, 0.0  ;;  %v6187_v42 = vmax.f32 %v5002_v46, 0.0 }
 0x328   : > { %2224 = vst.msk [vmem:[%s5294_s14 + $0x38] sm:$0xf] %vm2209_vm2, %v2544_v45  ;;  %2225 = vst.msk [vmem:[%s5294_s14 + $0x3c] sm:$0xf] %vm2209_vm2, %v2545_v50  ;;  %v2555_v17 = vpack.c.bf16 %v6184_v37, %v6184_v37  ;;  %v2556_v16 = vpack.c.bf16 %v6185_v3, %v6185_v3  ;;  %v6188_v23 = vmax.f32 %v5006_v48, 0.0  ;;  %v6189_v36 = vmax.f32 %v5010_v34, 0.0 }
 0x329   : > { %v2557_v52 = vpack.c.bf16 %v6186_v55, %v6186_v55  ;;  %2226 = vst.msk [vmem:[%s5294_s14 + $0x40] sm:$0xf] %vm2209_vm2, %v2546_v24  ;;  %2227 = vst.msk [vmem:[%s5294_s14 + $0x44] sm:$0xf] %vm2209_vm2, %v2547_v22  ;;  %v2558_v33 = vpack.c.bf16 %v6187_v42, %v6187_v42  ;;  %v6190_v14 = vmax.f32 %v5014_v35, 0.0  ;;  %v6191_v46 = vmax.f32 %v5018_v25, 0.0 }
 0x32a   : > { %2228 = vst.msk [vmem:[%s5294_s14 + $0x48] sm:$0xf] %vm2209_vm2, %v2548_v7  ;;  %2229 = vst.msk [vmem:[%s5294_s14 + $0x4c] sm:$0xf] %vm2209_vm2, %v2549_v4  ;;  %v2559_v53 = vpack.c.bf16 %v6188_v23, %v6188_v23  ;;  %v2560_v44 = vpack.c.bf16 %v6189_v36, %v6189_v36  ;;  %v6192_v34 = vmax.f32 %v5022_v31, 0.0  ;;  %v6193_v0 = vmax.f32 %v5026_v58, 0.0 }
 0x32b   : > { %v2561_v59 = vpack.c.bf16 %v6190_v14, %v6190_v14  ;;  %2230 = vst.msk [vmem:[%s5294_s14 + $0x50] sm:$0xf] %vm2209_vm2, %v2550_v19  ;;  %2231 = vst.msk [vmem:[%s5294_s14 + $0x54] sm:$0xf] %vm2209_vm2, %v2551_v62  ;;  %v2562_v48 = vpack.c.bf16 %v6191_v46, %v6191_v46  ;;  %v6194_v32 = vmax.f32 %v5030_v21, 0.0  ;;  %v6195_v25 = vmax.f32 %v5034_v5, 0.0 }
 0x32c   : > { %2232 = vst.msk [vmem:[%s5294_s14 + $0x58] sm:$0xf] %vm2209_vm2, %v2552_v9  ;;  %2233 = vst.msk [vmem:[%s5294_s14 + $0x5c] sm:$0xf] %vm2209_vm2, %v2553_v43  ;;  %v2563_v35 = vpack.c.bf16 %v6192_v34, %v6192_v34  ;;  %v2564_v63 = vpack.c.bf16 %v6193_v0, %v6193_v0  ;;  %v6196_v58 = vmax.f32 %v5038_v20, 0.0  ;;  %v6197_v10 = vmax.f32 %v5042_v26, 0.0 }
 0x32d   : > { %v2565_v45 = vpack.c.bf16 %v6194_v32, %v6194_v32  ;;  %2234 = vst.msk [vmem:[%s5294_s14 + $0x60] sm:$0xf] %vm2209_vm2, %v2554_v29  ;;  %2235 = vst.msk [vmem:[%s5294_s14 + $0x64] sm:$0xf] %vm2209_vm2, %v2555_v17  ;;  %v2566_v31 = vpack.c.bf16 %v6195_v25, %v6195_v25  ;;  %v6198_v8 = vmax.f32 %v5046_v41, 0.0  ;;  %v6199_v5 = vmax.f32 %v5050_v61, 0.0 }
 0x32e   : > { %2236 = vst.msk [vmem:[%s5294_s14 + $0x68] sm:$0xf] %vm2209_vm2, %v2556_v16  ;;  %2237 = vst.msk [vmem:[%s5294_s14 + $0x6c] sm:$0xf] %vm2209_vm2, %v2557_v52  ;;  %v2567_v21 = vpack.c.bf16 %v6196_v58, %v6196_v58  ;;  %v2568_v50 = vpack.c.bf16 %v6197_v10, %v6197_v10  ;;  %v6200_v26 = vmax.f32 %v5054_v2, 0.0  ;;  %v6201_v38 = vld [vmem:[#allocation30_spill] sm:$0xff] }
 0x32f   : > { %v2569_v24 = vpack.c.bf16 %v6198_v8, %v6198_v8  ;;  %2238 = vst.msk [vmem:[%s5294_s14 + $0x70] sm:$0xf] %vm2209_vm2, %v2558_v33  ;;  %2239 = vst.msk [vmem:[%s5294_s14 + $0x74] sm:$0xf] %vm2209_vm2, %v2559_v53  ;;  %v2570_v20 = vpack.c.bf16 %v6199_v5, %v6199_v5  ;;  %v6202_v22 = vmax.f32 %v6201_v38, 0.0  ;;  %v6203_v7 = vld [vmem:[#allocation31_spill] sm:$0xff] }
 0x330   : > { %2240 = vst.msk [vmem:[%s5294_s14 + $0x78] sm:$0xf] %vm2209_vm2, %v2560_v44  ;;  %2241 = vst.msk [vmem:[%s5294_s14 + $0x7c] sm:$0xf] %vm2209_vm2, %v2561_v59  ;;  %v2571_v41 = vpack.c.bf16 %v6200_v26, %v6200_v26  ;;  %v6204_v12 = vmax.f32 %v6203_v7, 0.0  ;;  %v6205_v61 = vld [vmem:[#allocation32_spill] sm:$0xff] }
 0x331   : > { %v2572_v6 = vpack.c.bf16 %v6202_v22, %v6202_v22  ;;  %2242 = vst.msk [vmem:[%s5294_s14 + $0x80] sm:$0xf] %vm2209_vm2, %v2562_v48  ;;  %2243 = vst.msk [vmem:[%s5294_s14 + $0x84] sm:$0xf] %vm2209_vm2, %v2563_v35  ;;  %v6206_v2 = vmax.f32 %v6205_v61, 0.0  ;;  %v6207_v19 = vld [vmem:[#allocation36_spill] sm:$0xff] }
 0x332   : > { %v2573_v4 = vpack.c.bf16 %v6204_v12, %v6204_v12  ;;  %2244 = vst.msk [vmem:[%s5294_s14 + $0x88] sm:$0xf] %vm2209_vm2, %v2564_v63  ;;  %2245 = vst.msk [vmem:[%s5294_s14 + $0x8c] sm:$0xf] %vm2209_vm2, %v2565_v45  ;;  %v6208_v28 = vmax.f32 %v6207_v19, 0.0  ;;  %v6209_v39 = vld [vmem:[#allocation33_spill] sm:$0xff] }
 0x333   : > { %v2574_v1 = vpack.c.bf16 %v6206_v2, %v6206_v2  ;;  %v6210_v9 = vmax.f32 %v6209_v39, 0.0  ;;  %v6211_v43 = vld [vmem:[#allocation34_spill] sm:$0xff]  ;;  %2246 = vst.msk [vmem:[%s5294_s14 + $0x90] sm:$0xf] %vm2209_vm2, %v2566_v31  ;;  %2247 = vst.msk [vmem:[%s5294_s14 + $0x94] sm:$0xf] %vm2209_vm2, %v2567_v21 }
 0x334   : > { %v2575_v62 = vpack.c.bf16 %v6208_v28, %v6208_v28  ;;  %v6212_v60 = vmax.f32 %v6211_v43, 0.0  ;;  %2248 = vst.msk [vmem:[%s5294_s14 + $0x98] sm:$0xf] %vm2209_vm2, %v2568_v50  ;;  %2249 = vst.msk [vmem:[%s5294_s14 + $0x9c] sm:$0xf] %vm2209_vm2, %v2569_v24  ;;  %v6213_v37 = vld [vmem:[#allocation37_spill] sm:$0xff] }
 0x335   : > { %v2576_v57 = vpack.c.bf16 %v6210_v9, %v6210_v9  ;;  %v6214_v17 = vmax.f32 %v6213_v37, 0.0  ;;  %v6215_v16 = vld [vmem:[#allocation35_spill] sm:$0xff]  ;;  %v6217_v42 = vld [vmem:[#allocation2_spill] sm:$0xff]  ;;  %2250 = vst.msk [vmem:[%s5294_s14 + $0xa0] sm:$0xf] %vm2209_vm2, %v2570_v20  ;;  %v6221_v14 = vmax.f32 %v5098_v18, 0.0 }
 0x336   : > { %v2577_v29 = vpack.c.bf16 %v6212_v60, %v6212_v60  ;;  %v6216_v55 = vmax.f32 %v6215_v16, 0.0  ;;  %v6218_v33 = vmax.f32 %v6217_v42, 0.0  ;;  %v6219_v53 = vld [vmem:[#allocation38_spill] sm:$0xff]  ;;  %2251 = vst.msk [vmem:[%s5294_s14 + $0xa4] sm:$0xf] %vm2209_vm2, %v2571_v41  ;;  %v6222_v46 = vmax.f32 %v6132_v51, 0.0 }
 0x337   : > { %v2578_v3 = vpack.c.bf16 %v6214_v17, %v6214_v17  ;;  %v6220_v36 = vmax.f32 %v6219_v53, 0.0  ;;  %2252 = vst.msk [vmem:[%s5294_s14 + $0xa8] sm:$0xf] %vm2209_vm2, %v2572_v6  ;;  %2253 = vst.msk [vmem:[%s5294_s14 + $0xac] sm:$0xf] %vm2209_vm2, %v2573_v4  ;;  %v2582_v59 = vpack.c.bf16 %v6221_v14, %v6221_v14  ;;  %v6223_v34 = vmax.f32 %v6133_v15, 0.0 }
 0x338   : > { %v2579_v52 = vpack.c.bf16 %v6216_v55, %v6216_v55  ;;  %v2580_v23 = vpack.c.bf16 %v6218_v33, %v6218_v33  ;;  %v2583_v48 = vpack.c.bf16 %v6222_v46, %v6222_v46  ;;  %v6224_v0 = vmax.f32 %v6134_v11, 0.0  ;;  %2254 = vst.msk [vmem:[%s5294_s14 + $0xb0] sm:$0xf] %vm2209_vm2, %v2574_v1  ;;  %2255 = vst.msk [vmem:[%s5294_s14 + $0xb4] sm:$0xf] %vm2209_vm2, %v2575_v62  ;;  %v6228_v25 = vld [vmem:[#allocation3_spill] sm:$0xff] }
 0x339   : > { %v2581_v44 = vpack.c.bf16 %v6220_v36, %v6220_v36  ;;  %v2584_v35 = vpack.c.bf16 %v6223_v34, %v6223_v34  ;;  %2256 = vst.msk [vmem:[%s5294_s14 + $0xb8] sm:$0xf] %vm2209_vm2, %v2576_v57  ;;  %2257 = vst.msk [vmem:[%s5294_s14 + $0xbc] sm:$0xf] %vm2209_vm2, %v2577_v29  ;;  %v6225_v18 = vmax.f32 %v6135_v40, 0.0  ;;  %v6226_v11 = vmax.f32 %v6136_v49, 0.0 }
 0x33a   : > { %v2585_v63 = vpack.c.bf16 %v6224_v0, %v6224_v0  ;;  %v6227_v32 = vmax.f32 %v6137_v47, 0.0  ;;  %v6229_v31 = vmax.f32 %v6228_v25, 0.0  ;;  %2258 = vst.msk [vmem:[%s5294_s14 + $0xc0] sm:$0xf] %vm2209_vm2, %v2578_v3  ;;  %2259 = vst.msk [vmem:[%s5294_s14 + $0xc4] sm:$0xf] %vm2209_vm2, %v2579_v52 }
 0x33b   : > { %v2586_v15 = vpack.c.bf16 %v6225_v18, %v6225_v18  ;;  %v2587_v51 = vpack.c.bf16 %v6226_v11, %v6226_v11  ;;  %2260 = vst.msk [vmem:[%s5294_s14 + $0xc8] sm:$0xf] %vm2209_vm2, %v2580_v23  ;;  %2261 = vst.msk [vmem:[%s5294_s14 + $0xcc] sm:$0xf] %vm2209_vm2, %v2581_v44  ;;  %v6230_v40 = vld [vmem:[#allocation4_spill] sm:$0xff]  ;;  %v6232_v21 = vld [vmem:[#allocation5_spill] sm:$0xff] }
 0x33c   : > { %v2588_v45 = vpack.c.bf16 %v6227_v32, %v6227_v32  ;;  %v2589_v58 = vpack.c.bf16 %v6229_v31, %v6229_v31  ;;  %v6231_v49 = vmax.f32 %v6230_v40, 0.0  ;;  %v6233_v10 = vmax.f32 %v6232_v21, 0.0  ;;  %v6234_v8 = vld [vmem:[#allocation6_spill] sm:$0xff]  ;;  %v6236_v20 = vld [vmem:[#allocation7_spill] sm:$0xff]  ;;  %2262 = vst.msk [vmem:[%s5294_s14 + $0xd0] sm:$0xf] %vm2209_vm2, %v2582_v59 }
 0x33d   : > { %v6235_v24 = vmax.f32 %v6234_v8, 0.0  ;;  %v6237_v26 = vmax.f32 %v6236_v20, 0.0  ;;  %2263 = vst.msk [vmem:[%s5294_s14 + $0xd4] sm:$0xf] %vm2209_vm2, %v2583_v48  ;;  %2264 = vst.msk [vmem:[%s5294_s14 + $0xd8] sm:$0xf] %vm2209_vm2, %v2584_v35 }
 0x33e   : > { %v2590_v47 = vpack.c.bf16 %v6231_v49, %v6231_v49  ;;  %v2591_v50 = vpack.c.bf16 %v6233_v10, %v6233_v10  ;;  %2265 = vst.msk [vmem:[%s5294_s14 + $0xdc] sm:$0xf] %vm2209_vm2, %v2585_v63  ;;  %v6238_v38 = vld [vmem:[#allocation8_spill] sm:$0xff]  ;;  %v6240_v7 = vld [vmem:[#allocation9_spill] sm:$0xff]  ;;  %v6242_v61 = vmax.f32 %v5154_v13, 0.0  ;;  %v6243_v1 = vmax.f32 %v5158_v54, 0.0 }
 0x33f   : > { %v2592_v5 = vpack.c.bf16 %v6235_v24, %v6235_v24  ;;  %v2593_v41 = vpack.c.bf16 %v6237_v26, %v6237_v26  ;;  %v6239_v22 = vmax.f32 %v6238_v38, 0.0  ;;  %v6241_v12 = vmax.f32 %v6240_v7, 0.0  ;;  %2266 = vst.msk [vmem:[%s5294_s14 + $0xe0] sm:$0xf] %vm2209_vm2, %v2586_v15  ;;  %2267 = vst.msk [vmem:[%s5294_s14 + $0xe4] sm:$0xf] %vm2209_vm2, %v2587_v51 }
 0x340   : > { %v2596_v2 = vpack.c.bf16 %v6242_v61, %v6242_v61  ;;  %v2597_v19 = vpack.c.bf16 %v6243_v1, %v6243_v1  ;;  %2268 = vst.msk [vmem:[%s5294_s14 + $0xe8] sm:$0xf] %vm2209_vm2, %v2588_v45  ;;  %2269 = vst.msk [vmem:[%s5294_s14 + $0xec] sm:$0xf] %vm2209_vm2, %v2589_v58  ;;  %v6244_v28 = vmax.f32 %v5162_v30, 0.0  ;;  %v6245_v54 = vmax.f32 %v5166_v56, 0.0 }
 0x341   : > { %v2594_v6 = vpack.c.bf16 %v6239_v22, %v6239_v22  ;;  %v2595_v4 = vpack.c.bf16 %v6241_v12, %v6241_v12  ;;  %v6246_v39 = vmax.f32 %v6142_v27, 0.0  ;;  %v6247_v57 = vld [vmem:[#allocation11_spill] sm:$0xff]  ;;  %2270 = vst.msk [vmem:[%s5294_s14 + $0xf0] sm:$0xf] %vm2209_vm2, %v2590_v47  ;;  %2271 = vst.msk [vmem:[%s5294_s14 + $0xf4] sm:$0xf] %vm2209_vm2, %v2591_v50 }
 0x342   : > { %v2598_v13 = vpack.c.bf16 %v6244_v28, %v6244_v28  ;;  %v2599_v62 = vpack.c.bf16 %v6245_v54, %v6245_v54  ;;  %v6248_v43 = vmax.f32 %v6247_v57, 0.0  ;;  %2272 = vst.msk [vmem:[%s5294_s14 + $0xf8] sm:$0xf] %vm2209_vm2, %v2592_v5  ;;  %2273 = vst.msk [vmem:[%s5294_s14 + $0xfc] sm:$0xf] %vm2209_vm2, %v2593_v41  ;;  %v6249_v30 = vld [vmem:[#allocation12_spill] sm:$0xff] }
 0x343   : > { %v2600_v9 = vpack.c.bf16 %v6246_v39, %v6246_v39  ;;  %v6250_v56 = vmax.f32 %v6249_v30, 0.0  ;;  %v6251_v29 = vld [vmem:[#allocation45_spill] sm:$0xff]  ;;  %v6253_v3 = vld [vmem:[#allocation46_spill] sm:$0xff]  ;;  %v6255_v52 = vld [vmem:[#allocation47_spill] sm:$0xff]  ;;  %2274 = vst.msk [vmem:[%s5294_s14 + $0x100] sm:$0xf] %vm2209_vm2, %v2594_v6 }
 0x344   : > { %v2601_v60 = vpack.c.bf16 %v6248_v43, %v6248_v43  ;;  %v6252_v37 = vmax.f32 %v6251_v29, 0.0  ;;  %v6254_v16 = vmax.f32 %v6253_v3, 0.0  ;;  %v6256_v42 = vmax.f32 %v6255_v52, 0.0  ;;  %2275 = vst.msk [vmem:[%s5294_s14 + $0x104] sm:$0xf] %vm2209_vm2, %v2595_v4  ;;  %v6257_v23 = vld [vmem:[#allocation48_spill] sm:$0xff] }
 0x345   : > { %v2602_v27 = vpack.c.bf16 %v6250_v56, %v6250_v56  ;;  %2276 = vst.msk [vmem:[%s5294_s14 + $0x108] sm:$0xf] %vm2209_vm2, %v2596_v2  ;;  %2277 = vst.msk [vmem:[%s5294_s14 + $0x10c] sm:$0xf] %vm2209_vm2, %v2597_v19  ;;  %v6258_v53 = vmax.f32 %v6257_v23, 0.0  ;;  %v6259_v44 = vld [vmem:[#allocation49_spill] sm:$0xff] }
 0x346   : > { %v2603_v17 = vpack.c.bf16 %v6252_v37, %v6252_v37  ;;  %v2604_v55 = vpack.c.bf16 %v6254_v16, %v6254_v16  ;;  %v2605_v33 = vpack.c.bf16 %v6256_v42, %v6256_v42  ;;  %v6260_v14 = vmax.f32 %v6259_v44, 0.0  ;;  %v6261_v46 = vld [vmem:[#allocation50_spill] sm:$0xff]  ;;  %v6263_v35 = vld [vmem:[#allocation51_spill] sm:$0xff]  ;;  %2278 = vst.msk [vmem:[%s5294_s14 + $0x110] sm:$0xf] %vm2209_vm2, %v2598_v13  ;;  %v6265_v18 = vld [vmem:[#allocation52_spill] sm:$0xff] }
 0x347   : > { %v2606_v36 = vpack.c.bf16 %v6258_v53, %v6258_v53  ;;  %v6262_v48 = vmax.f32 %v6261_v46, 0.0  ;;  %v6264_v0 = vmax.f32 %v6263_v35, 0.0  ;;  %2279 = vst.msk [vmem:[%s5294_s14 + $0x114] sm:$0xf] %vm2209_vm2, %v2599_v62  ;;  %2280 = vst.msk [vmem:[%s5294_s14 + $0x118] sm:$0xf] %vm2209_vm2, %v2600_v9 }
 0x348   : > { %v2607_v59 = vpack.c.bf16 %v6260_v14, %v6260_v14  ;;  %2281 = vst.msk [vmem:[%s5294_s14 + $0x11c] sm:$0xf] %vm2209_vm2, %v2601_v60  ;;  %v6266_v15 = vmax.f32 %v6265_v18, 0.0  ;;  %2282 = vst.msk [vmem:[%s5294_s14 + $0x120] sm:$0xf] %vm2209_vm2, %v2602_v27 }
 0x349   : > { %v2608_v34 = vpack.c.bf16 %v6262_v48, %v6262_v48  ;;  %v2609_v63 = vpack.c.bf16 %v6264_v0, %v6264_v0  ;;  %2283 = vst.msk [vmem:[%s5294_s14 + $0x124] sm:$0xf] %vm2209_vm2, %v2603_v17  ;;  %2284 = vst.msk [vmem:[%s5294_s14 + $0x128] sm:$0xf] %vm2209_vm2, %v2604_v55 }
 0x34a   : > { %v2610_v11 = vpack.c.bf16 %v6266_v15, %v6266_v15  ;;  %2285 = vst.msk [vmem:[%s5294_s14 + $0x12c] sm:$0xf] %vm2209_vm2, %v2605_v33  ;;  %2286 = vst.msk [vmem:[%s5294_s14 + $0x130] sm:$0xf] %vm2209_vm2, %v2606_v36 }
 0x34b   : > { %2287 = vst.msk [vmem:[%s5294_s14 + $0x134] sm:$0xf] %vm2209_vm2, %v2607_v59  ;;  %2288 = vst.msk [vmem:[%s5294_s14 + $0x138] sm:$0xf] %vm2209_vm2, %v2608_v34 }
 0x34c   : > { %2289 = vst.msk [vmem:[%s5294_s14 + $0x13c] sm:$0xf] %vm2209_vm2, %v2609_v63  ;;  %2290 = vst.msk [vmem:[%s5294_s14 + $0x140] sm:$0xf] %vm2209_vm2, %v2610_v11 }
 0x34d PF: > { %s15_s18 = sadd.s32 1, %s2924_s18  }
 0x34e   : > { %p12_p4 = scmp.ge.s32.totalorder %s15_s18, 6  }
 0x350   :  { %14 = sbr.rel (!%p12_p4) target bundleno = 1 (0x1), region = 82 }

// kernel: central_forward.7
= control target key start
LH: loop header
LB: loop body
LE: loop exit
PB: predicated region body
PF: predicated region fallthrough
CT: control target
= control target key end

     0   :  { %s1444_s18 = smov 0   ;;  %s1703_s0 = inlined_call_operand.vmem [shape: bf16[4,98,400], index: 0, kind: input, shape index: {}]   ;;  %s1704_s1 = inlined_call_operand.vmem [shape: bf16[4,400,32], index: 1, kind: input, shape index: {}]   ;;  %s1705_s2 = inlined_call_operand.vmem [shape: f32[4,1,32], index: 2, kind: input, shape index: {}]   ;;  %s1706_s3 = inlined_call_operand.vmem [shape: f32[4,1,32], index: 3, kind: input, shape index: {}]   ;;  %s1707_s4 = inlined_call_operand.vmem [shape: f32[4,1,32], index: 4, kind: input, shape index: {}]   ;;  %s1708_s5 = inlined_call_operand.vmem [shape: bf16[4,98,32], index: 5, kind: output, shape index: {}]  }
   0x1 LB: > { %s1169_s19 = sadd.s32 4294967295, %s1411_s18   ;;  %p1173_p0 = scmp.ge.s32.totalorder %s1411_s18, 1  ;;  %s1411_s18 = sphi %s1444_s18, %s15_s18  }
   0x2   : > { %p221_p1 = scmp.lt.s32.totalorder %s1411_s18, 5 }
   0x4   : > { %p222_p2 = pnand %p1173_p0, %p221_p1 }
   0x5   : > { %p263_p3 = scmp.lt.s32.totalorder (!%p222_p2), %s1169_s19, 3  ;;  %v1413_v0 = vmov (!%p222_p2), 0   ;;  %vm648_vm0 = vcmask (!%p222_p2), 130048   ;;  %vm846_vm1 = vcmask (!%p222_p2), 261120   ;;  %vm870_vm2 = vcmask (!%p222_p2), 254976  }
   0x6   : > { %225 = sbr.rel (%p222_p2) target bundleno = 415 (0x19f), region = 40  ;;  %758 = vmatprep.subr.bf16.mxu1 (!%p222_p2), %v1413_v0  ;;  %vm1060_vm3 = vcmask (!%p222_p2), 257024   ;;  %vm1073_vm4 = vcmask (!%p222_p2), 253952  }
   0xd   : > { %s1710_s19 = smov (!%p263_p3, %s1169_s19), 3 }
   0xe   : > { %s1327_s20 = smul.u32 200, %s1710_s19  ;;  %s275_s30 = scalar_lea.vmem %s1705_s2, %s1710_s19 }
   0xf   : > { %s1326_s24 = smul.u32 208, %s1710_s19  ;;  %v1537_v58 = vld [vmem:[%s275_s30] ss:$0 sm:$0xff]  ;;  %s278_s8 = scalar_lea.vmem %s1706_s3, %s1710_s19 }
  0x10   : > { %s1459_s23 = scalar_lea.vmem %s1704_s1, %s1327_s20  ;;  %s281_s11 = scalar_lea.vmem %s1707_s4, %s1710_s19 }
  0x11   : > { %v1338_v1 = vld [vmem:[%s1459_s23 + $0x40] sm:$0xff]   ;;  %v1341_v4 = vld [vmem:[%s1459_s23 + $0x48] sm:$0xff]   ;;  %v1344_v7 = vld [vmem:[%s1459_s23 + $0x50] sm:$0xff]   ;;  %s1490_s27 = scalar_lea.vmem %s1703_s0, %s1326_s24  ;;  %s1328_s12 = smul.u32 52, %s1710_s19 }
  0x12   : > { %v1339_v2 = vld [vmem:[%s1459_s23 + $0x80] sm:$0xff]   ;;  %1268 = vmatprep.subr.bf16.mxu0 %v1338_v1  ;;  %v1342_v5 = vld [vmem:[%s1459_s23 + $0x88] sm:$0xff]   ;;  %v1345_v8 = vld [vmem:[%s1459_s23 + $0x90] sm:$0xff]  }
  0x13   : > { %v1340_v3 = vld [vmem:[%s1459_s23] sm:$0xff]   ;;  %759 = vmatpush1.bf16.msra.mxu1 %v1339_v2  ;;  %v1343_v6 = vld [vmem:[%s1459_s23 + $0x8] sm:$0xff]   ;;  %v1346_v9 = vld [vmem:[%s1459_s23 + $0x10] sm:$0xff]   ;;  %s286_s15 = scalar_lea.vmem %s1708_s5, %s1328_s12 }
  0x14   : > { %1269 = vmatpush3.bf16.msra.mxu0 %v1340_v3  ;;  %760 = vmatprep.subr.bf16.mxu1 %v1413_v0  ;;  %v1347_v10 = vld [vmem:[%s1459_s23 + $0x58] sm:$0xff]   ;;  %v1350_v13 = vld [vmem:[%s1459_s23 + $0x60] sm:$0xff]   ;;  %v1353_v16 = vld [vmem:[%s1459_s23 + $0x68] sm:$0xff]  }
  0x15   : > { %1270 = vmatprep.subr.bf16.mxu0 %v1341_v4  ;;  %v1348_v11 = vld [vmem:[%s1459_s23 + $0x98] sm:$0xff]   ;;  %v1351_v14 = vld [vmem:[%s1459_s23 + $0xa0] sm:$0xff]   ;;  %v1354_v17 = vld [vmem:[%s1459_s23 + $0xa8] sm:$0xff]  }
  0x16   : > { %v1349_v12 = vld [vmem:[%s1459_s23 + $0x18] sm:$0xff]   ;;  %v1352_v15 = vld [vmem:[%s1459_s23 + $0x20] sm:$0xff]   ;;  %v1355_v18 = vld [vmem:[%s1459_s23 + $0x28] sm:$0xff]  }
  0x17   : > { %761 = vmatpush1.bf16.msra.mxu1 %v1342_v5  ;;  %v1356_v19 = vld [vmem:[%s1459_s23 + $0x70] sm:$0xff]   ;;  %v1359_v22 = vld [vmem:[%s1459_s23 + $0x78] sm:$0xff]   ;;  %v1365_v28 = vld [vmem:[%s1459_s23 + $0xc0] sm:$0xff]  }
  0x18   : > { %1271 = vmatpush3.bf16.msra.mxu0 %v1343_v6  ;;  %762 = vmatprep.subr.bf16.mxu1 %v1413_v0  ;;  %v1357_v20 = vld [vmem:[%s1459_s23 + $0xb0] sm:$0xff]   ;;  %v1360_v24 = vld [vmem:[%s1459_s23 + $0xb8] sm:$0xff]   ;;  %v312_v48 = vld [vmem:[%s1490_s27 + $0xc0] sm:$0x11] }
  0x19   : > { %1272 = vmatprep.subr.bf16.mxu0 %v1344_v7  ;;  %v1358_v21 = vld [vmem:[%s1459_s23 + $0x30] sm:$0xff]   ;;  %v1368_v25 = vld [vmem:[%s1490_s27 + $0xc] ss:$16 sps:$4 sm:$0xff]   ;;  %v1366_v30 = vld [vmem:[%s1490_s27 + $0x8] ss:$16 sps:$4 sm:$0xff]   ;;  %v1203_v50 = vcombine.high %v312_v48, %v312_v48  ;;  %v1202_v54 = vcombine.low %v312_v48, %v312_v48 }
  0x1a   : > { %v1364_v23 = vld [vmem:[%s1490_s27 + $0x4] ss:$16 sps:$4 sm:$0xff]   ;;  %v1361_v26 = vld [vmem:[%s1459_s23 + $0x38] sm:$0xff]   ;;  %1231 = vmatprep.mubr.msk.bf16.mxu1 %vm648_vm0, %v1368_v25  ;;  %v1362_v27 = vld [vmem:[%s1490_s27] ss:$16 sps:$4 sm:$0xff]  }
  0x1b   : > { %763 = vmatpush1.bf16.msra.mxu1 %v1345_v8  ;;  %702 = vmatprep.mubr.bf16.mxu0 %v1364_v23  ;;  %v1369_v29 = vld [vmem:[%s1490_s27 + $0x24] ss:$16 sps:$4 sm:$0xff]   ;;  %v1372_v31 = vld [vmem:[%s1490_s27 + $0x2c] ss:$16 sps:$4 sm:$0xff]   ;;  %v1371_v32 = vld [vmem:[%s1490_s27 + $0x20] ss:$16 sps:$4 sm:$0xff]  }
  0x1c   : > { %1273 = vmatpush3.bf16.msra.mxu0 %v1346_v9  ;;  %764 = vmatprep.subr.bf16.mxu1 %v1413_v0  ;;  %v1375_v33 = vld [vmem:[%s1490_s27 + $0x44] ss:$16 sps:$4 sm:$0xff]   ;;  %v1374_v34 = vld [vmem:[%s1490_s27 + $0x28] ss:$16 sps:$4 sm:$0xff]   ;;  %v1378_v35 = vld [vmem:[%s1490_s27 + $0x4c] ss:$16 sps:$4 sm:$0xff]  }
  0x1d   : > { %1274 = vmatprep.subr.bf16.mxu0 %v1347_v10  ;;  %v1377_v36 = vld [vmem:[%s1490_s27 + $0x40] ss:$16 sps:$4 sm:$0xff]   ;;  %v1381_v37 = vld [vmem:[%s1490_s27 + $0x64] ss:$16 sps:$4 sm:$0xff]   ;;  %v1380_v38 = vld [vmem:[%s1490_s27 + $0x48] ss:$16 sps:$4 sm:$0xff]  }
  0x1e   : > { %v1384_v39 = vld [vmem:[%s1490_s27 + $0x6c] ss:$16 sps:$4 sm:$0xff]   ;;  %v1383_v40 = vld [vmem:[%s1490_s27 + $0x60] ss:$16 sps:$4 sm:$0xff]   ;;  %v1387_v41 = vld [vmem:[%s1490_s27 + $0x84] ss:$16 sps:$4 sm:$0xff]  }
  0x1f   : > { %765 = vmatpush1.bf16.msra.mxu1 %v1348_v11  ;;  %v1386_v42 = vld [vmem:[%s1490_s27 + $0x68] ss:$16 sps:$4 sm:$0xff]   ;;  %v1390_v43 = vld [vmem:[%s1490_s27 + $0x8c] ss:$16 sps:$4 sm:$0xff]   ;;  %v1389_v44 = vld [vmem:[%s1490_s27 + $0x80] ss:$16 sps:$4 sm:$0xff]  }
  0x20   : > { %1275 = vmatpush3.bf16.msra.mxu0 %v1349_v12  ;;  %766 = vmatprep.subr.bf16.mxu1 %v1413_v0  ;;  %v1393_v45 = vld [vmem:[%s1490_s27 + $0xa4] ss:$16 sps:$4 sm:$0xff]   ;;  %v1392_v46 = vld [vmem:[%s1490_s27 + $0x88] ss:$16 sps:$4 sm:$0xff]   ;;  %v1396_v47 = vld [vmem:[%s1490_s27 + $0xac] ss:$16 sps:$4 sm:$0xff]  }
  0x21   : > { %1276 = vmatprep.subr.bf16.mxu0 %v1350_v13  ;;  %v1395_v49 = vld [vmem:[%s1490_s27 + $0xa0] ss:$16 sps:$4 sm:$0xff]   ;;  %v313_v51 = vld [vmem:[%s1490_s27 + $0xc8] sm:$0x11] }
  0x22   : > { %v1398_v52 = vld [vmem:[%s1490_s27 + $0xa8] ss:$16 sps:$4 sm:$0xff]   ;;  %v1205_v53 = vcombine.high %v313_v51, %v313_v51  ;;  %v1204_v55 = vcombine.low %v313_v51, %v313_v51 }
  0x23   : > { %767 = vmatpush1.bf16.msra.mxu1 %v1351_v14 }
  0x24   : > { %1277 = vmatpush3.bf16.msra.mxu0 %v1352_v15  ;;  %768 = vmatprep.subr.bf16.mxu1 %v1413_v0 }
  0x25   : > { %1278 = vmatprep.subr.bf16.mxu0 %v1353_v16 }
  0x27   : > { %769 = vmatpush1.bf16.msra.mxu1 %v1354_v17 }
  0x28   : > { %1279 = vmatpush3.bf16.msra.mxu0 %v1355_v18  ;;  %770 = vmatprep.subr.bf16.mxu1 %v1413_v0 }
  0x29   : > { %1280 = vmatprep.subr.bf16.mxu0 %v1356_v19 }
  0x2b   : > { %771 = vmatpush1.bf16.msra.mxu1 %v1357_v20 }
  0x2c   : > { %1281 = vmatpush3.bf16.msra.mxu0 %v1358_v21  ;;  %772 = vmatprep.subr.bf16.mxu1 %v1413_v0 }
  0x2d   : > { %1282 = vmatprep.subr.bf16.mxu0 %v1359_v22 }
  0x2f   : > { %773 = vmatpush1.bf16.msra.mxu1 %v1360_v24 }
  0x30   : > { %1283 = vmatpush3.bf16.msra.mxu0 %v1361_v26  ;;  %774 = vmatprep.subr.bf16.mxu1 %v1413_v0 }
  0x33   : > { %703 = vmatmul.mubr.bf16.vlgmr.msra.gmra.mrb[0].mxu0 %v1362_v27  ;;  %775 = vmatpush1.bf16.msra.mxu1 %v1365_v28 }
  0x34   : > { %710 = vmatprep.mubr.bf16.mxu0 %v1369_v29 }
  0x36   : > { %791 = vmatmul.mubr.bf16.vlgmr.msra.gmra.mrb[0].mxu1 %v1366_v30 }
  0x37   : > { %1232 = vmatprep.mubr.msk.bf16.mxu1 %vm648_vm0, %v1372_v31 }
  0x3b   : > { %711 = vmatmul.mubr.bf16.gmra.mrb[4].mxu0 %v1371_v32 }
  0x3c   : > { %718 = vmatprep.mubr.bf16.mxu0 %v1375_v33 }
  0x3e   : > { %799 = vmatmul.mubr.bf16.gmra.mrb[4].mxu1 %v1374_v34 }
  0x3f   : > { %1233 = vmatprep.mubr.msk.bf16.mxu1 %vm648_vm0, %v1378_v35 }
  0x43   : > { %719 = vmatmul.mubr.bf16.gmra.mrb[8].mxu0 %v1377_v36 }
  0x44   : > { %726 = vmatprep.mubr.bf16.mxu0 %v1381_v37 }
  0x46   : > { %807 = vmatmul.mubr.bf16.gmra.mrb[8].mxu1 %v1380_v38 }
  0x47   : > { %1234 = vmatprep.mubr.msk.bf16.mxu1 %vm648_vm0, %v1384_v39 }
  0x4b   : > { %727 = vmatmul.mubr.bf16.gmra.mrb[12].mxu0 %v1383_v40 }
  0x4c   : > { %734 = vmatprep.mubr.bf16.mxu0 %v1387_v41 }
  0x4e   : > { %815 = vmatmul.mubr.bf16.gmra.mrb[12].mxu1 %v1386_v42 }
  0x4f   : > { %1235 = vmatprep.mubr.msk.bf16.mxu1 %vm648_vm0, %v1390_v43 }
  0x53   : > { %735 = vmatmul.mubr.bf16.gmra.mrb[16].mxu0 %v1389_v44 }
  0x54   : > { %742 = vmatprep.mubr.bf16.mxu0 %v1393_v45 }
  0x56   : > { %823 = vmatmul.mubr.bf16.gmra.mrb[16].mxu1 %v1392_v46 }
  0x57   : > { %1236 = vmatprep.mubr.msk.bf16.mxu1 %vm648_vm0, %v1396_v47 }
  0x5b   : > { %743 = vmatmul.mubr.bf16.gmra.mrb[20].mxu0 %v1395_v49 }
  0x5c   : > { %750 = vmatprep.mubr.bf16.mxu0 %v1203_v50 }
  0x5e   : > { %831 = vmatmul.mubr.bf16.gmra.mrb[20].mxu1 %v1398_v52 }
  0x5f   : > { %1237 = vmatprep.mubr.msk.bf16.mxu1 %vm648_vm0, %v1205_v53 }
  0x63   : > { %751 = vmatmul.mubr.bf16.gmra.mrb[24].mxu0 %v1202_v54 }
  0x66   : > { %839 = vmatmul.mubr.bf16.gmra.mrb[24].mxu1 %v1204_v55 }
 0x106   : > { %v1284_v56 = vpop.f32.mrb[0].mxu0 }
 0x107   : > { %v1285_v57 = vpop.f32.mrb[1].mxu0 }
 0x108   : > { %v1286_v59 = vadd.f32 %v1285_v57, %v1284_v56  ;;  %v1287_v60 = vpop.f32.mrb[2].mxu0 }
 0x109   : > { %v1288_v61 = vpop.f32.mrb[3].mxu0  ;;  %v792_v62 = vpop.f32.mrb[0].mxu1 }
 0x10a   : > { %v1289_v63 = vadd.f32 %v1288_v61, %v1287_v60  ;;  %v705_v0 = vadd.f32 %v1286_v59, %v1537_v58  ;;  %v794_v1 = vpop.f32.mrb[1].mxu1 }
 0x10b   : > { %v795_v2 = vpop.f32.mrb[2].mxu1 }
 0x10c   : > { %v1540_v3 = vadd.f32 %v792_v62, %v705_v0  ;;  %v708_v4 = vadd.f32 %v1289_v63, %v1537_v58  ;;  %v797_v5 = vpop.f32.mrb[3].mxu1 }
 0x10e   : > { %v1543_v6 = vadd.f32 %v795_v2, %v708_v4  ;;  %v1290_v7 = vpop.f32.mrb[4].mxu0  ;;  %v847_v9 = vsel %vm846_vm1, %v1540_v3, 0.0 }
 0x10f   : > { %v1291_v8 = vpop.f32.mrb[5].mxu0 }
 0x110   : > { %v848_v10 = vsel %vm846_vm1, %v1543_v6, 0.0  ;;  %v1292_v11 = vadd.f32 %v1291_v8, %v1290_v7  ;;  %v1293_v12 = vpop.f32.mrb[6].mxu0 }
 0x111   : > { %v849_v13 = vadd.f32 %v848_v10, %v847_v9  ;;  %v1294_v14 = vpop.f32.mrb[7].mxu0  ;;  %v800_v15 = vpop.f32.mrb[4].mxu1 }
 0x112   : > { %v1295_v16 = vadd.f32 %v1294_v14, %v1293_v12  ;;  %v713_v17 = vadd.f32 %v1292_v11, %v1537_v58  ;;  %v802_v18 = vpop.f32.mrb[5].mxu1 }
 0x113   : > { %v803_v19 = vpop.f32.mrb[6].mxu1 }
 0x114   : > { %v1550_v20 = vadd.f32 %v800_v15, %v713_v17  ;;  %v716_v21 = vadd.f32 %v1295_v16, %v1537_v58  ;;  %v805_v22 = vpop.f32.mrb[7].mxu1 }
 0x116   : > { %v850_v23 = vsel %vm846_vm1, %v1550_v20, 0.0  ;;  %v1555_v24 = vadd.f32 %v803_v19, %v716_v21  ;;  %v1296_v25 = vpop.f32.mrb[8].mxu0 }
 0x117   : > { %v851_v26 = vadd.f32 %v850_v23, %v849_v13  ;;  %v1297_v27 = vpop.f32.mrb[9].mxu0 }
 0x118   : > { %v852_v28 = vsel %vm846_vm1, %v1555_v24, 0.0  ;;  %v1298_v29 = vadd.f32 %v1297_v27, %v1296_v25  ;;  %v1299_v30 = vpop.f32.mrb[10].mxu0 }
 0x119   : > { %v853_v31 = vadd.f32 %v852_v28, %v851_v26  ;;  %v1300_v32 = vpop.f32.mrb[11].mxu0  ;;  %v808_v33 = vpop.f32.mrb[8].mxu1 }
 0x11a   : > { %v1301_v34 = vadd.f32 %v1300_v32, %v1299_v30  ;;  %v721_v35 = vadd.f32 %v1298_v29, %v1537_v58  ;;  %v810_v36 = vpop.f32.mrb[9].mxu1 }
 0x11b   : > { %v811_v37 = vpop.f32.mrb[10].mxu1 }
 0x11c   : > { %v1560_v38 = vadd.f32 %v808_v33, %v721_v35  ;;  %v724_v39 = vadd.f32 %v1301_v34, %v1537_v58  ;;  %v813_v40 = vpop.f32.mrb[11].mxu1 }
 0x11e   : > { %v854_v41 = vsel %vm846_vm1, %v1560_v38, 0.0  ;;  %v1565_v42 = vadd.f32 %v811_v37, %v724_v39  ;;  %v1302_v43 = vpop.f32.mrb[12].mxu0 }
 0x11f   : > { %v855_v44 = vadd.f32 %v854_v41, %v853_v31  ;;  %v1303_v45 = vpop.f32.mrb[13].mxu0 }
 0x120   : > { %v856_v46 = vsel %vm846_vm1, %v1565_v42, 0.0  ;;  %v1304_v47 = vadd.f32 %v1303_v45, %v1302_v43  ;;  %v1305_v48 = vpop.f32.mrb[14].mxu0 }
 0x121   : > { %v857_v49 = vadd.f32 %v856_v46, %v855_v44  ;;  %v1306_v50 = vpop.f32.mrb[15].mxu0  ;;  %v816_v51 = vpop.f32.mrb[12].mxu1 }
 0x122   : > { %v1307_v52 = vadd.f32 %v1306_v50, %v1305_v48  ;;  %v729_v53 = vadd.f32 %v1304_v47, %v1537_v58  ;;  %v818_v54 = vpop.f32.mrb[13].mxu1 }
 0x123   : > { %v819_v55 = vpop.f32.mrb[14].mxu1 }
 0x124   : > { %v1570_v56 = vadd.f32 %v816_v51, %v729_v53  ;;  %v732_v57 = vadd.f32 %v1307_v52, %v1537_v58  ;;  %v821_v59 = vpop.f32.mrb[15].mxu1 }
 0x126   : > { %v858_v60 = vsel %vm846_vm1, %v1570_v56, 0.0  ;;  %v1575_v61 = vadd.f32 %v819_v55, %v732_v57  ;;  %v1308_v62 = vpop.f32.mrb[16].mxu0 }
 0x127   : > { %v859_v63 = vadd.f32 %v858_v60, %v857_v49  ;;  %v1309_v0 = vpop.f32.mrb[17].mxu0 }
 0x128   : > { %v860_v1 = vsel %vm846_vm1, %v1575_v61, 0.0  ;;  %v1310_v2 = vadd.f32 %v1309_v0, %v1308_v62  ;;  %v1311_v4 = vpop.f32.mrb[18].mxu0 }
 0x129   : > { %v861_v5 = vadd.f32 %v860_v1, %v859_v63  ;;  %v1312_v7 = vpop.f32.mrb[19].mxu0  ;;  %v824_v8 = vpop.f32.mrb[16].mxu1 }
 0x12a   : > { %v1313_v9 = vadd.f32 %v1312_v7, %v1311_v4  ;;  %v737_v10 = vadd.f32 %v1310_v2, %v1537_v58  ;;  %v826_v11 = vpop.f32.mrb[17].mxu1 }
 0x12b   : > { %v827_v12 = vpop.f32.mrb[18].mxu1 }
 0x12c   : > { %v825_v13 = vadd.f32 %v824_v8, %v737_v10  ;;  %v740_v14 = vadd.f32 %v1313_v9, %v1537_v58  ;;  %v829_v15 = vpop.f32.mrb[19].mxu1 }
 0x12e   : > { %v862_v16 = vsel %vm846_vm1, %v825_v13, 0.0  ;;  %v828_v17 = vadd.f32 %v827_v12, %v740_v14  ;;  %v1314_v18 = vpop.f32.mrb[20].mxu0 }
 0x12f   : > { %v863_v19 = vadd.f32 %v862_v16, %v861_v5  ;;  %v1315_v21 = vpop.f32.mrb[21].mxu0 }
 0x130   : > { %v864_v22 = vsel %vm846_vm1, %v828_v17, 0.0  ;;  %v1316_v23 = vadd.f32 %v1315_v21, %v1314_v18  ;;  %v1317_v25 = vpop.f32.mrb[22].mxu0 }
 0x131   : > { %v865_v26 = vadd.f32 %v864_v22, %v863_v19  ;;  %v1318_v27 = vpop.f32.mrb[23].mxu0  ;;  %v832_v28 = vpop.f32.mrb[20].mxu1 }
 0x132   : > { %v1319_v29 = vadd.f32 %v1318_v27, %v1317_v25  ;;  %v745_v30 = vadd.f32 %v1316_v23, %v1537_v58  ;;  %v834_v31 = vpop.f32.mrb[21].mxu1 }
 0x133   : > { %v835_v32 = vpop.f32.mrb[22].mxu1 }
 0x134   : > { %v833_v33 = vadd.f32 %v832_v28, %v745_v30  ;;  %v748_v34 = vadd.f32 %v1319_v29, %v1537_v58  ;;  %v837_v35 = vpop.f32.mrb[23].mxu1 }
 0x136   : > { %v866_v36 = vsel %vm846_vm1, %v833_v33, 0.0  ;;  %v836_v37 = vadd.f32 %v835_v32, %v748_v34  ;;  %v1320_v39 = vpop.f32.mrb[24].mxu0 }
 0x137   : > { %v867_v40 = vadd.f32 %v866_v36, %v865_v26  ;;  %v1321_v41 = vpop.f32.mrb[25].mxu0 }
 0x138   : > { %v868_v43 = vsel %vm846_vm1, %v836_v37, 0.0  ;;  %v1322_v44 = vadd.f32 %v1321_v41, %v1320_v39  ;;  %v1323_v45 = vpop.f32.mrb[26].mxu0 }
 0x139   : > { %v869_v46 = vadd.f32 %v868_v43, %v867_v40  ;;  %v1324_v47 = vpop.f32.mrb[27].mxu0  ;;  %v840_v48 = vpop.f32.mrb[24].mxu1 }
 0x13a   : > { %v753_v49 = vadd.f32 %v1322_v44, %v1537_v58  ;;  %v842_v50 = vpop.f32.mrb[25].mxu1 }
 0x13b   : > { %v843_v51 = vpop.f32.mrb[26].mxu1 }
 0x13c   : > { %v841_v52 = vadd.f32 %v840_v48, %v753_v49  ;;  %v844_v53 = vpop.f32.mrb[27].mxu1 }
 0x13e   : > { %v871_v54 = vsel %vm870_vm2, %v841_v52, 0.0 }
 0x13f   : > { %v872_v55 = vadd.f32 %v871_v54, %v869_v46 }
 0x141   : > { %v873_v57 = vrot.slane %v872_v55, 4 }
 0x143   : > { %v874_v59 = vadd.f32 %v873_v57, %v872_v55 }
 0x145   : > { %v875_v60 = vrot.slane %v874_v59, 2 }
 0x147   : > { %v876_v62 = vadd.f32 %v875_v60, %v874_v59 }
 0x149   : > { %v877_v63 = vrot.slane %v876_v62, 1 }
 0x14b   : > { %v878_v0 = vadd.f32 %v877_v63, %v876_v62 }
 0x14d   : > { %v880_v1 = vmul.f32 0.010204081, %v878_v0 }
 0x14f   : > { %v1590_v2 = vsub.f32 %v1540_v3, %v880_v1  ;;  %v1593_v58 = vsub.f32 %v1543_v6, %v880_v1  ;;  %v1596_v4 = vsub.f32 %v1550_v20, %v880_v1  ;;  %v1599_v5 = vsub.f32 %v1555_v24, %v880_v1 }
 0x150   : > { %v1602_v7 = vsub.f32 %v1560_v38, %v880_v1  ;;  %v1605_v8 = vsub.f32 %v1565_v42, %v880_v1  ;;  %v1608_v9 = vsub.f32 %v1570_v56, %v880_v1  ;;  %v1611_v3 = vsub.f32 %v1575_v61, %v880_v1 }
 0x151   : > { %v1613_v6 = vsub.f32 %v825_v13, %v880_v1  ;;  %v1615_v10 = vsub.f32 %v828_v17, %v880_v1  ;;  %v1617_v20 = vsub.f32 %v833_v33, %v880_v1  ;;  %v1619_v24 = vsub.f32 %v836_v37, %v880_v1 }
 0x152   : > { %v1621_v11 = vsub.f32 %v841_v52, %v880_v1  ;;  %v894_v38 = vmul.f32 %v1590_v2, %v1590_v2  ;;  %v895_v42 = vmul.f32 %v1593_v58, %v1593_v58  ;;  %v896_v56 = vmul.f32 %v1596_v4, %v1596_v4 }
 0x153   : > { %v897_v61 = vmul.f32 %v1599_v5, %v1599_v5  ;;  %v898_v15 = vmul.f32 %v1602_v7, %v1602_v7  ;;  %v899_v18 = vmul.f32 %v1605_v8, %v1605_v8  ;;  %v900_v22 = vmul.f32 %v1608_v9, %v1608_v9 }
 0x154   : > { %v907_v12 = vsel %vm846_vm1, %v894_v38, 0.0  ;;  %v908_v13 = vsel %vm846_vm1, %v895_v42, 0.0  ;;  %v910_v16 = vsel %vm846_vm1, %v896_v56, 0.0  ;;  %v901_v26 = vmul.f32 %v1611_v3, %v1611_v3  ;;  %v1238_v38 = vld [vmem:[%s278_s8] ss:$0 sm:$0xff] }
 0x155   : > { %v909_v14 = vadd.f32 %v908_v13, %v907_v12  ;;  %v912_v19 = vsel %vm846_vm1, %v897_v61, 0.0  ;;  %v914_v23 = vsel %vm846_vm1, %v898_v15, 0.0  ;;  %v916_v27 = vsel %vm846_vm1, %v899_v18, 0.0 }
 0x156   : > { %v902_v29 = vmul.f32 %v1613_v6, %v1613_v6  ;;  %v918_v30 = vsel %vm846_vm1, %v900_v22, 0.0  ;;  %v903_v32 = vmul.f32 %v1615_v10, %v1615_v10  ;;  %v920_v33 = vsel %vm846_vm1, %v901_v26, 0.0 }
 0x157   : > { %v911_v17 = vadd.f32 %v910_v16, %v909_v14  ;;  %v904_v35 = vmul.f32 %v1617_v20, %v1617_v20  ;;  %v905_v39 = vmul.f32 %v1619_v24, %v1619_v24  ;;  %v906_v43 = vmul.f32 %v1621_v11, %v1621_v11 }
 0x158   : > { %v922_v36 = vsel %vm846_vm1, %v902_v29, 0.0  ;;  %v924_v40 = vsel %vm846_vm1, %v903_v32, 0.0 }
 0x159   : > { %v913_v21 = vadd.f32 %v912_v19, %v911_v17  ;;  %v926_v44 = vsel %vm846_vm1, %v904_v35, 0.0  ;;  %v928_v46 = vsel %vm846_vm1, %v905_v39, 0.0  ;;  %v930_v48 = vsel %vm870_vm2, %v906_v43, 0.0 }
 0x15b   : > { %v915_v25 = vadd.f32 %v914_v23, %v913_v21 }
 0x15d   : > { %v917_v28 = vadd.f32 %v916_v27, %v915_v25 }
 0x15f   : > { %v919_v31 = vadd.f32 %v918_v30, %v917_v28 }
 0x161   : > { %v921_v34 = vadd.f32 %v920_v33, %v919_v31 }
 0x163   : > { %v923_v37 = vadd.f32 %v922_v36, %v921_v34 }
 0x165   : > { %v925_v41 = vadd.f32 %v924_v40, %v923_v37 }
 0x167   : > { %v927_v45 = vadd.f32 %v926_v44, %v925_v41 }
 0x169   : > { %v929_v47 = vadd.f32 %v928_v46, %v927_v45 }
 0x16b   : > { %v931_v49 = vadd.f32 %v930_v48, %v929_v47 }
 0x16d   : > { %v932_v50 = vrot.slane %v931_v49, 4 }
 0x16f   : > { %v933_v51 = vadd.f32 %v932_v50, %v931_v49 }
 0x171   : > { %v934_v52 = vrot.slane %v933_v51, 2 }
 0x173   : > { %v935_v53 = vadd.f32 %v934_v52, %v933_v51 }
 0x175   : > { %v936_v54 = vrot.slane %v935_v53, 1 }
 0x177   : > { %v937_v55 = vadd.f32 %v936_v54, %v935_v53 }
 0x179   : > { %v938_v57 = vmul.f32 0.010204081, %v937_v55 }
 0x17b   : > { %v939_v59 = vadd.f32 1e-05, %v938_v57 }
 0x17d   : > { %1403 = vrsqrt.f32 %v939_v59 }
 0x187   : > { %v1404_v60 = vpop.eup %1403 }
 0x188   : > { %v941_v62 = vmul.f32 %v1404_v60, %v1590_v2  ;;  %v942_v63 = vmul.f32 %v1404_v60, %v1593_v58  ;;  %v943_v0 = vmul.f32 %v1404_v60, %v1596_v4  ;;  %v944_v1 = vmul.f32 %v1404_v60, %v1599_v5 }
 0x189   : > { %v945_v42 = vmul.f32 %v1404_v60, %v1602_v7  ;;  %v946_v56 = vmul.f32 %v1404_v60, %v1605_v8  ;;  %v947_v61 = vmul.f32 %v1404_v60, %v1608_v9  ;;  %v948_v12 = vmul.f32 %v1404_v60, %v1611_v3  ;;  %v1239_v7 = vld [vmem:[%s281_s11] ss:$0 sm:$0xff] }
 0x18a   : > { %v949_v13 = vmul.f32 %v1404_v60, %v1613_v6  ;;  %v950_v14 = vmul.f32 %v1404_v60, %v1615_v10  ;;  %v951_v2 = vmul.f32 %v1404_v60, %v1617_v20  ;;  %v952_v58 = vmul.f32 %v1404_v60, %v1619_v24 }
 0x18b   : > { %v953_v4 = vmul.f32 %v1404_v60, %v1621_v11  ;;  %v961_v5 = vmul.f32 %v1238_v38, %v941_v62  ;;  %v962_v15 = vmul.f32 %v1238_v38, %v942_v63  ;;  %v963_v16 = vmul.f32 %v1238_v38, %v943_v0 }
 0x18c   : > { %v964_v17 = vmul.f32 %v1238_v38, %v944_v1  ;;  %v965_v8 = vmul.f32 %v1238_v38, %v945_v42  ;;  %v966_v18 = vmul.f32 %v1238_v38, %v946_v56  ;;  %v967_v9 = vmul.f32 %v1238_v38, %v947_v61 }
 0x18d   : > { %v968_v3 = vmul.f32 %v1238_v38, %v948_v12  ;;  %v969_v6 = vmul.f32 %v1238_v38, %v949_v13  ;;  %v970_v19 = vmul.f32 %v1238_v38, %v950_v14  ;;  %v971_v10 = vmul.f32 %v1238_v38, %v951_v2 }
 0x18e   : > { %v972_v21 = vmul.f32 %v1238_v38, %v952_v58  ;;  %v973_v20 = vmul.f32 %v1238_v38, %v953_v4  ;;  %v981_v22 = vadd.f32 %v1239_v7, %v961_v5  ;;  %v982_v24 = vadd.f32 %v1239_v7, %v962_v15 }
 0x18f   : > { %v983_v23 = vadd.f32 %v1239_v7, %v963_v16  ;;  %v984_v11 = vadd.f32 %v1239_v7, %v964_v17  ;;  %v985_v25 = vadd.f32 %v1239_v7, %v965_v8  ;;  %v986_v26 = vadd.f32 %v1239_v7, %v966_v18 }
 0x190   : > { %v987_v27 = vadd.f32 %v1239_v7, %v967_v9  ;;  %v988_v28 = vadd.f32 %v1239_v7, %v968_v3  ;;  %v989_v29 = vadd.f32 %v1239_v7, %v969_v6  ;;  %v990_v30 = vadd.f32 %v1239_v7, %v970_v19 }
 0x191   : > { %v991_v31 = vadd.f32 %v1239_v7, %v971_v10  ;;  %v992_v32 = vadd.f32 %v1239_v7, %v972_v21  ;;  %v993_v33 = vadd.f32 %v1239_v7, %v973_v20  ;;  %v994_v34 = vmax.f32 %v981_v22, 0.0 }
 0x192   : > { %v995_v35 = vmax.f32 %v982_v24, 0.0  ;;  %v996_v36 = vmax.f32 %v983_v23, 0.0  ;;  %v997_v37 = vmax.f32 %v984_v11, 0.0  ;;  %v998_v39 = vmax.f32 %v985_v25, 0.0 }
 0x193   : > { %v999_v40 = vmax.f32 %v986_v26, 0.0  ;;  %v1000_v41 = vmax.f32 %v987_v27, 0.0  ;;  %v1001_v43 = vmax.f32 %v988_v28, 0.0  ;;  %v1002_v44 = vmax.f32 %v989_v29, 0.0 }
 0x194   : > { %v1003_v45 = vmax.f32 %v990_v30, 0.0  ;;  %v1004_v46 = vmax.f32 %v991_v31, 0.0  ;;  %v1005_v47 = vmax.f32 %v992_v32, 0.0  ;;  %v1006_v48 = vmax.f32 %v993_v33, 0.0 }
 0x195   : > { %v1255_v49 = vpack.c.bf16 %v994_v34, %v994_v34  ;;  %v1256_v50 = vpack.c.bf16 %v995_v35, %v995_v35  ;;  %v1257_v51 = vpack.c.bf16 %v996_v36, %v996_v36  ;;  %v1258_v52 = vpack.c.bf16 %v997_v37, %v997_v37 }
 0x196   : > { %v1259_v53 = vpack.c.bf16 %v998_v39, %v998_v39  ;;  %v1260_v54 = vpack.c.bf16 %v999_v40, %v999_v40  ;;  %v1261_v55 = vpack.c.bf16 %v1000_v41, %v1000_v41  ;;  %v1262_v57 = vpack.c.bf16 %v1001_v43, %v1001_v43 }
 0x197   : > { %v1263_v59 = vpack.c.bf16 %v1002_v44, %v1002_v44  ;;  %v1264_v60 = vpack.c.bf16 %v1003_v45, %v1003_v45  ;;  %v1265_v62 = vpack.c.bf16 %v1004_v46, %v1004_v46  ;;  %v1266_v63 = vpack.c.bf16 %v1005_v47, %v1005_v47  ;;  %1061 = vst.msk [vmem:[%s286_s15] sm:$0xf] %vm1060_vm3, %v1255_v49 }
 0x198   : > { %1062 = vst.msk [vmem:[%s286_s15 + $0x4] sm:$0xf] %vm1060_vm3, %v1256_v50  ;;  %1063 = vst.msk [vmem:[%s286_s15 + $0x8] sm:$0xf] %vm1060_vm3, %v1257_v51  ;;  %v1267_v0 = vpack.c.bf16 %v1006_v48, %v1006_v48 }
 0x199   : > { %1064 = vst.msk [vmem:[%s286_s15 + $0xc] sm:$0xf] %vm1060_vm3, %v1258_v52  ;;  %1065 = vst.msk [vmem:[%s286_s15 + $0x10] sm:$0xf] %vm1060_vm3, %v1259_v53 }
 0x19a   : > { %1066 = vst.msk [vmem:[%s286_s15 + $0x14] sm:$0xf] %vm1060_vm3, %v1260_v54  ;;  %1067 = vst.msk [vmem:[%s286_s15 + $0x18] sm:$0xf] %vm1060_vm3, %v1261_v55 }
 0x19b   : > { %1068 = vst.msk [vmem:[%s286_s15 + $0x1c] sm:$0xf] %vm1060_vm3, %v1262_v57  ;;  %1069 = vst.msk [vmem:[%s286_s15 + $0x20] sm:$0xf] %vm1060_vm3, %v1263_v59 }
 0x19c   : > { %1070 = vst.msk [vmem:[%s286_s15 + $0x24] sm:$0xf] %vm1060_vm3, %v1264_v60  ;;  %1071 = vst.msk [vmem:[%s286_s15 + $0x28] sm:$0xf] %vm1060_vm3, %v1265_v62 }
 0x19d   : > { %1072 = vst.msk [vmem:[%s286_s15 + $0x2c] sm:$0xf] %vm1060_vm3, %v1266_v63 }
 0x19e   : > { %1074 = vst.msk [vmem:[%s286_s15 + $0x30] sm:$0x1] %vm1073_vm4, %v1267_v0 }
 0x19f PF: > { %s15_s18 = sadd.s32 1, %s1411_s18  }
 0x1a0   : > { %p12_p4 = scmp.ge.s32.totalorder %s15_s18, 6  }
 0x1a2   :  { %14 = sbr.rel (!%p12_p4) target bundleno = 1 (0x1), region = 82 }

// kernel: central_forward.8
= control target key start
LH: loop header
LB: loop body
LE: loop exit
PB: predicated region body
PF: predicated region fallthrough
CT: control target
= control target key end

     0   :  { %s1278_s18 = smov 0   ;;  %s1376_s0 = inlined_call_operand.vmem [shape: bf16[4,8,800], index: 0, kind: input, shape index: {}]   ;;  %s1377_s1 = inlined_call_operand.vmem [shape: bf16[4,800,32], index: 1, kind: input, shape index: {}]   ;;  %s1378_s2 = inlined_call_operand.vmem [shape: f32[4,1,32], index: 2, kind: input, shape index: {}]   ;;  %s1379_s3 = inlined_call_operand.vmem [shape: f32[4,1,32], index: 3, kind: input, shape index: {}]   ;;  %s1380_s4 = inlined_call_operand.vmem [shape: f32[4,1,32], index: 4, kind: input, shape index: {}]   ;;  %s1381_s5 = inlined_call_operand.vmem [shape: bf16[4,8,32], index: 5, kind: output, shape index: {}]  }
   0x1 LB: > { %s1019_s19 = sadd.s32 4294967295, %s1244_s18   ;;  %p1023_p0 = scmp.ge.s32.totalorder %s1244_s18, 1  ;;  %s1244_s18 = sphi %s1278_s18, %s15_s18  }
   0x2   : > { %p221_p1 = scmp.lt.s32.totalorder %s1244_s18, 5 }
   0x4   : > { %p222_p2 = pnand %p1023_p0, %p221_p1 }
   0x5   : > { %p262_p3 = scmp.lt.s32.totalorder (!%p222_p2), %s1019_s19, 3  ;;  %v1246_v41 = vmov (!%p222_p2), 0.0   ;;  %vm1247_vm0 = vmmov (!%p222_p2), 0   ;;  %vm721_vm1 = vcmask (!%p222_p2), 261120   ;;  %vm925_vm2 = vcmask (!%p222_p2), 257024  }
   0x6   : > { %225 = sbr.rel (%p222_p2) target bundleno = 359 (0x167), region = 40 }
   0xd   : > { %s1383_s19 = smov (!%p262_p3, %s1019_s19), 3 }
   0xe   : > { %s1168_s20 = smul.u32 400, %s1383_s19  ;;  %s274_s30 = scalar_lea.vmem %s1378_s2, %s1383_s19 }
   0xf   : > { %s1167_s24 = smul.u32 28, %s1383_s19  ;;  %v1027_v62 = vld [vmem:[%s274_s30] ss:$0 sm:$0xff]  ;;  %s277_s8 = scalar_lea.vmem %s1379_s3, %s1383_s19 }
  0x10   : > { %s1292_s23 = scalar_lea.vmem %s1377_s1, %s1168_s20  ;;  %s280_s11 = scalar_lea.vmem %s1380_s4, %s1383_s19 }
  0x11   : > { %v1179_v0 = vld [vmem:[%s1292_s23 + $0x40] sm:$0xff]   ;;  %v1183_v4 = vld [vmem:[%s1292_s23 + $0x48] sm:$0xff]   ;;  %v1187_v8 = vld [vmem:[%s1292_s23 + $0x50] sm:$0xff]   ;;  %s1327_s27 = scalar_lea.vmem %s1376_s0, %s1167_s24  ;;  %s1026_s12 = sshll.u32 %s1383_s19, 2 }
  0x12   : > { %v1180_v1 = vld [vmem:[%s1292_s23] sm:$0xff]   ;;  %1090 = vmatprep.subr.bf16.mxu0 %v1179_v0  ;;  %v1184_v5 = vld [vmem:[%s1292_s23 + $0x8] sm:$0xff]   ;;  %v1188_v9 = vld [vmem:[%s1292_s23 + $0x10] sm:$0xff]   ;;  %s284_s15 = scalar_lea.vmem %s1381_s5, %s1026_s12 }
  0x13   : > { %v1181_v2 = vld [vmem:[%s1292_s23 + $0xc0] sm:$0xff]   ;;  %1091 = vmatpush3.bf16.msra.mxu0 %v1180_v1  ;;  %v1185_v6 = vld [vmem:[%s1292_s23 + $0xc8] sm:$0xff]   ;;  %v1189_v10 = vld [vmem:[%s1292_s23 + $0xd0] sm:$0xff]  }
  0x14   : > { %v1182_v3 = vld [vmem:[%s1292_s23 + $0x80] sm:$0xff]   ;;  %1112 = vmatprep.subr.bf16.mxu1 %v1181_v2  ;;  %1092 = vmatprep.subr.bf16.mxu0 %v1183_v4  ;;  %v1186_v7 = vld [vmem:[%s1292_s23 + $0x88] sm:$0xff]   ;;  %v1190_v11 = vld [vmem:[%s1292_s23 + $0x90] sm:$0xff]  }
  0x15   : > { %1113 = vmatpush3.bf16.msra.mxu1 %v1182_v3  ;;  %v1191_v12 = vld [vmem:[%s1292_s23 + $0x58] sm:$0xff]   ;;  %v1195_v16 = vld [vmem:[%s1292_s23 + $0x60] sm:$0xff]   ;;  %v1199_v20 = vld [vmem:[%s1292_s23 + $0x68] sm:$0xff]  }
  0x16   : > { %1114 = vmatprep.subr.bf16.mxu1 %v1185_v6  ;;  %v1192_v13 = vld [vmem:[%s1292_s23 + $0x18] sm:$0xff]   ;;  %v1196_v17 = vld [vmem:[%s1292_s23 + $0x20] sm:$0xff]   ;;  %v1200_v21 = vld [vmem:[%s1292_s23 + $0x28] sm:$0xff]  }
  0x17   : > { %1093 = vmatpush3.bf16.msra.mxu0 %v1184_v5  ;;  %v1193_v14 = vld [vmem:[%s1292_s23 + $0xd8] sm:$0xff]   ;;  %v1197_v18 = vld [vmem:[%s1292_s23 + $0xe0] sm:$0xff]   ;;  %v1201_v22 = vld [vmem:[%s1292_s23 + $0xe8] sm:$0xff]  }
  0x18   : > { %1094 = vmatprep.subr.bf16.mxu0 %v1187_v8  ;;  %v1194_v15 = vld [vmem:[%s1292_s23 + $0x98] sm:$0xff]   ;;  %v1198_v19 = vld [vmem:[%s1292_s23 + $0xa0] sm:$0xff]   ;;  %v1202_v23 = vld [vmem:[%s1292_s23 + $0xa8] sm:$0xff]  }
  0x19   : > { %1115 = vmatpush3.bf16.msra.mxu1 %v1186_v7  ;;  %v1203_v24 = vld [vmem:[%s1292_s23 + $0x70] sm:$0xff]   ;;  %v1207_v28 = vld [vmem:[%s1292_s23 + $0x78] sm:$0xff]   ;;  %v286_v31 = vld [vmem:[%s1327_s27] sm:$0xff] }
  0x1a   : > { %1116 = vmatprep.subr.bf16.mxu1 %v1189_v10  ;;  %v1204_v25 = vld [vmem:[%s1292_s23 + $0x30] sm:$0xff]   ;;  %v1208_v29 = vld [vmem:[%s1292_s23 + $0x38] sm:$0xff]   ;;  %v1028_v32 = vcombine.low %v286_v31, %v286_v31  ;;  %v1029_v33 = vcombine.high %v286_v31, %v286_v31  ;;  %v1214_v35 = vld [vmem:[%s1292_s23 + $0x140] sm:$0xff]  }
  0x1b   : > { %1095 = vmatpush3.bf16.msra.mxu0 %v1188_v9  ;;  %v1205_v26 = vld [vmem:[%s1292_s23 + $0xf0] sm:$0xff]   ;;  %v1209_v30 = vld [vmem:[%s1292_s23 + $0xf8] sm:$0xff]   ;;  %v287_v36 = vld [vmem:[%s1327_s27 + $0x8] sm:$0xff] }
  0x1c   : > { %1096 = vmatprep.subr.bf16.mxu0 %v1191_v12  ;;  %v1206_v27 = vld [vmem:[%s1292_s23 + $0xb0] sm:$0xff]   ;;  %v1213_v34 = vld [vmem:[%s1292_s23 + $0xb8] sm:$0xff]   ;;  %757 = vmatprep.mubr.bf16.mxu0 %v1029_v33  ;;  %v1030_v37 = vcombine.low %v287_v36, %v287_v36  ;;  %v1031_v38 = vcombine.high %v287_v36, %v287_v36  ;;  %v1217_v39 = vld [vmem:[%s1292_s23 + $0x100] sm:$0xff]  }
  0x1d   : > { %1117 = vmatpush3.bf16.msra.mxu1 %v1190_v11  ;;  %v1218_v40 = vld [vmem:[%s1292_s23 + $0x148] sm:$0xff]   ;;  %v1220_v43 = vld [vmem:[%s1292_s23 + $0x150] sm:$0xff]   ;;  %v1222_v45 = vld [vmem:[%s1292_s23 + $0x158] sm:$0xff]  }
  0x1e   : > { %1118 = vmatprep.subr.bf16.mxu1 %v1193_v14  ;;  %797 = vmatprep.mubr.bf16.mxu1 %v1031_v38  ;;  %v1219_v42 = vld [vmem:[%s1292_s23 + $0x108] sm:$0xff]   ;;  %v1221_v44 = vld [vmem:[%s1292_s23 + $0x110] sm:$0xff]   ;;  %v1223_v46 = vld [vmem:[%s1292_s23 + $0x118] sm:$0xff]  }
  0x1f   : > { %1097 = vmatpush3.bf16.msra.mxu0 %v1192_v13  ;;  %v1224_v47 = vld [vmem:[%s1292_s23 + $0x160] sm:$0xff]   ;;  %v1226_v50 = vld [vmem:[%s1292_s23 + $0x168] sm:$0xff]   ;;  %v288_v51 = vld [vmem:[%s1327_s27 + $0x10] sm:$0xff] }
  0x20   : > { %1098 = vmatprep.subr.bf16.mxu0 %v1195_v16  ;;  %v1230_v48 = vld [vmem:[%s1292_s23 + $0x180] sm:$0xff]   ;;  %v1033_v52 = vcombine.high %v288_v51, %v288_v51  ;;  %v1235_v53 = vld [vmem:[%s1292_s23 + $0x188] sm:$0xff]   ;;  %v1212_v54 = vld [vmem:[%s1327_s27 + $0x18] ss:$0 sps:$4 sm:$0xff]   ;;  %v1032_v60 = vcombine.low %v288_v51, %v288_v51 }
  0x21   : > { %1119 = vmatpush3.bf16.msra.mxu1 %v1194_v15  ;;  %v1225_v49 = vld [vmem:[%s1292_s23 + $0x120] sm:$0xff]   ;;  %v1227_v55 = vld [vmem:[%s1292_s23 + $0x128] sm:$0xff]   ;;  %v1228_v56 = vld [vmem:[%s1292_s23 + $0x170] sm:$0xff]  }
  0x22   : > { %1120 = vmatprep.subr.bf16.mxu1 %v1197_v18  ;;  %v1229_v57 = vld [vmem:[%s1292_s23 + $0x130] sm:$0xff]   ;;  %v1231_v58 = vld [vmem:[%s1292_s23 + $0x178] sm:$0xff]  }
  0x23   : > { %1099 = vmatpush3.bf16.msra.mxu0 %v1196_v17  ;;  %v1232_v59 = vld [vmem:[%s1292_s23 + $0x138] sm:$0xff]  }
  0x24   : > { %1100 = vmatprep.subr.bf16.mxu0 %v1199_v20 }
  0x25   : > { %1121 = vmatpush3.bf16.msra.mxu1 %v1198_v19 }
  0x26   : > { %1122 = vmatprep.subr.bf16.mxu1 %v1201_v22 }
  0x27   : > { %1101 = vmatpush3.bf16.msra.mxu0 %v1200_v21 }
  0x28   : > { %1102 = vmatprep.subr.bf16.mxu0 %v1203_v24 }
  0x29   : > { %1123 = vmatpush3.bf16.msra.mxu1 %v1202_v23 }
  0x2a   : > { %1124 = vmatprep.subr.bf16.mxu1 %v1205_v26 }
  0x2b   : > { %1103 = vmatpush3.bf16.msra.mxu0 %v1204_v25 }
  0x2c   : > { %1104 = vmatprep.subr.bf16.mxu0 %v1207_v28 }
  0x2d   : > { %1125 = vmatpush3.bf16.msra.mxu1 %v1206_v27 }
  0x2e   : > { %1126 = vmatprep.subr.bf16.mxu1 %v1209_v30 }
  0x2f   : > { %1105 = vmatpush3.bf16.msra.mxu0 %v1208_v29 }
  0x30   : > { %1134 = vmatprep.subr.bf16.mxu0 %v1214_v35 }
  0x31   : > { %1127 = vmatpush3.bf16.msra.mxu1 %v1213_v34 }
  0x32   : > { %758 = vmatmul.mubr.bf16.vlgmr.msra.gmra.mrb[0].mxu0 %v1028_v32  ;;  %1159 = vmatprep.subr.bf16.mxu1 %v1246_v41 }
  0x33   : > { %1135 = vmatpush3.bf16.msra.mxu0 %v1217_v39  ;;  %837 = vmatprep.mubr.bf16.mxu0 %v1033_v52 }
  0x34   : > { %798 = vmatmul.mubr.bf16.vlgmr.msra.gmra.mrb[0].mxu1 %v1030_v37  ;;  %1136 = vmatprep.subr.bf16.mxu0 %v1218_v40 }
  0x35   : > { %1163 = vmatprep.mubr.msk.bf16.mxu1 %vm1247_vm0, %v1246_v41  ;;  %1160 = vmatpush3.bf16.msra.mxu1 %v1230_v48 }
  0x36   : > { %1161 = vmatprep.subr.bf16.mxu1 %v1246_v41  ;;  %v1086_v41 = vld [vmem:[%s277_s8] ss:$0 sm:$0xff] }
  0x37   : > { %1137 = vmatpush3.bf16.msra.mxu0 %v1219_v42 }
  0x38   : > { %1138 = vmatprep.subr.bf16.mxu0 %v1220_v43  ;;  %v1087_v43 = vld [vmem:[%s280_s11] ss:$0 sm:$0xff] }
  0x39   : > { %1162 = vmatpush3.bf16.msra.mxu1 %v1235_v53 }
  0x3b   : > { %1139 = vmatpush3.bf16.msra.mxu0 %v1221_v44 }
  0x3c   : > { %1140 = vmatprep.subr.bf16.mxu0 %v1222_v45  ;;  %1164 = vmatmul.mubr.msk.bf16.vlgmr.msra.gmra.mrb[4].mxu1 %vm721_vm1, %v1212_v54 }
  0x3f   : > { %1141 = vmatpush3.bf16.msra.mxu0 %v1223_v46 }
  0x40   : > { %1142 = vmatprep.subr.bf16.mxu0 %v1224_v47 }
  0x43   : > { %1143 = vmatpush3.bf16.msra.mxu0 %v1225_v49 }
  0x44   : > { %1144 = vmatprep.subr.bf16.mxu0 %v1226_v50 }
  0x47   : > { %1145 = vmatpush3.bf16.msra.mxu0 %v1227_v55 }
  0x48   : > { %1146 = vmatprep.subr.bf16.mxu0 %v1228_v56 }
  0x4b   : > { %1147 = vmatpush3.bf16.msra.mxu0 %v1229_v57 }
  0x4c   : > { %1148 = vmatprep.subr.bf16.mxu0 %v1231_v58 }
  0x4f   : > { %1149 = vmatpush3.bf16.msra.mxu0 %v1232_v59 }
  0x52   : > { %838 = vmatmul.mubr.bf16.vlgmr.msra.gmra.mrb[4].mxu0 %v1032_v60 }
 0x105   : > { %v1106_v61 = vpop.f32.mrb[0].mxu0 }
 0x106   : > { %v1107_v63 = vpop.f32.mrb[1].mxu0 }
 0x107   : > { %v1108_v0 = vadd.f32 %v1107_v63, %v1106_v61  ;;  %v1109_v1 = vpop.f32.mrb[2].mxu0  ;;  %v1128_v2 = vpop.f32.mrb[0].mxu1 }
 0x108   : > { %v1110_v3 = vpop.f32.mrb[3].mxu0  ;;  %v1129_v5 = vpop.f32.mrb[1].mxu1 }
 0x109   : > { %v760_v4 = vadd.f32 %v1108_v0, %v1027_v62  ;;  %v1130_v6 = vadd.f32 %v1129_v5, %v1128_v2  ;;  %v1131_v7 = vpop.f32.mrb[2].mxu1 }
 0x10a   : > { %v1132_v8 = vpop.f32.mrb[3].mxu1 }
 0x10b   : > { %v800_v9 = vadd.f32 %v1130_v6, %v760_v4 }
 0x10f   : > { %v879_v10 = vpop.f32.mrb[4].mxu1 }
 0x110   : > { %v1165_v11 = vpop.f32.mrb[5].mxu1 }
 0x111   : > { %v882_v12 = vpop.f32.mrb[6].mxu1 }
 0x112   : > { %v1166_v13 = vpop.f32.mrb[7].mxu1 }
 0x125   : > { %v1150_v14 = vpop.f32.mrb[4].mxu0 }
 0x126   : > { %v1151_v15 = vpop.f32.mrb[5].mxu0 }
 0x127   : > { %v1152_v16 = vadd.f32 %v1151_v15, %v1150_v14  ;;  %v1153_v17 = vpop.f32.mrb[6].mxu0 }
 0x128   : > { %v1154_v18 = vpop.f32.mrb[7].mxu0 }
 0x129   : > { %v840_v19 = vadd.f32 %v1152_v16, %v800_v9 }
 0x12b   : > { %v880_v20 = vadd.f32 %v879_v10, %v840_v19 }
 0x12d   : > { %v885_v21 = vsel %vm721_vm1, %v880_v20, 0.0 }
 0x12e   : > { %v886_v22 = vrot.slane %v885_v21, 4 }
 0x130   : > { %v887_v23 = vadd.f32 %v886_v22, %v885_v21 }
 0x132   : > { %v888_v24 = vrot.slane %v887_v23, 2 }
 0x134   : > { %v889_v25 = vadd.f32 %v888_v24, %v887_v23 }
 0x136   : > { %v890_v26 = vrot.slane %v889_v25, 1 }
 0x138   : > { %v891_v27 = vadd.f32 %v890_v26, %v889_v25 }
 0x13a   : > { %v893_v28 = vmul.f32 0.125, %v891_v27 }
 0x13c   : > { %v894_v29 = vsub.f32 %v880_v20, %v893_v28 }
 0x13e   : > { %v895_v30 = vmul.f32 %v894_v29, %v894_v29 }
 0x140   : > { %v896_v31 = vsel %vm721_vm1, %v895_v30, 0.0 }
 0x141   : > { %v897_v32 = vrot.slane %v896_v31, 4 }
 0x143   : > { %v898_v33 = vadd.f32 %v897_v32, %v896_v31 }
 0x145   : > { %v899_v34 = vrot.slane %v898_v33, 2 }
 0x147   : > { %v900_v35 = vadd.f32 %v899_v34, %v898_v33 }
 0x149   : > { %v901_v36 = vrot.slane %v900_v35, 1 }
 0x14b   : > { %v902_v37 = vadd.f32 %v901_v36, %v900_v35 }
 0x14d   : > { %v903_v38 = vmul.f32 0.125, %v902_v37 }
 0x14f   : > { %v904_v39 = vadd.f32 1e-05, %v903_v38 }
 0x151   : > { %1236 = vrsqrt.f32 %v904_v39 }
 0x15b   : > { %v1237_v40 = vpop.eup %1236 }
 0x15c   : > { %v906_v42 = vmul.f32 %v1237_v40, %v894_v29 }
 0x15e   : > { %v914_v44 = vmul.f32 %v1086_v41, %v906_v42 }
 0x160   : > { %v922_v45 = vadd.f32 %v1087_v43, %v914_v44 }
 0x162   : > { %v923_v46 = vmax.f32 %v922_v45, 0.0 }
 0x164   : > { %v924_v47 = vpack.c.bf16 %v923_v46, %v923_v46 }
 0x166   : > { %926 = vst.msk [vmem:[%s284_s15] sm:$0xf] %vm925_vm2, %v924_v47 }
 0x167 PF: > { %s15_s18 = sadd.s32 1, %s1244_s18  }
 0x168   : > { %p12_p4 = scmp.ge.s32.totalorder %s15_s18, 6  }
 0x16a   :  { %14 = sbr.rel (!%p12_p4) target bundleno = 1 (0x1), region = 82 }

// kernel: central_forward.9
= control target key start
LH: loop header
LB: loop body
LE: loop exit
PB: predicated region body
PF: predicated region fallthrough
CT: control target
= control target key end

     0   :  { %15 = vsyncpa [#allocation3], 0  ;;  %s1417_s0 = inlined_call_operand.vmem [shape: bf16[4,2,128], index: 0, kind: input, shape index: {}]   ;;  %s1418_s1 = inlined_call_operand.vmem [shape: f32[4,2,64], index: 1, kind: input, shape index: {}]   ;;  %s1419_s2 = inlined_call_operand.vmem [shape: bf16[4,128,128], index: 2, kind: input, shape index: {}]   ;;  %s1420_s3 = inlined_call_operand.vmem [shape: f32[4,1,128], index: 3, kind: input, shape index: {}]   ;;  %s1421_s4 = inlined_call_operand.vmem [shape: bf16[4,128,64], index: 4, kind: input, shape index: {}]   ;;  %s1422_s5 = inlined_call_operand.vmem [shape: f32[4,1,64], index: 5, kind: input, shape index: {}]   ;;  %s1423_s6 = inlined_call_operand.vmem [shape: bf16[4,64,5], index: 6, kind: input, shape index: {}]   ;;  %s1424_s7 = inlined_call_operand.vmem [shape: f32[4,1,5], index: 7, kind: input, shape index: {}]   ;;  %s1425_s8 = inlined_call_operand.vmem [shape: f32[4,2,128], index: 8, kind: output, shape index: {0}]   ;;  %s1426_s9 = inlined_call_operand.hbm [shape: f32[4,2,5], index: 9, kind: output, shape index: {1}]  }
   0x1   :  { %17 = vsyncpa [#allocation3 + $0x1], 0  ;;  %s1254_s30 = smov 0   ;;  %s1256_s10 = smov 0  }
   0x2   :  { %s1258_s11 = smov 0   ;;  %s1260_s12 = smov 0  }
   0x3 LB: > { %s1275_s13 = sadd.s32 4294967295, %s1199_s12   ;;  %s953_s14 = sadd.s32 4294967294, %s1199_s12   ;;  %s1199_s12 = sphi %s1260_s12, %s1432_s12   ;;  %s1195_s11 = sphi %s1258_s11, %s1431_s11   ;;  %s1191_s10 = sphi %s1256_s10, %s1430_s10   ;;  %s1187_s30 = sphi %s1254_s30, %s1429_s30  }
   0x4   : > { %s1279_s15 = sadd.s32 1, %s1199_s12   ;;  %s264_s16 = sadd.s32 1, %s1195_s11 }
   0x5   : > { %s261_s17 = ssub.s32 %s1199_s12, %s1279_s15  ;;  %p274_p0 = scmp.ne.s32.totalorder %s1195_s11, %s1191_s10 }
   0x6   : > { %p262_p1 = scmp.eq.s32.totalorder %s261_s17, 0  ;;  %p275_p2 = scmp.eq.s32.totalorder %s1275_s13, 3 }
   0x7   : > { %p280_p3 = scmp.ne.s32.totalorder %s1191_s10, %s1187_s30  ;;  %p281_p4 = scmp.eq.s32.totalorder %s953_s14, 3 }
   0x8   : > { %s1290_s18 = scalar_select %p262_p1, %s1195_s11, %s264_s16  }
   0x9   : > { %p1292_p5 = por %p275_p2, %p274_p0  ;;  %p1296_p6 = por %p281_p4, %p280_p3 }
   0xa   : > { %p956_p7 = scmp.ge.s32.totalorder %s1199_s12, 1  ;;  %p354_p8 = scmp.lt.s32.totalorder %s1199_s12, 5 }
   0xc   : > { %p355_p9 = pnand %p956_p7, %p354_p8 }
   0xd   : > { %p420_p10 = scmp.lt.s32.totalorder (!%p355_p9), %s1275_s13, 3  ;;  %v1201_v0 = vmov (!%p355_p9), 0.0   ;;  %vm1202_vm0 = vmmov (!%p355_p9), 0   ;;  %vm730_vm1 = vcmask (!%p355_p9), 523264   ;;  %vm775_vm2 = vcmask (!%p355_p9), 33792  }
   0xe   : > { %358 = sbr.rel (%p355_p9) target bundleno = 751 (0x2ef), region = 52  ;;  %1020 = vmatprep.subr.bf16.mxu0 (!%p355_p9), %v1201_v0  ;;  %1036 = vmatprep.mubr.msk.bf16.mxu0 (!%p355_p9), %vm1202_vm0, %v1201_v0 }
   0xf   : > { %1040 = vmatprep.subr.bf16.mxu1 (!%p355_p9), %v1201_v0  ;;  %1056 = vmatprep.mubr.msk.bf16.mxu1 (!%p355_p9), %vm1202_vm0, %v1201_v0 }
  0x15   : > { %s1307_s21 = scalar_select %p420_p10, %s1275_s13, 3 }
  0x17   : > { %s994_s22 = sshll.u32 %s1307_s21, 6  ;;  %s422_s28 = scalar_lea.vmem %s1417_s0, %s1307_s21 }
  0x18   : > { %s431_s25 = scalar_lea.vmem %s1419_s2, %s994_s22  ;;  %v456_v9 = vld [vmem:[%s422_s28] sm:$0x1]  ;;  %s439_s16 = scalar_lea.vmem %s1421_s4, %s994_s22 }
  0x19   : > { %v1113_v1 = vld [vmem:[%s431_s25] sm:$0xff]   ;;  %v1114_v2 = vld [vmem:[%s431_s25 + $0x8] sm:$0xff]   ;;  %v1115_v3 = vld [vmem:[%s431_s25 + $0x10] sm:$0xff]   ;;  %s996_s17 = sshll.u32 %s1307_s21, 5  ;;  %s434_s27 = scalar_lea.vmem %s1420_s3, %s1307_s21 }
  0x1a   : > { %1021 = vmatpush3.bf16.msra.mxu0 %v1113_v1  ;;  %v1116_v4 = vld [vmem:[%s431_s25 + $0x18] sm:$0xff]   ;;  %v1117_v5 = vld [vmem:[%s431_s25 + $0x20] sm:$0xff]   ;;  %v1118_v6 = vld [vmem:[%s431_s25 + $0x28] sm:$0xff]   ;;  %s447_s24 = scalar_lea.vmem %s1423_s6, %s996_s17  ;;  %s958_s28 = sshll.u32 %s1307_s21, 1 }
  0x1b   : > { %1022 = vmatprep.subr.bf16.mxu0 %v1201_v0  ;;  %v1119_v7 = vld [vmem:[%s431_s25 + $0x30] sm:$0xff]   ;;  %v1120_v8 = vld [vmem:[%s431_s25 + $0x38] sm:$0xff]   ;;  %v1121_v10 = vld [vmem:[%s439_s16] sm:$0xff]   ;;  %s442_s23 = scalar_lea.vmem %s1422_s5, %s1307_s21  ;;  %s450_s17 = scalar_lea.vmem %s1424_s7, %s1307_s21 }
  0x1c   : > { %1041 = vmatpush3.bf16.msra.mxu1 %v1121_v10  ;;  %v1122_v11 = vld [vmem:[%s439_s16 + $0x8] sm:$0xff]   ;;  %v1123_v12 = vld [vmem:[%s439_s16 + $0x10] sm:$0xff]   ;;  %v1124_v13 = vld [vmem:[%s439_s16 + $0x18] sm:$0xff]  }
  0x1d   : > { %1042 = vmatprep.subr.bf16.mxu1 %v1201_v0  ;;  %v1125_v14 = vld [vmem:[%s439_s16 + $0x20] sm:$0xff]   ;;  %v1126_v15 = vld [vmem:[%s439_s16 + $0x28] sm:$0xff]   ;;  %v1127_v16 = vld [vmem:[%s439_s16 + $0x30] sm:$0xff]  }
  0x1e   : > { %1023 = vmatpush3.bf16.msra.mxu0 %v1114_v2  ;;  %v1128_v17 = vld [vmem:[%s439_s16 + $0x38] sm:$0xff]   ;;  %v1129_v18 = vld [vmem:[%s447_s24] sm:$0xff]   ;;  %v1130_v19 = vld [vmem:[%s447_s24 + $0x8] sm:$0xff]   ;;  %s454_s16 = scalar_lea.vmem %s1425_s8, %s958_s28 }
  0x1f   : > { %1024 = vmatprep.subr.bf16.mxu0 %v1201_v0  ;;  %v966_v20 = vld [vmem:[%s434_s27] ss:$0 sm:$0xff]  ;;  %v1131_v33 = vld [vmem:[%s447_s24 + $0x10] sm:$0xff]   ;;  %v1132_v34 = vld [vmem:[%s447_s24 + $0x18] sm:$0xff]   ;;  %s426_s27 = scalar_lea.vmem %s1418_s1, %s958_s28  ;;  %s417_s24 = sand.u32 1, %s1191_s10  }
  0x20   : > { %1043 = vmatpush3.bf16.msra.mxu1 %v1122_v11  ;;  %v975_v35 = vld [vmem:[%s442_s23] ss:$0 sm:$0xff]  ;;  %s957_s29 = sshll.u32 %s417_s24, 1  ;;  %s991_s28 = sshll.u32 %s1275_s13, 5 }
  0x21   : > { %1044 = vmatprep.subr.bf16.mxu1 %v1201_v0  ;;  %v688_v37 = vld [vmem:[%s426_s27] sm:$0x3]  ;;  %s419_s22 = scalar_lea.vmem [#allocation2], %s957_s29  ;;  %s1375_s27 = scalar_lea.hbm %s1426_s9, %s991_s28 }
  0x22   : > { %1025 = vmatpush3.bf16.msra.mxu0 %v1115_v3  ;;  %v984_v44 = vld [vmem:[%s450_s17] ss:$0 sm:$0xff]  ;;  %s798_s23 = sshll.u32 %s419_s22, 4  ;;  %s782_s13 = scalar_lea.sflag [#allocation3], %s417_s24  ;;  %s1377_s23 = int_to_ptr.vmem [resolvable:$true] %s798_s23 }
  0x23   : > { %1026 = vmatprep.subr.bf16.mxu0 %v1201_v0  ;;  %s1137_s21 = scalar_lea.vmem %s1377_s23, 32  ;;  %s1203_s29 = smov [#allocation2]  }
  0x24   : > { %1045 = vmatpush3.bf16.msra.mxu1 %v1123_v12  ;;  %p1138_p11 = scmp.ne.s32.totalorder %s1377_s23, %s1137_s21  ;;  %s1141_s14 = sshll.u32 %s1203_s29, 4  ;;  %s1142_s14 = int_to_ptr.vmem [resolvable:$false] %s1141_s14 }
  0x25   : > { %1046 = vmatprep.subr.bf16.mxu1 %v1201_v0  ;;  %p1144_p0 = scmp.lt.s32.totalorder %s1377_s23, %s1142_s14 }
  0x26   : > { %1027 = vmatpush3.bf16.msra.mxu0 %v1116_v4  ;;  %p1139_p12 = pnand %p1138_p11, %p1292_p5 }
  0x27   : > { %1028 = vmatprep.subr.bf16.mxu0 %v1201_v0 }
  0x28   : > { %1047 = vmatpush3.bf16.msra.mxu1 %v1124_v13  ;;  %p1140_p13 = pneg %p1139_p12 }
  0x29   : > { %1048 = vmatprep.subr.bf16.mxu1 %v1201_v0 }
  0x2a   : > { %1029 = vmatpush3.bf16.msra.mxu0 %v1117_v5 }
  0x2b   : > { %1030 = vmatprep.subr.bf16.mxu0 %v1201_v0 }
  0x2c   : > { %1049 = vmatpush3.bf16.msra.mxu1 %v1125_v14 }
  0x2d   : > { %1050 = vmatprep.subr.bf16.mxu1 %v1201_v0 }
  0x2e   : > { %1031 = vmatpush3.bf16.msra.mxu0 %v1118_v6 }
  0x2f   : > { %1032 = vmatprep.subr.bf16.mxu0 %v1201_v0 }
  0x30   : > { %1051 = vmatpush3.bf16.msra.mxu1 %v1126_v15 }
  0x31   : > { %1052 = vmatprep.subr.bf16.mxu1 %v1201_v0 }
  0x32   : > { %1033 = vmatpush3.bf16.msra.mxu0 %v1119_v7 }
  0x33   : > { %1034 = vmatprep.subr.bf16.mxu0 %v1201_v0 }
  0x34   : > { %1053 = vmatpush3.bf16.msra.mxu1 %v1127_v16 }
  0x35   : > { %1054 = vmatprep.subr.bf16.mxu1 %v1201_v0 }
  0x36   : > { %1035 = vmatpush3.bf16.msra.mxu0 %v1120_v8 }
  0x37   : > { %1060 = vmatprep.subr.bf16.mxu0 %v1201_v0 }
  0x38   : > { %1055 = vmatpush3.bf16.msra.mxu1 %v1128_v17 }
  0x39   : > { %1037 = vmatmul.mubr.bf16.vlgmr.msra.gmra.mrb[0].mxu0 %v456_v9 }
  0x3a   : > { %1068 = vmatprep.mubr.msk.bf16.mxu0 %vm1202_vm0, %v1201_v0  ;;  %1061 = vmatpush3.bf16.msra.mxu0 %v1129_v18 }
  0x3b   : > { %1062 = vmatprep.subr.bf16.mxu0 %v1201_v0 }
  0x3e   : > { %1063 = vmatpush3.bf16.msra.mxu0 %v1130_v19 }
  0x3f   : > { %1064 = vmatprep.subr.bf16.mxu0 %v1201_v0 }
  0x42   : > { %1065 = vmatpush3.bf16.msra.mxu0 %v1131_v33 }
  0x43   : > { %1066 = vmatprep.subr.bf16.mxu0 %v1201_v0 }
  0x46   : > { %1067 = vmatpush3.bf16.msra.mxu0 %v1132_v34 }
 0x10c   : > { %v562_v21 = vpop.f32.mrb[0].mxu0 }
 0x10d   : > { %v563_v22 = vadd.f32 %v966_v20, %v562_v21  ;;  %v1038_v23 = vpop.f32.mrb[1].mxu0 }
 0x10e   : > { %v565_v24 = vpop.f32.mrb[2].mxu0 }
 0x10f   : > { %v568_v25 = vsub.f32 0.0, %v563_v22  ;;  %v1039_v26 = vpop.f32.mrb[3].mxu0 }
 0x111   : > { %v569_v27 = vmul.f32 1.442695, %v568_v25 }
 0x113   : > { %1133 = vpow2.f32 %v569_v27 }
 0x11d   : > { %v1134_v28 = vpop.eup %1133 }
 0x11e   : > { %v571_v29 = vadd.f32 1.0, %v1134_v28 }
 0x120   : > { %1135 = vrcp.f32 %v571_v29 }
 0x12a   : > { %v1136_v30 = vpop.eup %1135 }
 0x12b   : > { %v574_v31 = vmul.f32 %v1136_v30, %v563_v22 }
 0x12d   : > { %575 = vst [vmem:[%s454_s16] sm:$0x3] %v574_v31  ;;  %v576_v32 = vpack.c.bf16 %v574_v31, %v574_v31  ;;  %s1143_s16 = scalar_lea.vmem %s1142_s14, 64 }
 0x12e   : > { %p1145_p1 = scmp.lt.s32.totalorder %s1143_s16, %s1137_s21 }
 0x12f   : > { %1057 = vmatmul.mubr.bf16.vlgmr.msra.gmra.mrb[0].mxu1 %v576_v32 }
 0x130   : > { %p1146_p2 = por %p1145_p1, %p1144_p0 }
 0x132   : > { %p1147_p3 = pnand %p1146_p2, %p1140_p13 }
 0x202   : > { %v682_v36 = vpop.f32.mrb[0].mxu1 }
 0x203   : > { %v683_v38 = vadd.f32 %v975_v35, %v682_v36  ;;  %v1058_v39 = vpop.f32.mrb[1].mxu1 }
 0x204   : > { %v685_v40 = vpop.f32.mrb[2].mxu1 }
 0x205   : > { %v689_v41 = vmul.f32 %v688_v37, %v683_v38  ;;  %v1059_v42 = vpop.f32.mrb[3].mxu1 }
 0x207   : > { %v690_v43 = vpack.c.bf16 %v689_v41, %v689_v41 }
 0x209   : > { %1069 = vmatmul.mubr.msk.bf16.vlgmr.msra.gmra.mrb[4].mxu0 %vm730_vm1, %v690_v43 }
 0x2dc   : > { %v768_v45 = vpop.f32.mrb[4].mxu0 }
 0x2dd   : > { %v769_v46 = vadd.f32 %v984_v44, %v768_v45  ;;  %v1070_v47 = vpop.f32.mrb[5].mxu0 }
 0x2de   : > { %v771_v48 = vpop.f32.mrb[6].mxu0 }
 0x2df   : > { %v774_v49 = vmax.f32 %v769_v46, 0.0  ;;  %v1071_v50 = vpop.f32.mrb[7].mxu0 }
 0x2e1   : > { %776 = vst.msk [vmem:[%s419_s22] sm:$0x3] %vm775_vm2, %v774_v49 }
 0x2e2   : > { %1150 = shalt.err (!%p1147_p3)
}
 0x2e3   : > { %s1151_s24 = scalar_lea.hbm %s1375_s27, 32  ;;  %s1155_s22 = scalar_lea.hbm %s1426_s9, 128 }
 0x2e4   : > { %p1152_p4 = scmp.ne.s32.totalorder %s1375_s27, %s1151_s24  ;;  %p1156_p9 = scmp.lt.u32.totalorder %s1375_s27, %s1426_s9 }
 0x2e5   : > { %p1157_p10 = scmp.lt.u32.totalorder %s1155_s22, %s1151_s24  ;;  %p1159_p12 = scmp.lt.u32.totalorder %s1151_s24, %s1375_s27 }
 0x2e6   : > { %p1153_p7 = pnand %p1152_p4, %p1292_p5 }
 0x2e7   : > { %p1158_p11 = por %p1157_p10, %p1156_p9 }
 0x2e8   : > { %p1154_p8 = pneg %p1153_p7 }
 0x2e9   : > { %p1160_p13 = por %p1159_p12, %p1158_p11 }
 0x2eb   : > { %p1161_p0 = pnand %p1160_p13, %p1154_p8 }
 0x2ed   : > { %1164 = shalt.err (!%p1161_p0)
}
 0x2ee   : > { %1072 = dma.vmem_to_hbm [thread:$0]  (%p1292_p5), %s1377_s23, 32, %s1375_s27, %s782_s13  }
 0x2ef PF: > { %p1078_p1 = scmp.ge.s32.totalorder %s1199_s12, 2  ;;  %s817_s21 = sand.u32 1, %s1187_s30  }
 0x2f0   : > { %s818_s29 = scalar_lea.sflag [#allocation3], %s817_s21 }
 0x2f1   : > { %p1075_p2 = pnand %p1078_p1, %p1296_p6 }
 0x2f3   : > { %1182 = dma.done.wait (!%p1075_p2), %s818_s29, 32  }
 0x2f4   : > { %1184 = vsyncadd (!%p1075_p2), %s818_s29, 4294967264  ;;  %p20_p3 = scmp.ge.s32.totalorder %s1279_s15, 6   ;;  %s1429_s30 = smov %s1191_s10 }
 0x2f5   : > { %s1430_s10 = smov %s1195_s11  ;;  %s1431_s11 = smov %s1290_s18 }
 0x2f6   : > { %s1432_s12 = smov %s1279_s15  ;;  %22 = sbr.rel (!%p20_p3) target bundleno = 3 (0x3), region = 120 }
 0x2fd   :  { %823 = vsyncpa [#allocation3], 1 }
 0x2fe   :  { %825 = vsyncpa [#allocation3 + $0x1], 1 }

// kernel: central_forward.11
= control target key start
LH: loop header
LB: loop body
LE: loop exit
PB: predicated region body
PF: predicated region fallthrough
CT: control target
= control target key end

     0   :  { %v394_v1 = vmov 0.0   ;;  %vm395_vm0 = vmmov 0   ;;  %s496_s0 = inlined_call_operand.vmem [shape: f32[2,64], index: 0, kind: input, shape index: {}]   ;;  %s497_s1 = inlined_call_operand.vmem [shape: bf16[64,32], index: 1, kind: input, shape index: {}]   ;;  %s498_s2 = inlined_call_operand.vmem [shape: f32[1,32], index: 2, kind: input, shape index: {}]   ;;  %s499_s3 = inlined_call_operand.vmem [shape: bf16[32,64], index: 3, kind: input, shape index: {}]   ;;  %s500_s4 = inlined_call_operand.vmem [shape: f32[1,64], index: 4, kind: input, shape index: {}]   ;;  %s501_s5 = inlined_call_operand.vmem [shape: bf16[64,4], index: 5, kind: input, shape index: {}]   ;;  %s502_s6 = inlined_call_operand.vmem [shape: f32[1,4], index: 6, kind: input, shape index: {}]   ;;  %s503_s7 = inlined_call_operand.hbm [shape: f32[1,1], index: 7, kind: output, shape index: {}]  }
   0x1   :  { %v360_v0 = vld [vmem:[%s497_s1] sm:$0xff]   ;;  %325 = vmatprep.subr.bf16.mxu0 %v394_v1  ;;  %337 = vmatprep.subr.bf16.mxu1 %v394_v1  ;;  %v361_v2 = vld [vmem:[%s497_s1 + $0x8] sm:$0xff]   ;;  %v362_v3 = vld [vmem:[%s497_s1 + $0x10] sm:$0xff]  }
   0x2   :  { %326 = vmatpush3.bf16.msra.mxu0 %v360_v0  ;;  %333 = vmatprep.mubr.msk.bf16.mxu0 %vm395_vm0, %v394_v1 }
   0x3   :  { %327 = vmatprep.subr.bf16.mxu0 %v394_v1  ;;  %341 = vmatprep.mubr.msk.bf16.mxu1 %vm395_vm0, %v394_v1 }
   0x6   :  { %328 = vmatpush3.bf16.msra.mxu0 %v361_v2 }
   0x7   :  { %329 = vmatprep.subr.bf16.mxu0 %v394_v1 }
   0x8   :  { %12 = vsyncpa [#allocation3], 0  ;;  %v363_v4 = vld [vmem:[%s497_s1 + $0x18] sm:$0xff]   ;;  %v28_v5 = vld [vmem:[%s496_s0] sm:$0x3]  ;;  %vm69_vm1 = vcmask 523264  }
   0x9   :  { %v29_v6 = vpack.c.bf16 %v28_v5, %v28_v5  ;;  %v364_v7 = vld [vmem:[%s499_s3] sm:$0xff]   ;;  %v365_v8 = vld [vmem:[%s499_s3 + $0x8] sm:$0xff]   ;;  %vm138_vm2 = vcmask 261120   ;;  %v368_v19 = vld [vmem:[%s501_s5 + $0x10] sm:$0xff]   ;;  %vm267_vm3 = vcmask 25600   ;;  %vm271_vm4 = vcmask 1041408  }
   0xa   :  { %330 = vmatpush3.bf16.msra.mxu0 %v362_v3  ;;  %338 = vmatpush3.bf16.msra.mxu1 %v364_v7  ;;  %v296_v9 = vld [vmem:[%s498_s2] ss:$0 sm:$0xff]  ;;  %v367_v18 = vld [vmem:[%s501_s5 + $0x8] sm:$0xff]   ;;  %v369_v20 = vld [vmem:[%s501_s5 + $0x18] sm:$0xff]   ;;  %vm280_vm5 = vcmask 0  }
   0xb   :  { %331 = vmatprep.subr.bf16.mxu0 %v394_v1  ;;  %339 = vmatprep.subr.bf16.mxu1 %v394_v1  ;;  %v366_v16 = vld [vmem:[%s501_s5] sm:$0xff]  }
   0xc   :  { %v302_v21 = vld [vmem:[%s500_s4] ss:$0 sm:$0xff]  ;;  %s396_s4 = smov [#allocation2]  }
   0xd   :  { %v306_v29 = vld [vmem:[%s502_s6] ss:$0 sm:$0xff]  ;;  %s288_s5 = sshll.u32 %s396_s4, 4  ;;  %s289_s5 = int_to_ptr.vmem [resolvable:$true] %s288_s5 }
   0xe   :  { %332 = vmatpush3.bf16.msra.mxu0 %v363_v4  ;;  %340 = vmatpush3.bf16.msra.mxu1 %v365_v8  ;;  %s370_s6 = scalar_lea.vmem %s289_s5, 16  ;;  %s374_s25 = scalar_lea.vmem %s289_s5, 32 }
   0xf   :  { %345 = vmatprep.subr.bf16.mxu1 %v394_v1  ;;  %p371_p0 = scmp.ne.s32.totalorder %s289_s5, %s370_s6  ;;  %p375_p1 = scmp.lt.s32.totalorder %s289_s5, %s289_s5 }
  0x10   :  { %p376_p2 = scmp.lt.s32.totalorder %s374_s25, %s370_s6 }
  0x11   :  { %334 = vmatmul.mubr.msk.bf16.vlgmr.msra.gmra.mrb[0].mxu0 %vm69_vm1, %v29_v6 }
  0x12   :  { %p377_p3 = por %p376_p2, %p375_p1 }
  0x14   :  { %p378_p4 = pnand %p377_p3, %p371_p0 }
  0xe4   :  { %v107_v10 = vpop.f32.mrb[0].mxu0 }
  0xe5   :  { %v108_v11 = vadd.f32 %v296_v9, %v107_v10  ;;  %v335_v12 = vpop.f32.mrb[1].mxu0 }
  0xe6   :  { %v110_v13 = vpop.f32.mrb[2].mxu0 }
  0xe7   :  { %v113_v14 = vmax.f32 %v108_v11, 0.0  ;;  %v336_v15 = vpop.f32.mrb[3].mxu0 }
  0xe9   :  { %v114_v17 = vpack.c.bf16 %v113_v14, %v113_v14 }
  0xeb   :  { %342 = vmatmul.mubr.msk.bf16.vlgmr.msra.gmra.mrb[0].mxu1 %vm138_vm2, %v114_v17 }
  0xec   :  { %346 = vmatpush3.bf16.msra.mxu1 %v366_v16  ;;  %353 = vmatprep.mubr.msk.bf16.mxu1 %vm395_vm0, %v394_v1 }
  0xed   :  { %347 = vmatprep.subr.bf16.mxu1 %v394_v1 }
  0xf0   :  { %348 = vmatpush3.bf16.msra.mxu1 %v367_v18 }
  0xf1   :  { %349 = vmatprep.subr.bf16.mxu1 %v394_v1 }
  0xf4   :  { %350 = vmatpush3.bf16.msra.mxu1 %v368_v19 }
  0xf5   :  { %351 = vmatprep.subr.bf16.mxu1 %v394_v1 }
  0xf8   :  { %352 = vmatpush3.bf16.msra.mxu1 %v369_v20 }
 0x1be   :  { %v176_v22 = vpop.f32.mrb[0].mxu1 }
 0x1bf   :  { %v177_v23 = vadd.f32 %v302_v21, %v176_v22  ;;  %v343_v24 = vpop.f32.mrb[1].mxu1 }
 0x1c0   :  { %v179_v25 = vpop.f32.mrb[2].mxu1 }
 0x1c1   :  { %v182_v26 = vmax.f32 %v177_v23, 0.0  ;;  %v344_v27 = vpop.f32.mrb[3].mxu1 }
 0x1c3   :  { %v183_v28 = vpack.c.bf16 %v182_v26, %v182_v26 }
 0x1c5   :  { %354 = vmatmul.mubr.msk.bf16.vlgmr.msra.gmra.mrb[4].mxu1 %vm69_vm1, %v183_v28 }
 0x298   :  { %v260_v30 = vpop.f32.mrb[4].mxu1 }
 0x299   :  { %v261_v31 = vadd.f32 %v306_v29, %v260_v30  ;;  %v355_v32 = vpop.f32.mrb[5].mxu1 }
 0x29a   :  { %v263_v33 = vpop.f32.mrb[6].mxu1 }
 0x29b   :  { %v266_v34 = vmax.f32 %v261_v31, 0.0  ;;  %v356_v35 = vpop.f32.mrb[7].mxu1 }
 0x29d   :  { %v268_v36 = vsel %vm267_vm3, %v266_v34, 0.0 }
 0x29e   :  { %269 = vadd.xlane.f32.xlu0 %v268_v36 }
 0x32b   :  { %v270_v37 = vpop.xlane.xlu0 %269 }
 0x32c   :  { %v272_v38 = vsel %vm271_vm4, %v270_v37, 0.0 }
 0x32d   :  { %v273_v39 = vrot.slane %v272_v38, 4 }
 0x32f   :  { %v274_v40 = vadd.f32 %v273_v39, %v272_v38 }
 0x331   :  { %v275_v41 = vrot.slane %v274_v40, 2 }
 0x333   :  { %v276_v42 = vadd.f32 %v275_v41, %v274_v40 }
 0x335   :  { %v277_v43 = vrot.slane %v276_v42, 1 }
 0x337   :  { %v278_v44 = vadd.f32 %v277_v43, %v276_v42 }
 0x339   :  { %v279_v45 = vmul.f32 0.125, %v278_v44 }
 0x33b   :  { %281 = vst.msk [vmem:[#allocation2] sm:$0x1] %vm280_vm5, %v279_v45 }
 0x33c   :  { %381 = shalt.err (!%p378_p4)
}
 0x33d   :  { %s382_s28 = scalar_lea.hbm %s503_s7, 16 }
 0x33e   :  { %p383_p5 = scmp.ne.s32.totalorder %s503_s7, %s382_s28  ;;  %p386_p6 = scmp.lt.u32.totalorder %s382_s28, %s503_s7 }
 0x340   :  { %p388_p7 = pnand %p386_p6, %p383_p5 }
 0x342   :  { %391 = shalt.err (!%p388_p7)
}
 0x343   :  { %291 = dma.vmem_to_hbm [thread:$0]  %s289_s5, 16, %s503_s7, [#allocation3]  }
 0x344   :  { %392 = dma.done.wait [#allocation3], 16  }
 0x345   :  { %393 = vsyncadd [#allocation3], 4294967280 }
 0x346   :  { %295 = vsyncpa [#allocation3], 1 }

// kernel: central_forward.10
= control target key start
LH: loop header
LB: loop body
LE: loop exit
PB: predicated region body
PF: predicated region fallthrough
CT: control target
= control target key end

     0   :  { %v658_v1 = vmov 0.0   ;;  %vm659_vm0 = vmmov 0   ;;  %vm69_vm1 = vcmask 523264   ;;  %s825_s0 = inlined_call_operand.vmem [shape: f32[2,64], index: 0, kind: input, shape index: {}]   ;;  %s826_s1 = inlined_call_operand.vmem [shape: bf16[64,32], index: 1, kind: input, shape index: {}]   ;;  %s827_s2 = inlined_call_operand.vmem [shape: f32[1,32], index: 2, kind: input, shape index: {}]   ;;  %s828_s3 = inlined_call_operand.vmem [shape: bf16[32,64], index: 3, kind: input, shape index: {}]   ;;  %s829_s4 = inlined_call_operand.vmem [shape: f32[1,64], index: 4, kind: input, shape index: {}]   ;;  %s830_s5 = inlined_call_operand.vmem [shape: bf16[64,640], index: 5, kind: input, shape index: {}]   ;;  %s831_s6 = inlined_call_operand.vmem [shape: f32[1,640], index: 6, kind: input, shape index: {}]   ;;  %s832_s7 = inlined_call_operand.hbm [shape: f32[2,640], index: 7, kind: output, shape index: {}]  }
   0x1   :  { %v600_v0 = vld [vmem:[%s826_s1] sm:$0xff]   ;;  %563 = vmatprep.subr.bf16.mxu0 %v658_v1  ;;  %575 = vmatprep.subr.bf16.mxu1 %v658_v1  ;;  %v601_v2 = vld [vmem:[%s826_s1 + $0x8] sm:$0xff]   ;;  %v602_v3 = vld [vmem:[%s826_s1 + $0x10] sm:$0xff]  }
   0x2   :  { %564 = vmatpush3.bf16.msra.mxu0 %v600_v0  ;;  %571 = vmatprep.mubr.msk.bf16.mxu0 %vm659_vm0, %v658_v1  ;;  %v603_v4 = vld [vmem:[%s826_s1 + $0x18] sm:$0xff]   ;;  %v28_v5 = vld [vmem:[%s825_s0] sm:$0x3] }
   0x3   :  { %565 = vmatprep.subr.bf16.mxu0 %v658_v1  ;;  %579 = vmatprep.mubr.msk.bf16.mxu1 %vm659_vm0, %v658_v1  ;;  %v29_v6 = vpack.c.bf16 %v28_v5, %v28_v5 }
   0x6   :  { %566 = vmatpush3.bf16.msra.mxu0 %v601_v2 }
   0x7   :  { %567 = vmatprep.subr.bf16.mxu0 %v658_v1 }
   0xa   :  { %568 = vmatpush3.bf16.msra.mxu0 %v602_v3 }
   0xb   :  { %569 = vmatprep.subr.bf16.mxu0 %v658_v1 }
   0xe   :  { %570 = vmatpush3.bf16.msra.mxu0 %v603_v4 }
   0xf   :  { %12 = vsyncpa [#allocation3], 0  ;;  %v604_v7 = vld [vmem:[%s828_s3] sm:$0xff]   ;;  %v605_v8 = vld [vmem:[%s828_s3 + $0x8] sm:$0xff]   ;;  %vm138_vm2 = vcmask 261120   ;;  %v660_v33 = vmov 0   ;;  %v210_v46 = vlaneseq }
  0x10   :  { %576 = vmatpush3.bf16.msra.mxu1 %v604_v7  ;;  %v608_v9 = vld [vmem:[%s830_s5 + $0x4] ss:$20 sps:$4 sm:$0xff]   ;;  %v609_v10 = vld [vmem:[%s830_s5 + $0x8] ss:$20 sps:$4 sm:$0xff]   ;;  %v611_v11 = vld [vmem:[%s830_s5 + $0xc] ss:$20 sps:$4 sm:$0xff]  }
  0x11   :  { %572 = vmatmul.mubr.msk.bf16.vlgmr.msra.gmra.mrb[0].mxu0 %vm69_vm1, %v29_v6  ;;  %577 = vmatprep.subr.bf16.mxu1 %v658_v1  ;;  %v615_v12 = vld [vmem:[%s830_s5 + $0x30] ss:$20 sps:$4 sm:$0xff]   ;;  %v617_v13 = vld [vmem:[%s830_s5 + $0x34] ss:$20 sps:$4 sm:$0xff]   ;;  %v621_v14 = vld [vmem:[%s830_s5 + $0x58] ss:$20 sps:$4 sm:$0xff]  }
  0x12   :  { %383 = vmatprep.subr.bf16.mxu0 %v611_v11  ;;  %v623_v15 = vld [vmem:[%s830_s5 + $0x5c] ss:$20 sps:$4 sm:$0xff]   ;;  %v516_v16 = vld [vmem:[%s827_s2] ss:$0 sm:$0xff]  ;;  %v620_v27 = vld [vmem:[%s830_s5 + $0x54] ss:$20 sps:$4 sm:$0xff]   ;;  %415 = vmatprep.mubr.bf16.mxu0 %v660_v33 }
  0x13   :  { %384 = vmatpush1.bf16.msra.mxu0 %v609_v10  ;;  %v606_v23 = vld [vmem:[%s830_s5] ss:$20 sps:$4 sm:$0xff]   ;;  %v612_v26 = vld [vmem:[%s830_s5 + $0x28] ss:$20 sps:$4 sm:$0xff]   ;;  %v618_v28 = vld [vmem:[%s830_s5 + $0x50] ss:$20 sps:$4 sm:$0xff]  }
  0x14   :  { %578 = vmatpush3.bf16.msra.mxu1 %v605_v8  ;;  %385 = vmatprep.subr.bf16.mxu0 %v617_v13  ;;  %v614_v25 = vld [vmem:[%s830_s5 + $0x2c] ss:$20 sps:$4 sm:$0xff]   ;;  %v626_v29 = vld [vmem:[%s830_s5 + $0x7c] ss:$20 sps:$4 sm:$0xff]   ;;  %v629_v31 = vld [vmem:[%s830_s5 + $0x84] ss:$20 sps:$4 sm:$0xff]  }
  0x15   :  { %342 = vmatprep.subr.bf16.mxu1 %v608_v9  ;;  %v624_v30 = vld [vmem:[%s830_s5 + $0x78] ss:$20 sps:$4 sm:$0xff]   ;;  %v627_v32 = vld [vmem:[%s830_s5 + $0x80] ss:$20 sps:$4 sm:$0xff]   ;;  %v630_v41 = vld [vmem:[%s830_s5 + $0x10] ss:$20 sps:$4 sm:$0xff]  }
  0x16   :  { %v522_v34 = vld [vmem:[%s829_s4] ss:$0 sm:$0xff]  ;;  %v631_v43 = vld [vmem:[%s830_s5 + $0x38] ss:$20 sps:$4 sm:$0xff]   ;;  %v633_v45 = vld [vmem:[%s830_s5 + $0x88] ss:$20 sps:$4 sm:$0xff]  }
  0x17   :  { %386 = vmatpush1.bf16.msra.mxu0 %v615_v12  ;;  %v632_v44 = vld [vmem:[%s830_s5 + $0x60] ss:$20 sps:$4 sm:$0xff]   ;;  %v211_v47 = vshrl.u32 %v210_v46, 7  ;;  %v661_v53 = vmov 1983009808   ;;  %s662_s5 = smov [#allocation2]  }
  0x18   :  { %387 = vmatprep.subr.bf16.mxu0 %v623_v15  ;;  %v208_v50 = vld [vmem:[%s831_s6] sm:$0x1f]  ;;  %v477_v54 = vunpack.c.l.s4 %v661_v53  ;;  %s508_s6 = sshll.u32 %s662_s5, 4  ;;  %s509_s6 = int_to_ptr.vmem [resolvable:$true] %s508_s6 }
  0x19   :  { %v212_v48 = vsub.s32 0, %v211_v47  ;;  %v220_v49 = vsub.s32 2, %v211_v47  ;;  %v216_v51 = vsub.s32 1, %v211_v47  ;;  %v224_v52 = vsub.s32 3, %v211_v47  ;;  %s634_s30 = scalar_lea.vmem %s509_s6, 160  ;;  %p639_p1 = scmp.lt.s32.totalorder %s509_s6, %s509_s6 }
  0x1a   :  { %v478_v61 = vunpack.c.0.s8 %v477_v54  ;;  %p635_p0 = scmp.ne.s32.totalorder %s509_s6, %s634_s30  ;;  %p640_p2 = scmp.lt.s32.totalorder %s634_s30, %s634_s30 }
  0x1b   :  { %388 = vmatpush1.bf16.msra.mxu0 %v621_v14  ;;  %v213_v55 = vrot.slane %v208_v50, %v212_v48  ;;  %v221_v56 = vrot.slane %v208_v50, %v220_v49  ;;  %v217_v57 = vrot.slane %v208_v50, %v216_v51  ;;  %v225_v58 = vrot.slane %v208_v50, %v224_v52 }
  0x1c   :  { %389 = vmatprep.subr.bf16.mxu0 %v629_v31  ;;  %v481_v11 = vsub.s32 %v478_v61, %v211_v47  ;;  %p641_p3 = por %p640_p2, %p639_p1 }
  0x1e   :  { %p642_p4 = pnand %p641_p3, %p635_p0 }
  0x1f   :  { %390 = vmatpush1.bf16.msra.mxu0 %v627_v32 }
  0xe4   :  { %v107_v17 = vpop.f32.mrb[0].mxu0 }
  0xe5   :  { %v108_v18 = vadd.f32 %v516_v16, %v107_v17  ;;  %v573_v19 = vpop.f32.mrb[1].mxu0  ;;  %v228_v17 = vsub.s32 4, %v211_v47 }
  0xe6   :  { %v110_v20 = vpop.f32.mrb[2].mxu0 }
  0xe7   :  { %v113_v21 = vmax.f32 %v108_v18, 0.0  ;;  %v574_v22 = vpop.f32.mrb[3].mxu0  ;;  %v229_v19 = vrot.slane %v208_v50, %v228_v17 }
  0xe9   :  { %v114_v24 = vpack.c.bf16 %v113_v21, %v113_v21 }
  0xeb   :  { %580 = vmatmul.mubr.msk.bf16.vlgmr.msra.gmra.mrb[0].mxu1 %vm138_vm2, %v114_v24 }
  0xec   :  { %343 = vmatpush1.bf16.msra.mxu1 %v606_v23  ;;  %374 = vmatprep.mubr.bf16.mxu1 %v660_v33 }
  0xed   :  { %344 = vmatprep.subr.bf16.mxu1 %v614_v25 }
  0xf0   :  { %345 = vmatpush1.bf16.msra.mxu1 %v612_v26 }
  0xf1   :  { %346 = vmatprep.subr.bf16.mxu1 %v620_v27 }
  0xf4   :  { %347 = vmatpush1.bf16.msra.mxu1 %v618_v28 }
  0xf5   :  { %348 = vmatprep.subr.bf16.mxu1 %v626_v29 }
  0xf8   :  { %349 = vmatpush1.bf16.msra.mxu1 %v624_v30 }
  0xf9   :  { %583 = vmatprep.subr.bf16.mxu1 %v658_v1 }
 0x1be   :  { %v176_v35 = vpop.f32.mrb[0].mxu1 }
 0x1bf   :  { %v177_v36 = vadd.f32 %v522_v34, %v176_v35  ;;  %v581_v37 = vpop.f32.mrb[1].mxu1 }
 0x1c0   :  { %v179_v38 = vpop.f32.mrb[2].mxu1 }
 0x1c1   :  { %v182_v39 = vmax.f32 %v177_v36, 0.0  ;;  %v582_v40 = vpop.f32.mrb[3].mxu1 }
 0x1c3   :  { %v183_v42 = vpack.c.bf16 %v182_v39, %v182_v39 }
 0x1c5   :  { %546 = vmatmul.mubr.msk.bf16.vlgmr.msra.gmra.mrb[4].mxu1 %vm69_vm1, %v183_v42  ;;  %547 = vmatmul.mubr.msk.bf16.vlgmr.msra.gmra.mrb[4].mxu0 %vm69_vm1, %v183_v42 }
 0x1c6   :  { %584 = vmatpush3.bf16.msra.mxu1 %v630_v41  ;;  %591 = vmatprep.mubr.msk.bf16.mxu1 %vm659_vm0, %v658_v1 }
 0x1c7   :  { %585 = vmatprep.subr.bf16.mxu1 %v658_v1 }
 0x1ca   :  { %586 = vmatpush3.bf16.msra.mxu1 %v631_v43 }
 0x1cb   :  { %587 = vmatprep.subr.bf16.mxu1 %v658_v1 }
 0x1ce   :  { %588 = vmatpush3.bf16.msra.mxu1 %v632_v44 }
 0x1cf   :  { %589 = vmatprep.subr.bf16.mxu1 %v658_v1 }
 0x1d2   :  { %590 = vmatpush3.bf16.msra.mxu1 %v633_v45 }
 0x1d5   :  { %592 = vmatmul.mubr.msk.bf16.vlgmr.msra.gmra.mrb[8].mxu1 %vm69_vm1, %v183_v42 }
 0x298   :  { %v376_v59 = vpop.f32.mrb[4].mxu1  ;;  %v417_v60 = vpop.f32.mrb[4].mxu0 }
 0x299   :  { %v377_v62 = vadd.f32 %v376_v59, %v213_v55  ;;  %v418_v63 = vadd.f32 %v417_v60, %v221_v56  ;;  %v378_v0 = vpop.f32.mrb[5].mxu1  ;;  %v419_v1 = vpop.f32.mrb[5].mxu0 }
 0x29a   :  { %v379_v2 = vadd.f32 %v378_v0, %v217_v57  ;;  %v420_v3 = vadd.f32 %v419_v1, %v225_v58  ;;  %v380_v4 = vpop.f32.mrb[6].mxu1  ;;  %v421_v5 = vpop.f32.mrb[6].mxu0 }
 0x29b   :  { %v464_v6 = vmax.f32 %v377_v62, 0.0  ;;  %v466_v7 = vmax.f32 %v418_v63, 0.0  ;;  %v381_v8 = vpop.f32.mrb[7].mxu1  ;;  %v422_v9 = vpop.f32.mrb[7].mxu0 }
 0x29c   :  { %v465_v10 = vmax.f32 %v379_v2, 0.0  ;;  %v467_v12 = vmax.f32 %v420_v3, 0.0 }
 0x29e   :  { %v474_v13 = vcombine.low %v464_v6, %v465_v10  ;;  %v475_v14 = vcombine.low %v466_v7, %v467_v12 }
 0x2a0   :  { %v482_v15 = vrot.slane %v474_v13, %v481_v11  ;;  %v489_v16 = vrot.slane %v475_v14, %v481_v11 }
 0x2a2   :  { %v490_v18 = vcombine.low %v482_v15, %v489_v16 }
 0x2a4   :  { %500 = vst [vmem:[#allocation2] sm:$0xff] %v490_v18 }
 0x2a8   :  { %v458_v20 = vpop.f32.mrb[8].mxu1 }
 0x2a9   :  { %v459_v21 = vadd.f32 %v458_v20, %v229_v19  ;;  %v593_v22 = vpop.f32.mrb[9].mxu1 }
 0x2aa   :  { %v461_v23 = vpop.f32.mrb[10].mxu1 }
 0x2ab   :  { %v468_v24 = vmax.f32 %v459_v21, 0.0  ;;  %v594_v25 = vpop.f32.mrb[11].mxu1 }
 0x2ad   :  { %549 = vst.sshfl [vmem:[#allocation2 + $0x8] sm:$0x3 pattern:$0x76325410] %v468_v24 }
 0x2ae   :  { %645 = shalt.err (!%p642_p4)
}
 0x2af   :  { %s646_s2 = scalar_lea.hbm %s832_s7, 160 }
 0x2b0   :  { %p647_p5 = scmp.ne.s32.totalorder %s832_s7, %s646_s2  ;;  %p650_p6 = scmp.lt.u32.totalorder %s646_s2, %s832_s7 }
 0x2b2   :  { %p652_p7 = pnand %p650_p6, %p647_p5 }
 0x2b4   :  { %655 = shalt.err (!%p652_p7)
}
 0x2b5   :  { %511 = dma.vmem_to_hbm [thread:$0]  %s509_s6, 160, %s832_s7, [#allocation3]  }
 0x2b6   :  { %656 = dma.done.wait [#allocation3], 160  }
 0x2b7   :  { %657 = vsyncadd [#allocation3], 4294967136 }
 0x2b8   :  { %515 = vsyncpa [#allocation3], 1 }

</bundles_post_ra>
